<compile_context>
chip_gen: v7x
topology: tpu7x:2x2x1
jax: 0.10.0
libtpu: 0.0.40
codegen_flags: <defaults>
</compile_context>

<pallas_src>
import math
import functools

import jax
import jax.numpy as jnp
from jax import lax
from jax.experimental import pallas as pl
from jax.experimental.pallas import tpu as pltpu

T_CONV = 12  # fixed by nn.Conv2d(12, 12, (1, 3))


def _layernorm(y, gamma, beta, eps=1e-5):
    mu = jnp.mean(y, axis=-1, keepdims=True)
    var = jnp.mean((y - mu) ** 2, axis=-1, keepdims=True)
    return (y - mu) * lax.rsqrt(var + eps) * gamma + beta


def fused_transform_kernel(x_ref, convw_ref, convb_ref, mats_ref, vecs_ref,
                           xout_ref, shout_ref, *, num_layer):
    """One program = one (batch, node-block); runs ALL Transform layers in VMEM.

    x_ref     : (1, NB, T, C)    node-major activations for this block
    convw_ref : (L, 2, T, 3T)    fused conv taps; w[l, q/k, o, k*T+i] = torch w[o,i,0,k]
    convb_ref : (L, 2, T, 1)     conv biases
    mats_ref  : (L, 3, C, C)     [Wv, Wf1, Wf2] in (in, out) layout (y = x @ W + b)
    vecs_ref  : (L, 7, C)        [bv, bf1, bf2, ln_g, ln_b, lnff_g, lnff_b]
    """
    x = x_ref[0].astype(jnp.float32)           # (NB, T, C)
    nb, t, c = x.shape
    cm2 = c - 2                                # Conv2d kernel (1,3), no padding
    inv_sqrt_c = 1.0 / math.sqrt(c)            # reference scales by sqrt(C) (= x.shape[3])

    # Layer 0 of the reference skips the (shape-mismatched / all-zero) buffer add,
    # which is exactly "history = zeros" here; it accumulates across layers after that.
    score = jnp.zeros((nb, t, t), jnp.float32)

    for l in range(num_layer):                 # static unroll (num_layer is small)
        wq = convw_ref[l, 0]                   # (T, 3T)
        wk = convw_ref[l, 1]
        bq = convb_ref[l, 0]                   # (T, 1)
        bk = convb_ref[l, 1]
        wv = mats_ref[l, 0]                    # (C, C)
        wf1 = mats_ref[l, 1]
        wf2 = mats_ref[l, 2]
        vl = vecs_ref[l]                       # (7, C)
        bv, bf1, bf2 = vl[0:1], vl[1:2], vl[2:3]
        ln_g, ln_b = vl[3:4], vl[4:5]
        lnff_g, lnff_b = vl[5:6], vl[6:7]

        xf = x.reshape(nb * t, c)              # (NB*T, C) — big-GEMM view

        # value = Linear(C, C)(x): single GEMM over all nodes/time steps of the block.
        v = jnp.dot(xf, wv, preferred_element_type=jnp.float32) + bv      # (NB*T, C)

        # conv1 / conv2: 1x3 conv along the feature axis mixing the T channel dim.
        # Fuse the 3 taps into one width-3T contraction (one matmul per projection).
        xs = jnp.concatenate(
            [x[:, :, 0:cm2], x[:, :, 1:cm2 + 1], x[:, :, 2:cm2 + 2]], axis=1)  # (NB,3T,C-2)
        wq_b = jnp.broadcast_to(wq[None], (nb, t, 3 * t))
        wk_b = jnp.broadcast_to(wk[None], (nb, t, 3 * t))
        q = jnp.einsum('ntm,nmj->ntj', wq_b, xs,
                       preferred_element_type=jnp.float32) + bq[None]      # (NB,T,C-2)
        k = jnp.einsum('ntm,nmj->ntj', wk_b, xs,
                       preferred_element_type=jnp.float32) + bk[None]      # (NB,T,C-2)

        # attention over the time axis, batched over the NB nodes of this block
        a = jnp.einsum('ntj,nuj->ntu', q, k,
                       preferred_element_type=jnp.float32) * inv_sqrt_c    # (NB,T,T)
        a = jnp.exp(a - jnp.max(a, axis=-1, keepdims=True))
        a = a * pl.reciprocal(jnp.sum(a, axis=-1, keepdims=True), approx=True)
        a = a + score                       # A = softmax(QK^T/sqrt(C)) + score_his
        score = a                           # score_his <- A (cumulative across layers)

        o = jnp.einsum('ntu,nuc->ntc', a, v.reshape(nb, t, c),
                       preferred_element_type=jnp.float32)                 # (NB,T,C)
        # torch.cat(torch.split(value, b, 0), -1) is a no-op (single split chunk)
        val = o.reshape(nb * t, c) + xf
        val = _layernorm(val, ln_g, ln_b)

        # position-wise FF, again as (NB*T, C) GEMMs
        h = jnp.maximum(jnp.dot(val, wf1, preferred_element_type=jnp.float32) + bf1, 0.0)
        f = jnp.dot(h, wf2, preferred_element_type=jnp.float32) + bf2
        x = _layernorm(f + val, lnff_g, lnff_b).reshape(nb, t, c)

    xout_ref[0] = x.astype(xout_ref.dtype)
    shout_ref[0] = score.astype(shout_ref.dtype)


def fused_transform_layers(x_nt, packed_params, *, node_block):
    """x_nt: (B, N, T, C) node-major. Returns (x_out (B,N,T,C), score_his (B,N,T,T))."""
    conv_w, conv_b, mats, vecs = packed_params
    b, n, t, c = x_nt.shape
    num_layer = conv_w.shape[0]
    nb = node_block
    assert n % nb == 0
    nblk = n // nb

    kernel = functools.partial(fused_transform_kernel, num_layer=num_layer)

    in_specs = [
        pl.BlockSpec((1, nb, t, c), lambda i, j: (i, j, 0, 0)),
        # packed params: one full-array block each, fetched once
        pl.BlockSpec(conv_w.shape, lambda i, j: (0, 0, 0, 0)),
        pl.BlockSpec(conv_b.shape, lambda i, j: (0, 0, 0, 0)),
        pl.BlockSpec(mats.shape, lambda i, j: (0, 0, 0, 0)),
        pl.BlockSpec(vecs.shape, lambda i, j: (0, 0, 0)),
    ]
    out_specs = (
        pl.BlockSpec((1, nb, t, c), lambda i, j: (i, j, 0, 0)),
        pl.BlockSpec((1, nb, t, t), lambda i, j: (i, j, 0, 0)),
    )
    out_shape = (jax.ShapeDtypeStruct((b, n, t, c), jnp.float32),
                 jax.ShapeDtypeStruct((b, n, t, t), jnp.float32))

    fn = pl.pallas_call(
        kernel,
        out_shape=out_shape,
        grid_spec=pltpu.PrefetchScalarGridSpec(
            num_scalar_prefetch=0,
            grid=(b, nblk),
            in_specs=in_specs,
            out_specs=out_specs,
        ),
        compiler_params=pltpu.CompilerParams(
            dimension_semantics=("parallel", "parallel")),  # both axes independent
    )
    return fn(x_nt, conv_w, conv_b, mats, vecs)


def positional_encoding(c, max_len=170):
    position = jnp.arange(max_len, dtype=jnp.float32)[:, None]
    div_term = jnp.exp(jnp.arange(0, c, 2, dtype=jnp.float32)
                       * (-(math.log(10000.0) / c)))
    ang = position * div_term
    pe = jnp.zeros((max_len, c), jnp.float32)
    pe = pe.at[:, 0::2].set(jnp.sin(ang))
    pe = pe.at[:, 1::2].set(jnp.cos(ang))
    return pe


def init_transform_params(key, c):
    """Random per-layer Transform params (our storage conventions, see kernel docstring)."""
    ks = jax.random.split(key, 7)
    s = 0.1
    # fused conv weights (T, 3T): w[o, k*T + i] <-> torch Conv2d weight[o, i, 0, k]
    wq = jax.random.normal(ks[0], (T_CONV, 3 * T_CONV), jnp.float32) * s
    bq = jax.random.normal(ks[1], (T_CONV,), jnp.float32) * s
    wk = jax.random.normal(ks[2], (T_CONV, 3 * T_CONV), jnp.float32) * s
    bk = jax.random.normal(ks[3], (T_CONV,), jnp.float32) * s
    # linear weights stored in (in, out) layout: y = x @ W + b (== torch y = x W^T + b)
    wv = jax.random.normal(ks[4], (c, c), jnp.float32) * s
    wf1 = jax.random.normal(ks[5], (c, c), jnp.float32) * s
    wf2 = jax.random.normal(ks[6], (c, c), jnp.float32) * s
    zeros_c = jnp.zeros((c,), jnp.float32)
    ones_c = jnp.ones((c,), jnp.float32)
    return dict(wq=wq, bq=bq, wk=wk, bk=bk,
                wv=wv, bv=zeros_c,
                wf1=wf1, bf1=zeros_c, wf2=wf2, bf2=zeros_c,
                ln_g=ones_c, ln_b=zeros_c, lnff_g=ones_c, lnff_b=zeros_c)


def pack_layer_params(layer_params):
    """Pack the per-layer params into 4 dense arrays (one DMA each)."""
    conv_w = jnp.stack([jnp.stack([p["wq"], p["wk"]]) for p in layer_params])       # (L,2,T,3T)
    conv_b = jnp.stack([jnp.stack([p["bq"][:, None], p["bk"][:, None]])
                        for p in layer_params])                                     # (L,2,T,1)
    mats = jnp.stack([jnp.stack([p["wv"], p["wf1"], p["wf2"]])
                      for p in layer_params])                                       # (L,3,C,C)
    vecs = jnp.stack([jnp.stack([p["bv"], p["bf1"], p["bf2"], p["ln_g"], p["ln_b"],
                                 p["lnff_g"], p["lnff_b"]]) for p in layer_params]) # (L,7,C)
    return conv_w, conv_b, mats, vecs


def transformer_layer_S_forward(x, layer_params, node_block=8):
    """x: (B, T, N, C) -> (x_out (B, T, N, C), score_his (B, N, T, T)).

    score_his mirrors the module's self.score_his buffer after one forward pass
    (layer 0 starts from zeros, exactly matching the reference's skipped/all-zero add).
    """
    b, t, n, c = x.shape
    # TODO(synk): the original PE buffer is (1, 170, 1, C) and cannot broadcast against
    # T=12 (required by Conv2d(12,...)); we apply the same sin/cos table sliced to T.
    pe = positional_encoding(c)
    x = x + pe[None, :t, None, :]

    x_nt = jnp.transpose(x, (0, 2, 1, 3))        # (B, N, T, C) node-major
    packed = pack_layer_params(layer_params)
    nb = node_block if (n % node_block == 0) else n
    x_out, score_his = fused_transform_layers(x_nt, packed, node_block=nb)
    return jnp.transpose(x_out, (0, 2, 1, 3)), score_his


def _reference_forward(x, layer_params):
    """Pure-JAX reference of the same forward pass (for a sanity check)."""
    b, t, n, c = x.shape
    pe = positional_encoding(c)
    x = x + pe[None, :t, None, :]
    xn = jnp.transpose(x, (0, 2, 1, 3))          # (B, N, T, C)
    score = jnp.zeros((b, n, t, t), jnp.float32)
    for p in layer_params:
        xs = jnp.concatenate([xn[..., 0:c - 2], xn[..., 1:c - 1], xn[..., 2:c]], axis=2)
        q = jnp.einsum('tm,bnmj->bntj', p["wq"], xs) + p["bq"][None, None, :, None]
        k = jnp.einsum('tm,bnmj->bntj', p["wk"], xs) + p["bk"][None, None, :, None]
        v = jnp.einsum('bntc,cd->bntd', xn, p["wv"]) + p["bv"]
        a = jnp.einsum('bntj,bnuj->bntu', q, k) / (c ** 0.5)
        a = jax.nn.softmax(a, axis=-1) + score
        score = a
        o = jnp.einsum('bntu,bnud->bntd', a, v)
        val = _layernorm(o + xn, p["ln_g"], p["ln_b"])
        h = jnp.maximum(jnp.einsum('bntc,cd->bntd', val, p["wf1"]) + p["bf1"], 0.0)
        f = jnp.einsum('bntc,cd->bntd', h, p["wf2"]) + p["bf2"]
        xn = _layernorm(f + val, p["lnff_g"], p["lnff_b"])
    return jnp.transpose(xn, (0, 2, 1, 3)), score


if __name__ == "__main__":
    B, T, N, C = 2, 12, 16, 32   # T must be 12 (conv channel count); C = dim_out
    NUM_LAYER = 2

    key = jax.random.PRNGKey(0)
    kx, kp = jax.random.split(key)
    x = jax.random.normal(kx, (B, T, N, C), jnp.float32)
    layer_keys = jax.random.split(kp, NUM_LAYER)
    layer_params = [init_transform_params(k, C) for k in layer_keys]

    out, score_his = transformer_layer_S_forward(x, layer_params)
    out = jax.block_until_ready(out)
    assert out.shape == (B, T, N, C) and out.dtype == jnp.float32
    assert score_his.shape == (B, N, T, T)

    # Sanity check against a pure-JAX reference (loose tolerance: the kernel's softmax
    # normalization uses the EUP approximate reciprocal).
    ref_out, ref_score = _reference_forward(x, layer_params)
    err = float(jnp.max(jnp.abs(out - ref_out)))
    serr = float(jnp.max(jnp.abs(score_his - ref_score)))
    assert err < 1e-1 and serr < 1e-1, (err, serr)

    print("KERNEL_OK")
</pallas_src>

<mosaic_0001>
module attributes {stable_mosaic.version = 11 : i64} {
  func.func @fused_transform_kernel(%arg0: i32, %arg1: i32, %arg2: memref<1x8x12x32xf32, #tpu.memory_space<vmem>>, %arg3: memref<2x2x12x36xf32, #tpu.memory_space<vmem>>, %arg4: memref<2x2x12x1xf32, #tpu.memory_space<vmem>>, %arg5: memref<2x3x32x32xf32, #tpu.memory_space<vmem>>, %arg6: memref<2x7x32xf32, #tpu.memory_space<vmem>>, %arg7: memref<1x8x12x32xf32, #tpu.memory_space<vmem>>, %arg8: memref<1x8x12x12xf32, #tpu.memory_space<vmem>>) attributes {dimension_semantics = [#tpu.dimension_semantics<parallel>, #tpu.dimension_semantics<parallel>], iteration_bounds = array<i64: 2, 2>, scalar_prefetch = 0 : i64, scratch_operands = 0 : i64, tpu.core_type = #tpu.core_type<tc>, window_params = [{transform_indices = @transform_0, window_bounds = array<i64: 1, 8, 12, 32>}, {pipeline_mode = #tpu.pipeline_mode<synchronous>, transform_indices = @transform_1, window_bounds = array<i64: 2, 2, 12, 36>}, {pipeline_mode = #tpu.pipeline_mode<synchronous>, transform_indices = @transform_2, window_bounds = array<i64: 2, 2, 12, 1>}, {pipeline_mode = #tpu.pipeline_mode<synchronous>, transform_indices = @transform_3, window_bounds = array<i64: 2, 3, 32, 32>}, {pipeline_mode = #tpu.pipeline_mode<synchronous>, transform_indices = @transform_4, window_bounds = array<i64: 2, 7, 32>}, {transform_indices = @transform_5, window_bounds = array<i64: 1, 8, 12, 32>}, {transform_indices = @transform_6, window_bounds = array<i64: 1, 8, 12, 12>}]} {
    %c0 = arith.constant 0 : index
    %c0_0 = arith.constant 0 : index
    %c0_1 = arith.constant 0 : index
    %c0_2 = arith.constant 0 : index
    %0 = vector.load %arg2[%c0, %c0_0, %c0_1, %c0_2] : memref<1x8x12x32xf32, #tpu.memory_space<vmem>>, vector<1x8x12x32xf32>
    %1 = vector.shape_cast %0 : vector<1x8x12x32xf32> to vector<8x12x32xf32>
    %cst = arith.constant 0.000000e+00 : f32
    %2 = vector.broadcast %cst : f32 to vector<8x12x12xf32>
    %c0_3 = arith.constant 0 : index
    %c0_4 = arith.constant 0 : index
    %c0_5 = arith.constant 0 : index
    %c0_6 = arith.constant 0 : index
    %3 = vector.load %arg3[%c0_3, %c0_4, %c0_5, %c0_6] : memref<2x2x12x36xf32, #tpu.memory_space<vmem>>, vector<1x1x12x36xf32>
    %4 = vector.shape_cast %3 : vector<1x1x12x36xf32> to vector<12x36xf32>
    %c0_7 = arith.constant 0 : index
    %c1 = arith.constant 1 : index
    %c0_8 = arith.constant 0 : index
    %c0_9 = arith.constant 0 : index
    %5 = vector.load %arg3[%c0_7, %c1, %c0_8, %c0_9] : memref<2x2x12x36xf32, #tpu.memory_space<vmem>>, vector<1x1x12x36xf32>
    %6 = vector.shape_cast %5 : vector<1x1x12x36xf32> to vector<12x36xf32>
    %c0_10 = arith.constant 0 : index
    %c0_11 = arith.constant 0 : index
    %c0_12 = arith.constant 0 : index
    %c0_13 = arith.constant 0 : index
    %7 = vector.load %arg4[%c0_10, %c0_11, %c0_12, %c0_13] : memref<2x2x12x1xf32, #tpu.memory_space<vmem>>, vector<1x1x12x1xf32>
    %8 = vector.shape_cast %7 : vector<1x1x12x1xf32> to vector<12x1xf32>
    %c0_14 = arith.constant 0 : index
    %c1_15 = arith.constant 1 : index
    %c0_16 = arith.constant 0 : index
    %c0_17 = arith.constant 0 : index
    %9 = vector.load %arg4[%c0_14, %c1_15, %c0_16, %c0_17] : memref<2x2x12x1xf32, #tpu.memory_space<vmem>>, vector<1x1x12x1xf32>
    %10 = vector.shape_cast %9 : vector<1x1x12x1xf32> to vector<12x1xf32>
    %c0_18 = arith.constant 0 : index
    %c0_19 = arith.constant 0 : index
    %c0_20 = arith.constant 0 : index
    %c0_21 = arith.constant 0 : index
    %11 = vector.load %arg5[%c0_18, %c0_19, %c0_20, %c0_21] : memref<2x3x32x32xf32, #tpu.memory_space<vmem>>, vector<1x1x32x32xf32>
    %12 = vector.shape_cast %11 : vector<1x1x32x32xf32> to vector<32x32xf32>
    %c0_22 = arith.constant 0 : index
    %c1_23 = arith.constant 1 : index
    %c0_24 = arith.constant 0 : index
    %c0_25 = arith.constant 0 : index
    %13 = vector.load %arg5[%c0_22, %c1_23, %c0_24, %c0_25] : memref<2x3x32x32xf32, #tpu.memory_space<vmem>>, vector<1x1x32x32xf32>
    %14 = vector.shape_cast %13 : vector<1x1x32x32xf32> to vector<32x32xf32>
    %c0_26 = arith.constant 0 : index
    %c2 = arith.constant 2 : index
    %c0_27 = arith.constant 0 : index
    %c0_28 = arith.constant 0 : index
    %15 = vector.load %arg5[%c0_26, %c2, %c0_27, %c0_28] : memref<2x3x32x32xf32, #tpu.memory_space<vmem>>, vector<1x1x32x32xf32>
    %16 = vector.shape_cast %15 : vector<1x1x32x32xf32> to vector<32x32xf32>
    %c0_29 = arith.constant 0 : index
    %c0_30 = arith.constant 0 : index
    %c0_31 = arith.constant 0 : index
    %17 = vector.load %arg6[%c0_29, %c0_30, %c0_31] : memref<2x7x32xf32, #tpu.memory_space<vmem>>, vector<1x7x32xf32>
    %18 = vector.shape_cast %17 : vector<1x7x32xf32> to vector<7x32xf32>
    %19 = vector.extract_strided_slice %18 {offsets = [0, 0], sizes = [1, 32], strides = [1, 1]} : vector<7x32xf32> to vector<1x32xf32>
    %20 = vector.extract_strided_slice %18 {offsets = [1, 0], sizes = [1, 32], strides = [1, 1]} : vector<7x32xf32> to vector<1x32xf32>
    %21 = vector.extract_strided_slice %18 {offsets = [2, 0], sizes = [1, 32], strides = [1, 1]} : vector<7x32xf32> to vector<1x32xf32>
    %22 = vector.extract_strided_slice %18 {offsets = [3, 0], sizes = [1, 32], strides = [1, 1]} : vector<7x32xf32> to vector<1x32xf32>
    %23 = vector.extract_strided_slice %18 {offsets = [4, 0], sizes = [1, 32], strides = [1, 1]} : vector<7x32xf32> to vector<1x32xf32>
    %24 = vector.extract_strided_slice %18 {offsets = [5, 0], sizes = [1, 32], strides = [1, 1]} : vector<7x32xf32> to vector<1x32xf32>
    %25 = vector.extract_strided_slice %18 {offsets = [6, 0], sizes = [1, 32], strides = [1, 1]} : vector<7x32xf32> to vector<1x32xf32>
    %26 = vector.shape_cast %1 : vector<8x12x32xf32> to vector<96x32xf32>
    %cst_32 = arith.constant dense<0.000000e+00> : vector<96x32xf32>
    %27 = tpu.matmul %26, %12, %cst_32 {dimension_numbers = #tpu.dot_dimension_numbers<[1], [0], [0], [1], [0, 0, 1, 1], [], []>} : vector<96x32xf32>, vector<32x32xf32>, vector<96x32xf32> -> vector<96x32xf32>
    %28 = vector.broadcast %19 : vector<1x32xf32> to vector<96x32xf32>
    %29 = arith.addf %27, %28 : vector<96x32xf32>
    %30 = vector.extract_strided_slice %1 {offsets = [0, 0, 0], sizes = [8, 12, 30], strides = [1, 1, 1]} : vector<8x12x32xf32> to vector<8x12x30xf32>
    %31 = vector.extract_strided_slice %1 {offsets = [0, 0, 1], sizes = [8, 12, 30], strides = [1, 1, 1]} : vector<8x12x32xf32> to vector<8x12x30xf32>
    %32 = vector.extract_strided_slice %1 {offsets = [0, 0, 2], sizes = [8, 12, 30], strides = [1, 1, 1]} : vector<8x12x32xf32> to vector<8x12x30xf32>
    %33 = tpu.concatenate %30, %31, %32 in 1 : vector<8x12x30xf32>, vector<8x12x30xf32>, vector<8x12x30xf32> -> vector<8x36x30xf32>
    %34 = vector.shape_cast %4 : vector<12x36xf32> to vector<1x12x36xf32>
    %35 = vector.shape_cast %34 : vector<1x12x36xf32> to vector<1x12x36xf32>
    %36 = vector.broadcast %35 : vector<1x12x36xf32> to vector<8x12x36xf32>
    %37 = vector.shape_cast %6 : vector<12x36xf32> to vector<1x12x36xf32>
    %38 = vector.shape_cast %37 : vector<1x12x36xf32> to vector<1x12x36xf32>
    %39 = vector.broadcast %38 : vector<1x12x36xf32> to vector<8x12x36xf32>
    "tpu.trace_start"() <{level = 10 : i32, message = "ntm,nmj->ntj"}> : () -> ()
    %cst_33 = arith.constant dense<0.000000e+00> : vector<8x12x30xf32>
    %40 = tpu.matmul %36, %33, %cst_33 {dimension_numbers = #tpu.dot_dimension_numbers<[2], [1], [1], [2], [0, 0, 0, 1, 1, 2], [0], [0]>} : vector<8x12x36xf32>, vector<8x36x30xf32>, vector<8x12x30xf32> -> vector<8x12x30xf32>
    "tpu.trace_stop"() : () -> ()
    %41 = vector.shape_cast %8 : vector<12x1xf32> to vector<1x12x1xf32>
    %42 = vector.broadcast %41 : vector<1x12x1xf32> to vector<8x12x30xf32>
    %43 = arith.addf %40, %42 : vector<8x12x30xf32>
    "tpu.trace_start"() <{level = 10 : i32, message = "ntm,nmj->ntj"}> : () -> ()
    %cst_34 = arith.constant dense<0.000000e+00> : vector<8x12x30xf32>
    %44 = tpu.matmul %39, %33, %cst_34 {dimension_numbers = #tpu.dot_dimension_numbers<[2], [1], [1], [2], [0, 0, 0, 1, 1, 2], [0], [0]>} : vector<8x12x36xf32>, vector<8x36x30xf32>, vector<8x12x30xf32> -> vector<8x12x30xf32>
    "tpu.trace_stop"() : () -> ()
    %45 = vector.shape_cast %10 : vector<12x1xf32> to vector<1x12x1xf32>
    %46 = vector.broadcast %45 : vector<1x12x1xf32> to vector<8x12x30xf32>
    %47 = arith.addf %44, %46 : vector<8x12x30xf32>
    "tpu.trace_start"() <{level = 10 : i32, message = "ntj,nuj->ntu"}> : () -> ()
    %cst_35 = arith.constant dense<0.000000e+00> : vector<8x12x12xf32>
    %48 = tpu.matmul %43, %47, %cst_35 {dimension_numbers = #tpu.dot_dimension_numbers<[2], [2], [1], [1], [0, 0, 0, 1, 1, 1], [0], [0]>} : vector<8x12x30xf32>, vector<8x12x30xf32>, vector<8x12x12xf32> -> vector<8x12x12xf32>
    "tpu.trace_stop"() : () -> ()
    %cst_36 = arith.constant 0.176776692 : f32
    %49 = vector.broadcast %cst_36 : f32 to vector<8x12x12xf32>
    %50 = arith.mulf %48, %49 : vector<8x12x12xf32>
    %cst_37 = arith.constant dense<0xFF800000> : vector<8x12xf32>
    %51 = vector.multi_reduction <maximumf>, %50, %cst_37 [2] : vector<8x12x12xf32> to vector<8x12xf32>
    %52 = vector.shape_cast %51 : vector<8x12xf32> to vector<8x12x1xf32>
    %53 = vector.broadcast %52 : vector<8x12x1xf32> to vector<8x12x12xf32>
    %54 = arith.subf %50, %53 : vector<8x12x12xf32>
    %55 = math.exp %54 : vector<8x12x12xf32>
    %cst_38 = arith.constant dense<0.000000e+00> : vector<8x12xf32>
    %56 = vector.multi_reduction <add>, %55, %cst_38 [2] : vector<8x12x12xf32> to vector<8x12xf32>
    %57 = vector.shape_cast %56 : vector<8x12xf32> to vector<8x12x1xf32>
    %58 = tpu.reciprocal %57 {approx = true} : vector<8x12x1xf32> -> vector<8x12x1xf32>
    %59 = vector.broadcast %58 : vector<8x12x1xf32> to vector<8x12x12xf32>
    %60 = arith.mulf %55, %59 : vector<8x12x12xf32>
    %61 = arith.addf %60, %2 : vector<8x12x12xf32>
    %62 = vector.shape_cast %29 : vector<96x32xf32> to vector<8x12x32xf32>
    "tpu.trace_start"() <{level = 10 : i32, message = "ntu,nuc->ntc"}> : () -> ()
    %cst_39 = arith.constant dense<0.000000e+00> : vector<8x12x32xf32>
    %63 = tpu.matmul %61, %62, %cst_39 {dimension_numbers = #tpu.dot_dimension_numbers<[2], [1], [1], [2], [0, 0, 0, 1, 1, 2], [0], [0]>} : vector<8x12x12xf32>, vector<8x12x32xf32>, vector<8x12x32xf32> -> vector<8x12x32xf32>
    "tpu.trace_stop"() : () -> ()
    %64 = vector.shape_cast %63 : vector<8x12x32xf32> to vector<96x32xf32>
    %65 = arith.addf %64, %26 : vector<96x32xf32>
    %cst_40 = arith.constant dense<0.000000e+00> : vector<96xf32>
    %66 = vector.multi_reduction <add>, %65, %cst_40 [1] : vector<96x32xf32> to vector<96xf32>
    %67 = vector.shape_cast %66 : vector<96xf32> to vector<96x1xf32>
    %cst_41 = arith.constant 3.200000e+01 : f32
    %68 = vector.broadcast %cst_41 : f32 to vector<96x1xf32>
    %69 = arith.divf %67, %68 : vector<96x1xf32>
    %70 = vector.broadcast %69 : vector<96x1xf32> to vector<96x32xf32>
    %71 = arith.subf %65, %70 : vector<96x32xf32>
    %72 = arith.mulf %71, %71 : vector<96x32xf32>
    %cst_42 = arith.constant dense<0.000000e+00> : vector<96xf32>
    %73 = vector.multi_reduction <add>, %72, %cst_42 [1] : vector<96x32xf32> to vector<96xf32>
    %74 = vector.shape_cast %73 : vector<96xf32> to vector<96x1xf32>
    %cst_43 = arith.constant 3.200000e+01 : f32
    %75 = vector.broadcast %cst_43 : f32 to vector<96x1xf32>
    %76 = arith.divf %74, %75 : vector<96x1xf32>
    %77 = vector.broadcast %69 : vector<96x1xf32> to vector<96x32xf32>
    %78 = arith.subf %65, %77 : vector<96x32xf32>
    %cst_44 = arith.constant 9.99999974E-6 : f32
    %79 = vector.broadcast %cst_44 : f32 to vector<96x1xf32>
    %80 = arith.addf %76, %79 : vector<96x1xf32>
    %81 = math.rsqrt %80 : vector<96x1xf32>
    %82 = vector.broadcast %81 : vector<96x1xf32> to vector<96x32xf32>
    %83 = arith.mulf %78, %82 : vector<96x32xf32>
    %84 = vector.broadcast %22 : vector<1x32xf32> to vector<96x32xf32>
    %85 = arith.mulf %83, %84 : vector<96x32xf32>
    %86 = vector.broadcast %23 : vector<1x32xf32> to vector<96x32xf32>
    %87 = arith.addf %85, %86 : vector<96x32xf32>
    %cst_45 = arith.constant dense<0.000000e+00> : vector<96x32xf32>
    %88 = tpu.matmul %87, %14, %cst_45 {dimension_numbers = #tpu.dot_dimension_numbers<[1], [0], [0], [1], [0, 0, 1, 1], [], []>} : vector<96x32xf32>, vector<32x32xf32>, vector<96x32xf32> -> vector<96x32xf32>
    %89 = vector.broadcast %20 : vector<1x32xf32> to vector<96x32xf32>
    %90 = arith.addf %88, %89 : vector<96x32xf32>
    %cst_46 = arith.constant 0.000000e+00 : f32
    %91 = vector.broadcast %cst_46 : f32 to vector<96x32xf32>
    %92 = arith.maximumf %90, %91 : vector<96x32xf32>
    %cst_47 = arith.constant dense<0.000000e+00> : vector<96x32xf32>
    %93 = tpu.matmul %92, %16, %cst_47 {dimension_numbers = #tpu.dot_dimension_numbers<[1], [0], [0], [1], [0, 0, 1, 1], [], []>} : vector<96x32xf32>, vector<32x32xf32>, vector<96x32xf32> -> vector<96x32xf32>
    %94 = vector.broadcast %21 : vector<1x32xf32> to vector<96x32xf32>
    %95 = arith.addf %93, %94 : vector<96x32xf32>
    %96 = arith.addf %95, %87 : vector<96x32xf32>
    %cst_48 = arith.constant dense<0.000000e+00> : vector<96xf32>
    %97 = vector.multi_reduction <add>, %96, %cst_48 [1] : vector<96x32xf32> to vector<96xf32>
    %98 = vector.shape_cast %97 : vector<96xf32> to vector<96x1xf32>
    %cst_49 = arith.constant 3.200000e+01 : f32
    %99 = vector.broadcast %cst_49 : f32 to vector<96x1xf32>
    %100 = arith.divf %98, %99 : vector<96x1xf32>
    %101 = vector.broadcast %100 : vector<96x1xf32> to vector<96x32xf32>
    %102 = arith.subf %96, %101 : vector<96x32xf32>
    %103 = arith.mulf %102, %102 : vector<96x32xf32>
    %cst_50 = arith.constant dense<0.000000e+00> : vector<96xf32>
    %104 = vector.multi_reduction <add>, %103, %cst_50 [1] : vector<96x32xf32> to vector<96xf32>
    %105 = vector.shape_cast %104 : vector<96xf32> to vector<96x1xf32>
    %cst_51 = arith.constant 3.200000e+01 : f32
    %106 = vector.broadcast %cst_51 : f32 to vector<96x1xf32>
    %107 = arith.divf %105, %106 : vector<96x1xf32>
    %108 = vector.broadcast %100 : vector<96x1xf32> to vector<96x32xf32>
    %109 = arith.subf %96, %108 : vector<96x32xf32>
    %cst_52 = arith.constant 9.99999974E-6 : f32
    %110 = vector.broadcast %cst_52 : f32 to vector<96x1xf32>
    %111 = arith.addf %107, %110 : vector<96x1xf32>
    %112 = math.rsqrt %111 : vector<96x1xf32>
    %113 = vector.broadcast %112 : vector<96x1xf32> to vector<96x32xf32>
    %114 = arith.mulf %109, %113 : vector<96x32xf32>
    %115 = vector.broadcast %24 : vector<1x32xf32> to vector<96x32xf32>
    %116 = arith.mulf %114, %115 : vector<96x32xf32>
    %117 = vector.broadcast %25 : vector<1x32xf32> to vector<96x32xf32>
    %118 = arith.addf %116, %117 : vector<96x32xf32>
    %119 = vector.shape_cast %118 : vector<96x32xf32> to vector<8x12x32xf32>
    %c1_53 = arith.constant 1 : index
    %c0_54 = arith.constant 0 : index
    %c0_55 = arith.constant 0 : index
    %c0_56 = arith.constant 0 : index
    %120 = vector.load %arg3[%c1_53, %c0_54, %c0_55, %c0_56] : memref<2x2x12x36xf32, #tpu.memory_space<vmem>>, vector<1x1x12x36xf32>
    %121 = vector.shape_cast %120 : vector<1x1x12x36xf32> to vector<12x36xf32>
    %c1_57 = arith.constant 1 : index
    %c1_58 = arith.constant 1 : index
    %c0_59 = arith.constant 0 : index
    %c0_60 = arith.constant 0 : index
    %122 = vector.load %arg3[%c1_57, %c1_58, %c0_59, %c0_60] : memref<2x2x12x36xf32, #tpu.memory_space<vmem>>, vector<1x1x12x36xf32>
    %123 = vector.shape_cast %122 : vector<1x1x12x36xf32> to vector<12x36xf32>
    %c1_61 = arith.constant 1 : index
    %c0_62 = arith.constant 0 : index
    %c0_63 = arith.constant 0 : index
    %c0_64 = arith.constant 0 : index
    %124 = vector.load %arg4[%c1_61, %c0_62, %c0_63, %c0_64] : memref<2x2x12x1xf32, #tpu.memory_space<vmem>>, vector<1x1x12x1xf32>
    %125 = vector.shape_cast %124 : vector<1x1x12x1xf32> to vector<12x1xf32>
    %c1_65 = arith.constant 1 : index
    %c1_66 = arith.constant 1 : index
    %c0_67 = arith.constant 0 : index
    %c0_68 = arith.constant 0 : index
    %126 = vector.load %arg4[%c1_65, %c1_66, %c0_67, %c0_68] : memref<2x2x12x1xf32, #tpu.memory_space<vmem>>, vector<1x1x12x1xf32>
    %127 = vector.shape_cast %126 : vector<1x1x12x1xf32> to vector<12x1xf32>
    %c1_69 = arith.constant 1 : index
    %c0_70 = arith.constant 0 : index
    %c0_71 = arith.constant 0 : index
    %c0_72 = arith.constant 0 : index
    %128 = vector.load %arg5[%c1_69, %c0_70, %c0_71, %c0_72] : memref<2x3x32x32xf32, #tpu.memory_space<vmem>>, vector<1x1x32x32xf32>
    %129 = vector.shape_cast %128 : vector<1x1x32x32xf32> to vector<32x32xf32>
    %c1_73 = arith.constant 1 : index
    %c1_74 = arith.constant 1 : index
    %c0_75 = arith.constant 0 : index
    %c0_76 = arith.constant 0 : index
    %130 = vector.load %arg5[%c1_73, %c1_74, %c0_75, %c0_76] : memref<2x3x32x32xf32, #tpu.memory_space<vmem>>, vector<1x1x32x32xf32>
    %131 = vector.shape_cast %130 : vector<1x1x32x32xf32> to vector<32x32xf32>
    %c1_77 = arith.constant 1 : index
    %c2_78 = arith.constant 2 : index
    %c0_79 = arith.constant 0 : index
    %c0_80 = arith.constant 0 : index
    %132 = vector.load %arg5[%c1_77, %c2_78, %c0_79, %c0_80] : memref<2x3x32x32xf32, #tpu.memory_space<vmem>>, vector<1x1x32x32xf32>
    %133 = vector.shape_cast %132 : vector<1x1x32x32xf32> to vector<32x32xf32>
    %c1_81 = arith.constant 1 : index
    %c0_82 = arith.constant 0 : index
    %c0_83 = arith.constant 0 : index
    %134 = vector.load %arg6[%c1_81, %c0_82, %c0_83] : memref<2x7x32xf32, #tpu.memory_space<vmem>>, vector<1x7x32xf32>
    %135 = vector.shape_cast %134 : vector<1x7x32xf32> to vector<7x32xf32>
    %136 = vector.extract_strided_slice %135 {offsets = [0, 0], sizes = [1, 32], strides = [1, 1]} : vector<7x32xf32> to vector<1x32xf32>
    %137 = vector.extract_strided_slice %135 {offsets = [1, 0], sizes = [1, 32], strides = [1, 1]} : vector<7x32xf32> to vector<1x32xf32>
    %138 = vector.extract_strided_slice %135 {offsets = [2, 0], sizes = [1, 32], strides = [1, 1]} : vector<7x32xf32> to vector<1x32xf32>
    %139 = vector.extract_strided_slice %135 {offsets = [3, 0], sizes = [1, 32], strides = [1, 1]} : vector<7x32xf32> to vector<1x32xf32>
    %140 = vector.extract_strided_slice %135 {offsets = [4, 0], sizes = [1, 32], strides = [1, 1]} : vector<7x32xf32> to vector<1x32xf32>
    %141 = vector.extract_strided_slice %135 {offsets = [5, 0], sizes = [1, 32], strides = [1, 1]} : vector<7x32xf32> to vector<1x32xf32>
    %142 = vector.extract_strided_slice %135 {offsets = [6, 0], sizes = [1, 32], strides = [1, 1]} : vector<7x32xf32> to vector<1x32xf32>
    %143 = vector.shape_cast %119 : vector<8x12x32xf32> to vector<96x32xf32>
    %cst_84 = arith.constant dense<0.000000e+00> : vector<96x32xf32>
    %144 = tpu.matmul %143, %129, %cst_84 {dimension_numbers = #tpu.dot_dimension_numbers<[1], [0], [0], [1], [0, 0, 1, 1], [], []>} : vector<96x32xf32>, vector<32x32xf32>, vector<96x32xf32> -> vector<96x32xf32>
    %145 = vector.broadcast %136 : vector<1x32xf32> to vector<96x32xf32>
    %146 = arith.addf %144, %145 : vector<96x32xf32>
    %147 = vector.extract_strided_slice %119 {offsets = [0, 0, 0], sizes = [8, 12, 30], strides = [1, 1, 1]} : vector<8x12x32xf32> to vector<8x12x30xf32>
    %148 = vector.extract_strided_slice %119 {offsets = [0, 0, 1], sizes = [8, 12, 30], strides = [1, 1, 1]} : vector<8x12x32xf32> to vector<8x12x30xf32>
    %149 = vector.extract_strided_slice %119 {offsets = [0, 0, 2], sizes = [8, 12, 30], strides = [1, 1, 1]} : vector<8x12x32xf32> to vector<8x12x30xf32>
    %150 = tpu.concatenate %147, %148, %149 in 1 : vector<8x12x30xf32>, vector<8x12x30xf32>, vector<8x12x30xf32> -> vector<8x36x30xf32>
    %151 = vector.shape_cast %121 : vector<12x36xf32> to vector<1x12x36xf32>
    %152 = vector.shape_cast %151 : vector<1x12x36xf32> to vector<1x12x36xf32>
    %153 = vector.broadcast %152 : vector<1x12x36xf32> to vector<8x12x36xf32>
    %154 = vector.shape_cast %123 : vector<12x36xf32> to vector<1x12x36xf32>
    %155 = vector.shape_cast %154 : vector<1x12x36xf32> to vector<1x12x36xf32>
    %156 = vector.broadcast %155 : vector<1x12x36xf32> to vector<8x12x36xf32>
    "tpu.trace_start"() <{level = 10 : i32, message = "ntm,nmj->ntj"}> : () -> ()
    %cst_85 = arith.constant dense<0.000000e+00> : vector<8x12x30xf32>
    %157 = tpu.matmul %153, %150, %cst_85 {dimension_numbers = #tpu.dot_dimension_numbers<[2], [1], [1], [2], [0, 0, 0, 1, 1, 2], [0], [0]>} : vector<8x12x36xf32>, vector<8x36x30xf32>, vector<8x12x30xf32> -> vector<8x12x30xf32>
    "tpu.trace_stop"() : () -> ()
    %158 = vector.shape_cast %125 : vector<12x1xf32> to vector<1x12x1xf32>
    %159 = vector.broadcast %158 : vector<1x12x1xf32> to vector<8x12x30xf32>
    %160 = arith.addf %157, %159 : vector<8x12x30xf32>
    "tpu.trace_start"() <{level = 10 : i32, message = "ntm,nmj->ntj"}> : () -> ()
    %cst_86 = arith.constant dense<0.000000e+00> : vector<8x12x30xf32>
    %161 = tpu.matmul %156, %150, %cst_86 {dimension_numbers = #tpu.dot_dimension_numbers<[2], [1], [1], [2], [0, 0, 0, 1, 1, 2], [0], [0]>} : vector<8x12x36xf32>, vector<8x36x30xf32>, vector<8x12x30xf32> -> vector<8x12x30xf32>
    "tpu.trace_stop"() : () -> ()
    %162 = vector.shape_cast %127 : vector<12x1xf32> to vector<1x12x1xf32>
    %163 = vector.broadcast %162 : vector<1x12x1xf32> to vector<8x12x30xf32>
    %164 = arith.addf %161, %163 : vector<8x12x30xf32>
    "tpu.trace_start"() <{level = 10 : i32, message = "ntj,nuj->ntu"}> : () -> ()
    %cst_87 = arith.constant dense<0.000000e+00> : vector<8x12x12xf32>
    %165 = tpu.matmul %160, %164, %cst_87 {dimension_numbers = #tpu.dot_dimension_numbers<[2], [2], [1], [1], [0, 0, 0, 1, 1, 1], [0], [0]>} : vector<8x12x30xf32>, vector<8x12x30xf32>, vector<8x12x12xf32> -> vector<8x12x12xf32>
    "tpu.trace_stop"() : () -> ()
    %cst_88 = arith.constant 0.176776692 : f32
    %166 = vector.broadcast %cst_88 : f32 to vector<8x12x12xf32>
    %167 = arith.mulf %165, %166 : vector<8x12x12xf32>
    %cst_89 = arith.constant dense<0xFF800000> : vector<8x12xf32>
    %168 = vector.multi_reduction <maximumf>, %167, %cst_89 [2] : vector<8x12x12xf32> to vector<8x12xf32>
    %169 = vector.shape_cast %168 : vector<8x12xf32> to vector<8x12x1xf32>
    %170 = vector.broadcast %169 : vector<8x12x1xf32> to vector<8x12x12xf32>
    %171 = arith.subf %167, %170 : vector<8x12x12xf32>
    %172 = math.exp %171 : vector<8x12x12xf32>
    %cst_90 = arith.constant dense<0.000000e+00> : vector<8x12xf32>
    %173 = vector.multi_reduction <add>, %172, %cst_90 [2] : vector<8x12x12xf32> to vector<8x12xf32>
    %174 = vector.shape_cast %173 : vector<8x12xf32> to vector<8x12x1xf32>
    %175 = tpu.reciprocal %174 {approx = true} : vector<8x12x1xf32> -> vector<8x12x1xf32>
    %176 = vector.broadcast %175 : vector<8x12x1xf32> to vector<8x12x12xf32>
    %177 = arith.mulf %172, %176 : vector<8x12x12xf32>
    %178 = arith.addf %177, %61 : vector<8x12x12xf32>
    %179 = vector.shape_cast %146 : vector<96x32xf32> to vector<8x12x32xf32>
    "tpu.trace_start"() <{level = 10 : i32, message = "ntu,nuc->ntc"}> : () -> ()
    %cst_91 = arith.constant dense<0.000000e+00> : vector<8x12x32xf32>
    %180 = tpu.matmul %178, %179, %cst_91 {dimension_numbers = #tpu.dot_dimension_numbers<[2], [1], [1], [2], [0, 0, 0, 1, 1, 2], [0], [0]>} : vector<8x12x12xf32>, vector<8x12x32xf32>, vector<8x12x32xf32> -> vector<8x12x32xf32>
    "tpu.trace_stop"() : () -> ()
    %181 = vector.shape_cast %180 : vector<8x12x32xf32> to vector<96x32xf32>
    %182 = arith.addf %181, %143 : vector<96x32xf32>
    %cst_92 = arith.constant dense<0.000000e+00> : vector<96xf32>
    %183 = vector.multi_reduction <add>, %182, %cst_92 [1] : vector<96x32xf32> to vector<96xf32>
    %184 = vector.shape_cast %183 : vector<96xf32> to vector<96x1xf32>
    %cst_93 = arith.constant 3.200000e+01 : f32
    %185 = vector.broadcast %cst_93 : f32 to vector<96x1xf32>
    %186 = arith.divf %184, %185 : vector<96x1xf32>
    %187 = vector.broadcast %186 : vector<96x1xf32> to vector<96x32xf32>
    %188 = arith.subf %182, %187 : vector<96x32xf32>
    %189 = arith.mulf %188, %188 : vector<96x32xf32>
    %cst_94 = arith.constant dense<0.000000e+00> : vector<96xf32>
    %190 = vector.multi_reduction <add>, %189, %cst_94 [1] : vector<96x32xf32> to vector<96xf32>
    %191 = vector.shape_cast %190 : vector<96xf32> to vector<96x1xf32>
    %cst_95 = arith.constant 3.200000e+01 : f32
    %192 = vector.broadcast %cst_95 : f32 to vector<96x1xf32>
    %193 = arith.divf %191, %192 : vector<96x1xf32>
    %194 = vector.broadcast %186 : vector<96x1xf32> to vector<96x32xf32>
    %195 = arith.subf %182, %194 : vector<96x32xf32>
    %cst_96 = arith.constant 9.99999974E-6 : f32
    %196 = vector.broadcast %cst_96 : f32 to vector<96x1xf32>
    %197 = arith.addf %193, %196 : vector<96x1xf32>
    %198 = math.rsqrt %197 : vector<96x1xf32>
    %199 = vector.broadcast %198 : vector<96x1xf32> to vector<96x32xf32>
    %200 = arith.mulf %195, %199 : vector<96x32xf32>
    %201 = vector.broadcast %139 : vector<1x32xf32> to vector<96x32xf32>
    %202 = arith.mulf %200, %201 : vector<96x32xf32>
    %203 = vector.broadcast %140 : vector<1x32xf32> to vector<96x32xf32>
    %204 = arith.addf %202, %203 : vector<96x32xf32>
    %cst_97 = arith.constant dense<0.000000e+00> : vector<96x32xf32>
    %205 = tpu.matmul %204, %131, %cst_97 {dimension_numbers = #tpu.dot_dimension_numbers<[1], [0], [0], [1], [0, 0, 1, 1], [], []>} : vector<96x32xf32>, vector<32x32xf32>, vector<96x32xf32> -> vector<96x32xf32>
    %206 = vector.broadcast %137 : vector<1x32xf32> to vector<96x32xf32>
    %207 = arith.addf %205, %206 : vector<96x32xf32>
    %cst_98 = arith.constant 0.000000e+00 : f32
    %208 = vector.broadcast %cst_98 : f32 to vector<96x32xf32>
    %209 = arith.maximumf %207, %208 : vector<96x32xf32>
    %cst_99 = arith.constant dense<0.000000e+00> : vector<96x32xf32>
    %210 = tpu.matmul %209, %133, %cst_99 {dimension_numbers = #tpu.dot_dimension_numbers<[1], [0], [0], [1], [0, 0, 1, 1], [], []>} : vector<96x32xf32>, vector<32x32xf32>, vector<96x32xf32> -> vector<96x32xf32>
    %211 = vector.broadcast %138 : vector<1x32xf32> to vector<96x32xf32>
    %212 = arith.addf %210, %211 : vector<96x32xf32>
    %213 = arith.addf %212, %204 : vector<96x32xf32>
    %cst_100 = arith.constant dense<0.000000e+00> : vector<96xf32>
    %214 = vector.multi_reduction <add>, %213, %cst_100 [1] : vector<96x32xf32> to vector<96xf32>
    %215 = vector.shape_cast %214 : vector<96xf32> to vector<96x1xf32>
    %cst_101 = arith.constant 3.200000e+01 : f32
    %216 = vector.broadcast %cst_101 : f32 to vector<96x1xf32>
    %217 = arith.divf %215, %216 : vector<96x1xf32>
    %218 = vector.broadcast %217 : vector<96x1xf32> to vector<96x32xf32>
    %219 = arith.subf %213, %218 : vector<96x32xf32>
    %220 = arith.mulf %219, %219 : vector<96x32xf32>
    %cst_102 = arith.constant dense<0.000000e+00> : vector<96xf32>
    %221 = vector.multi_reduction <add>, %220, %cst_102 [1] : vector<96x32xf32> to vector<96xf32>
    %222 = vector.shape_cast %221 : vector<96xf32> to vector<96x1xf32>
    %cst_103 = arith.constant 3.200000e+01 : f32
    %223 = vector.broadcast %cst_103 : f32 to vector<96x1xf32>
    %224 = arith.divf %222, %223 : vector<96x1xf32>
    %225 = vector.broadcast %217 : vector<96x1xf32> to vector<96x32xf32>
    %226 = arith.subf %213, %225 : vector<96x32xf32>
    %cst_104 = arith.constant 9.99999974E-6 : f32
    %227 = vector.broadcast %cst_104 : f32 to vector<96x1xf32>
    %228 = arith.addf %224, %227 : vector<96x1xf32>
    %229 = math.rsqrt %228 : vector<96x1xf32>
    %230 = vector.broadcast %229 : vector<96x1xf32> to vector<96x32xf32>
    %231 = arith.mulf %226, %230 : vector<96x32xf32>
    %232 = vector.broadcast %141 : vector<1x32xf32> to vector<96x32xf32>
    %233 = arith.mulf %231, %232 : vector<96x32xf32>
    %234 = vector.broadcast %142 : vector<1x32xf32> to vector<96x32xf32>
    %235 = arith.addf %233, %234 : vector<96x32xf32>
    %236 = vector.shape_cast %235 : vector<96x32xf32> to vector<8x12x32xf32>
    %c0_105 = arith.constant 0 : index
    %c0_106 = arith.constant 0 : index
    %c0_107 = arith.constant 0 : index
    %c0_108 = arith.constant 0 : index
    %237 = vector.load %arg7[%c0_105, %c0_106, %c0_107, %c0_108] : memref<1x8x12x32xf32, #tpu.memory_space<vmem>>, vector<1x8x12x32xf32>
    %238 = vector.shape_cast %237 : vector<1x8x12x32xf32> to vector<8x12x32xf32>
    %239 = vector.shape_cast %236 : vector<8x12x32xf32> to vector<1x8x12x32xf32>
    tpu.vector_store %arg7[%c0_105, %c0_106, %c0_107, %c0_108], %239 {strides = array<i32>} : memref<1x8x12x32xf32, #tpu.memory_space<vmem>>, vector<1x8x12x32xf32>,
    %c0_109 = arith.constant 0 : index
    %c0_110 = arith.constant 0 : index
    %c0_111 = arith.constant 0 : index
    %c0_112 = arith.constant 0 : index
    %240 = vector.load %arg8[%c0_109, %c0_110, %c0_111, %c0_112] : memref<1x8x12x12xf32, #tpu.memory_space<vmem>>, vector<1x8x12x12xf32>
    %241 = vector.shape_cast %240 : vector<1x8x12x12xf32> to vector<8x12x12xf32>
    %242 = vector.shape_cast %178 : vector<8x12x12xf32> to vector<1x8x12x12xf32>
    tpu.vector_store %arg8[%c0_109, %c0_110, %c0_111, %c0_112], %242 {strides = array<i32>} : memref<1x8x12x12xf32, #tpu.memory_space<vmem>>, vector<1x8x12x12xf32>,
    return
  }
  func.func @transform_0(%arg0: i32, %arg1: i32) -> (i32, i32, i32, i32) {
    %c0_i32 = arith.constant 0 : i32
    %c0_i32_0 = arith.constant 0 : i32
    %c0_i32_1 = arith.constant 0 : i32
    return %arg0, %arg1, %c0_i32, %c0_i32_0 : i32, i32, i32, i32
  }
  func.func @transform_1(%arg0: i32, %arg1: i32) -> (i32, i32, i32, i32) {
    %c0_i32 = arith.constant 0 : i32
    %c0_i32_0 = arith.constant 0 : i32
    %c0_i32_1 = arith.constant 0 : i32
    %c0_i32_2 = arith.constant 0 : i32
    %c0_i32_3 = arith.constant 0 : i32
    return %c0_i32, %c0_i32_0, %c0_i32_1, %c0_i32_2 : i32, i32, i32, i32
  }
  func.func @transform_2(%arg0: i32, %arg1: i32) -> (i32, i32, i32, i32) {
    %c0_i32 = arith.constant 0 : i32
    %c0_i32_0 = arith.constant 0 : i32
    %c0_i32_1 = arith.constant 0 : i32
    %c0_i32_2 = arith.constant 0 : i32
    %c0_i32_3 = arith.constant 0 : i32
    return %c0_i32, %c0_i32_0, %c0_i32_1, %c0_i32_2 : i32, i32, i32, i32
  }
  func.func @transform_3(%arg0: i32, %arg1: i32) -> (i32, i32, i32, i32) {
    %c0_i32 = arith.constant 0 : i32
    %c0_i32_0 = arith.constant 0 : i32
    %c0_i32_1 = arith.constant 0 : i32
    %c0_i32_2 = arith.constant 0 : i32
    %c0_i32_3 = arith.constant 0 : i32
    return %c0_i32, %c0_i32_0, %c0_i32_1, %c0_i32_2 : i32, i32, i32, i32
  }
  func.func @transform_4(%arg0: i32, %arg1: i32) -> (i32, i32, i32) {
    %c0_i32 = arith.constant 0 : i32
    %c0_i32_0 = arith.constant 0 : i32
    %c0_i32_1 = arith.constant 0 : i32
    %c0_i32_2 = arith.constant 0 : i32
    return %c0_i32, %c0_i32_0, %c0_i32_1 : i32, i32, i32
  }
  func.func @transform_5(%arg0: i32, %arg1: i32) -> (i32, i32, i32, i32) {
    %c0_i32 = arith.constant 0 : i32
    %c0_i32_0 = arith.constant 0 : i32
    %c0_i32_1 = arith.constant 0 : i32
    return %arg0, %arg1, %c0_i32, %c0_i32_0 : i32, i32, i32, i32
  }
  func.func @transform_6(%arg0: i32, %arg1: i32) -> (i32, i32, i32, i32) {
    %c0_i32 = arith.constant 0 : i32
    %c0_i32_0 = arith.constant 0 : i32
    %c0_i32_1 = arith.constant 0 : i32
    return %arg0, %arg1, %c0_i32, %c0_i32_0 : i32, i32, i32, i32
  }
}

</mosaic_0001>

<bundles_post_ra>
// kernel: tpu_custom_call.1
= control target key start
LH: loop header
LB: loop body
LE: loop exit
PB: predicated region body
PF: predicated region fallthrough
CT: control target
= control target key end

     0   :  { %s12309_s21 = smov 0   ;;  %s12311_s22 = smov 0   ;;  %s15469_s0 = inlined_call_operand.vmem [shape: f32[2,16,12,32], index: 0, kind: input, shape index: {}]   ;;  %s15470_s1 = inlined_call_operand.vmem [shape: f32[2,2,12,36], index: 1, kind: input, shape index: {}]   ;;  %s15471_s2 = inlined_call_operand.vmem [shape: f32[2,2,12,1], index: 2, kind: input, shape index: {}]   ;;  %s15472_s3 = inlined_call_operand.vmem [shape: f32[2,3,32,32], index: 3, kind: input, shape index: {}]   ;;  %s15473_s4 = inlined_call_operand.vmem [shape: f32[2,7,32], index: 4, kind: input, shape index: {}]   ;;  %s15474_s5 = inlined_call_operand.vmem [shape: f32[2,16,12,32], index: 5, kind: output, shape index: {0}]   ;;  %s15475_s6 = inlined_call_operand.vmem [shape: f32[2,16,12,12], index: 6, kind: output, shape index: {1}]  }
   0x1   :  { %s12313_s23 = smov 0   ;;  %s12315_s24 = smov 0  }
   0x2   :  { %s12317_s25 = smov 0  }
   0x3 LB: > { %s26_s26 = sadd.s32 1, %s12258_s23  ;;  %s29_s27 = sadd.s32 1, %s12262_s24  ;;  %s12266_s25 = sphi %s12317_s25, %s17_s25   ;;  %s12262_s24 = sphi %s12315_s24, %s15557_s24   ;;  %s12258_s23 = sphi %s12313_s23, %s15556_s23   ;;  %s12254_s22 = sphi %s12311_s22, %s15555_s22   ;;  %s12250_s21 = sphi %s12309_s21, %s15554_s21  }
   0x4   : > { %p27_p0 = scmp.ge.s32.totalorder %s26_s26, 2  ;;  %p9749_p1 = scmp.ge.s32.totalorder %s12266_s25, 1 }
   0x5   : > { %p239_p2 = scmp.lt.s32.totalorder %s12266_s25, 5 }
   0x6   : > { %s15559_s26 = smov (%p27_p0, %s26_s26), 0  ;;  %s15561_s27 = smov (!%p27_p0, %s29_s27), %s12262_s24 }
   0x7   : > { %p240_p3 = pnand %p9749_p1, %p239_p2  ;;  %p31_p4 = scmp.ge.s32.totalorder %s15561_s27, 2 }
   0x9   : > { %s15563_s27 = smov (%p31_p4, %s15561_s27), 0  ;;  %243 = sbr.rel (%p240_p3) target bundleno = 4537 (0x11b9), region = 40 }
  0x10   : > { %s9750_s28 = sshll.u32 %s12250_s21, 3  ;;  %p290_p5 = scmp.lt.s32.totalorder %s12254_s22, 1  ;;  %v348_v0 = vld [vmem:[%s15472_s3] sm:$0xff]  ;;  %v349_v1 = vld [vmem:[%s15472_s3 + $0x8] sm:$0xff]  ;;  %v350_v2 = vld [vmem:[%s15472_s3 + $0x10] sm:$0xff]  ;;  %vm561_vm0 = vcmask 1043456  }
  0x11   : > { %p292_p6 = scmp.lt.s32.totalorder %s9750_s28, 15  ;;  %v11325_v3 = vpack.c.bf16 %v349_v1, %v348_v0  ;;  %v351_v4 = vld [vmem:[%s15472_s3 + $0x18] sm:$0xff]  ;;  %s12268_s20 = smov 127   ;;  %vm411_vm1 = vcmask 261120   ;;  %v12412_v31 = vld [vmem:[%s15470_s1] sm:$0xff]  ;;  %vm692_vm2 = vcmask 293888  }
  0x12   : > { %s15565_s22 = smov (!%p290_p5, %s12254_s22), 1  ;;  %v11329_v5 = vpack.c.bf16 %v351_v4, %v350_v2  ;;  %10565 = vmatprep.mubr.msk.f32.mxu1 %vm692_vm2, %v12412_v31  ;;  %vm1931_vm3 = vcmask 244736   ;;  %vm12271_vm5 = vmmov 1   ;;  %vm2644_vm7 = vcmask 97280  }
  0x13   : > { %s15567_s28 = smov (!%p292_p6, %s9750_s28), 15  ;;  %11326 = vmatprep.subr.bf16.mxu0 %v11325_v3  ;;  %s9752_s13 = sshll.u32 %s15565_s22, 5  ;;  %vm12882_vm4 = vmpackc.low %vm1931_vm3, %vm1931_vm3  ;;  %vm2648_vm8 = vcmask 93184   ;;  %vm9558_vm9 = vcmask 257024  }
  0x14   : > { %11328 = vmatpush3.bf16.msra.mxu0 %v11325_v3  ;;  %s9751_s14 = sshll.u32 %s15567_s28, 1  ;;  %s12269_s28 = smov 126   ;;  %vm12943_vm6 = vmpackc.low %vm561_vm0, %vm12271_vm5 }
  0x15   : > { %11330 = vmatprep.subr.bf16.mxu0 %v11329_v5  ;;  %s296_s15 = sadd.s32 %s9752_s13, %s9751_s14 }
  0x16   : > { %s12351_s16 = sshll.u32 %s296_s15, 3 }
  0x17   : > { %s12357_s19 = scalar_lea.vmem %s15469_s0, %s12351_s16  ;;  %s14674_s18 = scalar_lea.vmem %s15475_s6, %s12351_s16 }
  0x18   : > { %11332 = vmatpush3.bf16.msra.mxu0 %v11329_v5  ;;  %v12360_v6 = vld [vmem:[%s12357_s19] sm:$0xff]  ;;  %v12363_v7 = vld [vmem:[%s12357_s19 + $0x8] sm:$0xf]  ;;  %v12366_v8 = vld [vmem:[%s12357_s19 + $0x10] sm:$0xff]  ;;  %s15387_s29 = scalar_lea.vmem %s15474_s5, %s12351_s16 }
  0x19   : > { %v562_v9 = vrot.slane %v12360_v6, 4  ;;  %v563_v10 = vrot.slane %v12363_v7, 4  ;;  %v12371_v11 = vld [vmem:[%s12357_s19 + $0x18] sm:$0xf]  ;;  %v565_v12 = vrot.slane %v12366_v8, 4  ;;  %v12377_v15 = vld [vmem:[%s12357_s19 + $0x20] sm:$0xff]  ;;  %v12391_v22 = vcombine.high %v12360_v6, %v12360_v6 }
  0x1a   : > { %v566_v13 = vrot.slane %v12371_v11, 4  ;;  %v12380_v16 = vld [vmem:[%s12357_s19 + $0x30] sm:$0xff]  ;;  %v12384_v19 = vld [vmem:[%s12357_s19 + $0x28] sm:$0xf]  ;;  %v12387_v20 = vld [vmem:[%s12357_s19 + $0x38] sm:$0xf]  ;;  %v11872_v23 = vpack.i.bf16 %v12366_v8, %v12360_v6  ;;  %v400_v28 = vcombine.low %v12363_v7, %v12366_v8  ;;  %v12407_v30 = vcombine.high %v12366_v8, %v12366_v8 }
  0x1b   : > { %v564_v14 = vsel %vm561_vm0, %v562_v9, %v563_v10  ;;  %v568_v24 = vrot.slane %v12377_v15, 4  ;;  %v571_v25 = vrot.slane %v12380_v16, 4  ;;  %v569_v26 = vrot.slane %v12384_v19, 4  ;;  %v12424_v36 = vld [vmem:[%s12357_s19 + $0x40] sm:$0xff]  ;;  %v12427_v37 = vld [vmem:[%s12357_s19 + $0x50] sm:$0xff] }
  0x1c   : > { %v11867_v17 = vpack.i.bf16 %v564_v14, %v562_v9  ;;  %v567_v18 = vsel %vm561_vm0, %v565_v12, %v566_v13  ;;  %v572_v27 = vrot.slane %v12387_v20, 4  ;;  %v399_v29 = vcombine.low %v12360_v6, %v12391_v22  ;;  %v12442_v41 = vld [vmem:[%s12357_s19 + $0x48] sm:$0xf]  ;;  %v12445_v42 = vld [vmem:[%s12357_s19 + $0x58] sm:$0xf]  ;;  %v12476_v55 = vld [vmem:[%s12357_s19 + $0x60] sm:$0xff] }
  0x1d   : > { %v11877_v21 = vpack.i.bf16 %v567_v18, %v565_v12  ;;  %v11882_v32 = vpack.i.bf16 %v571_v25, %v568_v24  ;;  %v12417_v33 = vcombine.high %v12377_v15, %v12377_v15  ;;  %v570_v34 = vsel %vm561_vm0, %v568_v24, %v569_v26  ;;  %v12481_v58 = vld [vmem:[%s12357_s19 + $0x70] sm:$0xff]  ;;  %v12499_v1 = vld [vmem:[%s12357_s19 + $0x68] sm:$0xf]  ;;  %v12502_v2 = vld [vmem:[%s12357_s19 + $0x78] sm:$0xf] }
  0x1e   : > { %11868 = vrot.lane.b32.xlu0 %v11867_v17, %s12268_s20  ;;  %v573_v35 = vsel %vm561_vm0, %v571_v25, %v572_v27  ;;  %10537 = vmatprep.mubr.msk.f32.mxu0 %vm411_vm1, %v399_v29  ;;  %v401_v38 = vcombine.low %v12407_v30, %v12371_v11  ;;  %v12437_v40 = vcombine.high %v12380_v16, %v12380_v16  ;;  %v574_v46 = vrot.slane %v12424_v36, 4  ;;  %v9764_v24 = vld [vmem:[%s15471_s2 + $0x10] sm:$0xff]  ;;  %v343_v25 = vld [vmem:[%s15471_s2] sm:$0xff]  ;;  %v9765_v26 = vld [vmem:[%s15471_s2 + $0x18] sm:$0xf] }
  0x1f   : > { %11878 = vrot.lane.b32.xlu1 %v11877_v21, %s12268_s20  ;;  %10538 = vmatmul.mubr.msk.f32.vlgmr.msra.gmra.mrb[0].mxu0 %vm411_vm1, %v400_v28  ;;  %v402_v39 = vcombine.low %v12377_v15, %v12417_v33  ;;  %v403_v43 = vcombine.low %v12384_v19, %v12380_v16  ;;  %v12452_v44 = vcombine.high %v12424_v36, %v12424_v36  ;;  %v577_v47 = vrot.slane %v12427_v37, 4  ;;  %v344_v27 = vld [vmem:[%s15471_s2 + $0x8] sm:$0xf] }
  0x20   : > { %10540 = vmatprep.mubr.msk.f32.mxu0 %vm411_vm1, %v401_v38  ;;  %v11892_v45 = vpack.i.bf16 %v573_v35, %v570_v34  ;;  %v11887_v48 = vpack.i.bf16 %v12380_v16, %v12377_v15  ;;  %v575_v49 = vrot.slane %v12442_v41, 4  ;;  %v578_v50 = vrot.slane %v12445_v42, 4 }
  0x21   : > { %v404_v51 = vcombine.low %v12437_v40, %v12387_v20  ;;  %v405_v52 = vcombine.low %v12424_v36, %v12452_v44  ;;  %v12471_v53 = vcombine.high %v12427_v37, %v12427_v37  ;;  %v11897_v54 = vpack.i.bf16 %v577_v47, %v574_v46 }
  0x22   : > { %11873 = vrot.lane.b32.xlu0 %v11872_v23, %s12269_s28  ;;  %v576_v56 = vsel %vm561_vm0, %v574_v46, %v575_v49  ;;  %v579_v57 = vsel %vm561_vm0, %v577_v47, %v578_v50  ;;  %v406_v59 = vcombine.low %v12442_v41, %v12427_v37  ;;  %v12488_v60 = vcombine.high %v12476_v55, %v12476_v55 }
  0x23   : > { %636 = vrot.lane.b32.xlu1 %v12363_v7, %s12269_s28  ;;  %10541 = vmatmul.mubr.msk.f32.gmra.mrb[2].mxu0 %vm411_vm1, %v402_v39  ;;  %v407_v61 = vcombine.low %v12471_v53, %v12445_v42  ;;  %v11902_v62 = vpack.i.bf16 %v579_v57, %v576_v56  ;;  %v580_v63 = vrot.slane %v12476_v55, 4  ;;  %v583_v0 = vrot.slane %v12481_v58, 4 }
  0x24   : > { %10543 = vmatprep.mubr.msk.f32.mxu0 %vm411_vm1, %v403_v43  ;;  %v408_v3 = vcombine.low %v12476_v55, %v12488_v60  ;;  %v12509_v4 = vcombine.high %v12481_v58, %v12481_v58  ;;  %v409_v5 = vcombine.low %v12499_v1, %v12481_v58  ;;  %v11907_v9 = vpack.i.bf16 %v12427_v37, %v12424_v36 }
  0x25   : > { %v11912_v10 = vpack.i.bf16 %v583_v0, %v580_v63  ;;  %v581_v12 = vrot.slane %v12499_v1, 4  ;;  %v584_v13 = vrot.slane %v12502_v2, 4  ;;  %v12270_v23 = vmov 0  }
  0x26   : > { %11883 = vrot.lane.b32.xlu0 %v11882_v32, %s12268_s20  ;;  %v410_v14 = vcombine.low %v12509_v4, %v12502_v2  ;;  %11922 = vset.pattern.permute.xlu1 %v12270_v23 }
  0x27   : > { %640 = vrot.lane.b32.xlu1 %v12371_v11, %s12269_s28  ;;  %10544 = vmatmul.mubr.msk.f32.gmra.mrb[4].mxu0 %vm411_vm1, %v404_v51  ;;  %v582_v17 = vsel %vm561_vm0, %v580_v63, %v581_v12  ;;  %v585_v18 = vsel %vm561_vm0, %v583_v0, %v584_v13 }
  0x28   : > { %10546 = vmatprep.mubr.msk.f32.mxu0 %vm411_vm1, %v405_v52  ;;  %v11917_v21 = vpack.i.bf16 %v585_v18, %v582_v17  ;;  %11923 = vset.pattern.permute.xlu0 %v12270_v23 }
  0x2a   : > { %11893 = vrot.lane.b32.xlu0 %v11892_v45, %s12268_s20 }
  0x2b   : > { %11888 = vrot.lane.b32.xlu1 %v11887_v48, %s12269_s28  ;;  %10547 = vmatmul.mubr.msk.f32.gmra.mrb[6].mxu0 %vm411_vm1, %v406_v59 }
  0x2c   : > { %10549 = vmatprep.mubr.msk.f32.mxu0 %vm411_vm1, %v407_v61 }
  0x2e   : > { %11898 = vrot.lane.b32.xlu0 %v11897_v54, %s12268_s20 }
  0x2f   : > { %644 = vrot.lane.b32.xlu1 %v12384_v19, %s12269_s28  ;;  %10550 = vmatmul.mubr.msk.f32.gmra.mrb[8].mxu0 %vm411_vm1, %v408_v3 }
  0x30   : > { %10552 = vmatprep.mubr.msk.f32.mxu0 %vm411_vm1, %v409_v5 }
  0x32   : > { %648 = vrot.lane.b32.xlu0 %v12387_v20, %s12269_s28 }
  0x33   : > { %11903 = vrot.lane.b32.xlu1 %v11902_v62, %s12268_s20  ;;  %10553 = vmatmul.mubr.msk.f32.gmra.mrb[10].mxu0 %vm411_vm1, %v410_v14 }
  0x34   : > { %10604 = vmatprep.mubr.msk.f32.mxu0 %vm692_vm2, %v12412_v31 }
  0x36   : > { %11908 = vrot.lane.b32.xlu0 %v11907_v9, %s12269_s28 }
  0x37   : > { %11913 = vrot.lane.b32.xlu1 %v11912_v10, %s12268_s20 }
  0x3a   : > { %652 = vrot.lane.b32.xlu0 %v12442_v41, %s12269_s28 }
  0x3b   : > { %656 = vrot.lane.b32.xlu1 %v12445_v42, %s12269_s28 }
  0x3e   : > { %11918 = vrot.lane.b32.xlu0 %v11917_v21, %s12268_s20 }
  0x3f   : > { %658 = vrot.lane.b32.xlu1 %v12476_v55, %s12269_s28 }
  0x42   : > { %662 = vrot.lane.b32.xlu0 %v12481_v58, %s12269_s28 }
  0x43   : > { %660 = vrot.lane.b32.xlu1 %v12499_v1, %s12269_s28 }
  0x46   : > { %664 = vrot.lane.b32.xlu0 %v12502_v2, %s12269_s28 }
  0x47   : > { %1317 = vperm.xlu1 %11922, %v9764_v24  }
  0x4a   : > { %1322 = vperm.xlu0 %11923, %v9765_v26  }
  0x4b   : > { %684 = vperm.xlu1 %11922, %v343_v25  }
  0x4f   : > { %689 = vperm.xlu1 %11922, %v344_v27  }
  0x90   : > { %v11869_v28 = vpop.permute.xlu0 %11868 }
  0x91   : > { %v11870_v29 = vunpack.i.l.bf16 %v11869_v28  ;;  %v11879_v32 = vpop.permute.xlu1 %11878  ;;  %v11871_v39 = vunpack.i.h.bf16 %v11869_v28 }
  0x92   : > { %v11880_v43 = vunpack.i.l.bf16 %v11879_v32  ;;  %v11881_v51 = vunpack.i.h.bf16 %v11879_v32 }
  0x93   : > { %v674_v34 = vsel %vm561_vm0, %v12363_v7, %v11870_v29 }
  0x94   : > { %v11874_v35 = vpop.permute.xlu0 %11873  ;;  %v12560_v38 = vpack.c.bf16 %v674_v34, %v12360_v6  ;;  %v675_v49 = vsel %vm561_vm0, %v12371_v11, %v11880_v43 }
  0x95   : > { %v11875_v45 = vunpack.i.l.bf16 %v11874_v35  ;;  %v12562_v46 = vpop.permute.xlu1 %636  ;;  %v11876_v52 = vunpack.i.h.bf16 %v11874_v35  ;;  %v12582_v11 = vpack.c.bf16 %v675_v49, %v12366_v8 }
  0x96   : > { %11334 = vmatprep.subr.bf16.mxu1 %v12560_v38 }
  0x97   : > { %v12565_v47 = vpack.c.bf16 %v11875_v45, %v11871_v39  ;;  %11336 = vmatpush3.bf16.msra.mxu1 %v12560_v38 }
  0x98   : > { %v11884_v48 = vpop.permute.xlu0 %11883 }
  0x99   : > { %v11886_v7 = vunpack.i.h.bf16 %v11884_v48  ;;  %11338 = vmatprep.subr.bf16.mxu1 %v12565_v47  ;;  %v12571_v6 = vpop.permute.xlu1 %640  ;;  %v11885_v63 = vunpack.i.l.bf16 %v11884_v48 }
  0x9b   : > { %v677_v50 = vsel %vm561_vm0, %v12387_v20, %v11886_v7  ;;  %11340 = vmatpush3.bf16.msra.mxu1 %v12565_v47  ;;  %v12587_v20 = vld [vmem:[%s15470_s1 + $0x8] sm:$0xf]  ;;  %v676_v12 = vsel %vm561_vm0, %v12384_v19, %v11885_v63 }
  0x9c   : > { %v11894_v54 = vpop.permute.xlu0 %11893  ;;  %10563 = vmatprep.subr.msk.mxu1 %vm561_vm0, %v12562_v46  ;;  %v12579_v56 = vpack.c.bf16 %v677_v50, %v12380_v16  ;;  %v12593_v16 = vpack.c.bf16 %v11876_v52, %v11881_v51  ;;  %v12626_v19 = vpack.c.bf16 %v676_v12, %v12377_v15  ;;  %v12715_v52 = vld [vmem:[%s15470_s1 + $0x10] sm:$0xff] }
  0x9d   : > { %v11896_v57 = vunpack.i.h.bf16 %v11894_v54  ;;  %v11889_v59 = vpop.permute.xlu1 %11888  ;;  %v11895_v14 = vunpack.i.l.bf16 %v11894_v54  ;;  %v12738_v54 = vld [vmem:[%s15470_s1 + $0x18] sm:$0xf] }
  0x9e   : > { %v11891_v61 = vunpack.i.h.bf16 %v11889_v59  ;;  %11358 = vmatprep.subr.bf16.mxu0 %v12579_v56  ;;  %v11890_v17 = vunpack.i.l.bf16 %v11889_v59 }
  0x9f   : > { %10564 = vmatpush3.msk.msra.mxu1 %vm561_vm0, %v12562_v46  ;;  %11360 = vmatpush3.bf16.msra.mxu0 %v12579_v56 }
  0xa0   : > { %v12595_v62 = vpack.c.bf16 %v11891_v61, %v11896_v57  ;;  %v11899_v8 = vpop.permute.xlu0 %11898  ;;  %10566 = vmatmul.mubr.msk.f32.vlgmr.msra.gmra.mrb[0].mxu1 %vm692_vm2, %v12587_v20  ;;  %11342 = vmatprep.subr.bf16.mxu1 %v12582_v11  ;;  %v12633_v23 = vpack.c.bf16 %v11890_v17, %v11895_v14 }
  0xa1   : > { %v11901_v0 = vunpack.i.h.bf16 %v11899_v8  ;;  %11344 = vmatpush3.bf16.msra.mxu1 %v12582_v11  ;;  %v12601_v3 = vpop.permute.xlu1 %644  ;;  %10578 = vmatprep.mubr.msk.f32.mxu1 %vm692_vm2, %v12412_v31  ;;  %v11900_v15 = vunpack.i.l.bf16 %v11899_v8 }
  0xa2   : > { %11346 = vmatprep.subr.bf16.mxu1 %v12593_v16  ;;  %11362 = vmatprep.subr.bf16.mxu0 %v12595_v62 }
  0xa3   : > { %v679_v5 = vsel %vm561_vm0, %v12445_v42, %v11901_v0  ;;  %11364 = vmatpush3.bf16.msra.mxu0 %v12595_v62  ;;  %v678_v34 = vsel %vm561_vm0, %v12442_v41, %v11900_v15 }
  0xa4   : > { %v12610_v9 = vpop.permute.xlu0 %648  ;;  %v12613_v10 = vpack.c.bf16 %v679_v5, %v12427_v37  ;;  %v12669_v41 = vpack.c.bf16 %v678_v34, %v12424_v36 }
  0xa5   : > { %11348 = vmatpush3.bf16.msra.mxu1 %v12593_v16  ;;  %10602 = vmatprep.subr.msk.mxu0 %vm561_vm0, %v12610_v9  ;;  %v11904_v13 = vpop.permute.xlu1 %11903 }
  0xa6   : > { %10576 = vmatprep.subr.msk.mxu1 %vm561_vm0, %v12571_v6  ;;  %v11906_v42 = vunpack.i.h.bf16 %v11904_v13  ;;  %v11905_v29 = vunpack.i.l.bf16 %v11904_v13 }
  0xa7   : > { %10603 = vmatpush3.msk.msra.mxu0 %vm561_vm0, %v12610_v9 }
  0xa8   : > { %v11909_v37 = vpop.permute.xlu0 %11908  ;;  %11374 = vmatprep.subr.bf16.mxu0 %v12613_v10  ;;  %10605 = vmatmul.mubr.msk.f32.vlgmr.msra.gmra.mrb[12].mxu0 %vm692_vm2, %v12587_v20 }
  0xa9   : > { %v11911_v18 = vunpack.i.h.bf16 %v11909_v37  ;;  %10577 = vmatpush3.msk.msra.mxu1 %vm561_vm0, %v12571_v6  ;;  %11376 = vmatpush3.bf16.msra.mxu0 %v12613_v10  ;;  %v11914_v21 = vpop.permute.xlu1 %11913  ;;  %v11910_v32 = vunpack.i.l.bf16 %v11909_v37 }
  0xaa   : > { %10579 = vmatmul.mubr.msk.f32.vlgmr.msra.gmra.mrb[2].mxu1 %vm692_vm2, %v12587_v20  ;;  %11350 = vmatprep.subr.bf16.mxu1 %v12626_v19  ;;  %v11916_v24 = vunpack.i.h.bf16 %v11914_v21  ;;  %v11915_v36 = vunpack.i.l.bf16 %v11914_v21 }
  0xab   : > { %v12638_v25 = vpack.c.bf16 %v11911_v18, %v11906_v42  ;;  %11352 = vmatpush3.bf16.msra.mxu1 %v12626_v19  ;;  %10591 = vmatprep.mubr.msk.f32.mxu1 %vm692_vm2, %v12412_v31  ;;  %v12664_v43 = vpack.c.bf16 %v11910_v32, %v11905_v29 }
  0xac   : > { %v681_v26 = vsel %vm561_vm0, %v12502_v2, %v11916_v24  ;;  %v12645_v27 = vpop.permute.xlu0 %652  ;;  %11354 = vmatprep.subr.bf16.mxu1 %v12633_v23  ;;  %10630 = vmatprep.mubr.msk.f32.mxu0 %vm692_vm2, %v12412_v31  ;;  %v680_v49 = vsel %vm561_vm0, %v12499_v1, %v11915_v36 }
  0xad   : > { %11378 = vmatprep.subr.bf16.mxu0 %v12638_v25  ;;  %v12651_v28 = vpop.permute.xlu1 %656  ;;  %v12660_v2 = vpack.c.bf16 %v681_v26, %v12481_v58  ;;  %v12702_v51 = vpack.c.bf16 %v680_v49, %v12476_v55 }
  0xae   : > { %11380 = vmatpush3.bf16.msra.mxu0 %v12638_v25 }
  0xaf   : > { %11356 = vmatpush3.bf16.msra.mxu1 %v12633_v23  ;;  %10628 = vmatprep.subr.msk.mxu0 %vm561_vm0, %v12651_v28 }
  0xb0   : > { %v11919_v35 = vpop.permute.xlu0 %11918  ;;  %10589 = vmatprep.subr.msk.mxu1 %vm561_vm0, %v12601_v3 }
  0xb1   : > { %v11921_v39 = vunpack.i.h.bf16 %v11919_v35  ;;  %v11920_v7 = vunpack.i.l.bf16 %v11919_v35  ;;  %v659_v50 = vpop.permute.xlu1 %658 }
  0xb2   : > { %10629 = vmatpush3.msk.msra.mxu0 %vm561_vm0, %v12651_v28 }
  0xb3   : > { %10590 = vmatpush3.msk.msra.mxu1 %vm561_vm0, %v12601_v3  ;;  %11390 = vmatprep.subr.bf16.mxu0 %v12660_v2  ;;  %v12708_v1 = vpack.c.bf16 %v659_v50, %v11920_v7 }
  0xb4   : > { %v663_v58 = vpop.permute.xlu0 %662  ;;  %10592 = vmatmul.mubr.msk.f32.vlgmr.msra.gmra.mrb[4].mxu1 %vm692_vm2, %v12587_v20  ;;  %11366 = vmatprep.subr.bf16.mxu1 %v12669_v41 }
  0xb5   : > { %v12677_v45 = vpack.c.bf16 %v663_v58, %v11921_v39  ;;  %10631 = vmatmul.mubr.msk.f32.vlgmr.msra.gmra.mrb[14].mxu0 %vm692_vm2, %v12587_v20  ;;  %11368 = vmatpush3.bf16.msra.mxu1 %v12669_v41  ;;  %v12723_v55 = vpop.permute.xlu1 %660 }
  0xb6   : > { %11392 = vmatpush3.bf16.msra.mxu0 %v12660_v2  ;;  %11370 = vmatprep.subr.bf16.mxu1 %v12664_v43 }
  0xb7   : > { %11394 = vmatprep.subr.bf16.mxu0 %v12677_v45  ;;  %10617 = vmatprep.mubr.msk.f32.mxu1 %vm692_vm2, %v12412_v31 }
  0xb8   : > { %v12687_v48 = vpop.permute.xlu0 %664  ;;  %10656 = vmatprep.mubr.msk.f32.mxu0 %vm692_vm2, %v12412_v31 }
  0xb9   : > { %11372 = vmatpush3.bf16.msra.mxu1 %v12664_v43 }
  0xba   : > { %11396 = vmatpush3.bf16.msra.mxu0 %v12677_v45  ;;  %10615 = vmatprep.subr.msk.mxu1 %vm561_vm0, %v12645_v27 }
  0xbb   : > { %10654 = vmatprep.subr.msk.mxu0 %vm561_vm0, %v12687_v48 }
  0xbd   : > { %10616 = vmatpush3.msk.msra.mxu1 %vm561_vm0, %v12645_v27 }
  0xbe   : > { %10655 = vmatpush3.msk.msra.mxu0 %vm561_vm0, %v12687_v48  ;;  %10618 = vmatmul.mubr.msk.f32.vlgmr.msra.gmra.mrb[6].mxu1 %vm692_vm2, %v12587_v20 }
  0xbf   : > { %11406 = vmatprep.subr.bf16.mxu0 %v12582_v11  ;;  %11382 = vmatprep.subr.bf16.mxu1 %v12702_v51 }
  0xc0   : > { %10657 = vmatmul.mubr.msk.f32.vlgmr.msra.gmra.mrb[16].mxu0 %vm692_vm2, %v12587_v20  ;;  %11384 = vmatpush3.bf16.msra.mxu1 %v12702_v51 }
  0xc1   : > { %11408 = vmatpush3.bf16.msra.mxu0 %v12582_v11  ;;  %11386 = vmatprep.subr.bf16.mxu1 %v12708_v1 }
  0xc2   : > { %11410 = vmatprep.subr.bf16.mxu0 %v12593_v16  ;;  %10682 = vmatprep.mubr.msk.f32.mxu0 %vm692_vm2, %v12715_v52 }
  0xc3   : > { %10643 = vmatprep.mubr.msk.f32.mxu1 %vm692_vm2, %v12412_v31  ;;  %v395_v31 = vlaneseq }
  0xc4   : > { %11388 = vmatpush3.bf16.msra.mxu1 %v12708_v1 }
  0xc5   : > { %11412 = vmatpush3.bf16.msra.mxu0 %v12593_v16  ;;  %10641 = vmatprep.subr.msk.mxu1 %vm561_vm0, %v12723_v55 }
  0xc6   : > { %10680 = vmatprep.subr.msk.mxu0 %vm561_vm0, %v12571_v6 }
  0xc8   : > { %10642 = vmatpush3.msk.msra.mxu1 %vm561_vm0, %v12723_v55 }
  0xc9   : > { %10681 = vmatpush3.msk.msra.mxu0 %vm561_vm0, %v12571_v6  ;;  %10644 = vmatmul.mubr.msk.f32.vlgmr.msra.gmra.mrb[8].mxu1 %vm692_vm2, %v12587_v20 }
  0xca   : > { %10683 = vmatmul.mubr.msk.f32.vlgmr.msra.gmra.mrb[18].mxu0 %vm692_vm2, %v12738_v54  ;;  %11422 = vmatprep.subr.bf16.mxu0 %v12579_v56 }
  0xcb   : > { %11398 = vmatprep.subr.bf16.mxu1 %v12560_v38  ;;  %11424 = vmatpush3.bf16.msra.mxu0 %v12579_v56 }
  0xcc   : > { %11400 = vmatpush3.bf16.msra.mxu1 %v12560_v38  ;;  %11426 = vmatprep.subr.bf16.mxu0 %v12595_v62  ;;  %v12825_v38 = vshrl.u32 %v395_v31, 7 }
  0xcd   : > { %11402 = vmatprep.subr.bf16.mxu1 %v12565_v47  ;;  %10708 = vmatprep.mubr.msk.f32.mxu0 %vm692_vm2, %v12715_v52 }
  0xce   : > { %10669 = vmatprep.mubr.msk.f32.mxu1 %vm692_vm2, %v12715_v52  ;;  %15505 = vst [vmem:[#allocation2_spill] sm:$0xff] %v12825_v38 }
  0xcf   : > { %11428 = vmatpush3.bf16.msra.mxu0 %v12595_v62 }
  0xd0   : > { %11404 = vmatpush3.bf16.msra.mxu1 %v12565_v47  ;;  %10706 = vmatprep.subr.msk.mxu0 %vm561_vm0, %v12610_v9  ;;  %v362_v47 = vld [vmem:[%s15473_s4] sm:$0x7f] }
  0xd1   : > { %10667 = vmatprep.subr.msk.mxu1 %vm561_vm0, %v12562_v46 }
  0xd3   : > { %10707 = vmatpush3.msk.msra.mxu0 %vm561_vm0, %v12610_v9 }
  0xd4   : > { %10668 = vmatpush3.msk.msra.mxu1 %vm561_vm0, %v12562_v46  ;;  %10709 = vmatmul.mubr.msk.f32.vlgmr.msra.gmra.mrb[20].mxu0 %vm692_vm2, %v12738_v54  ;;  %v15478_v46 = vsub.s32 0, %v12825_v38 }
  0xd5   : > { %11438 = vmatprep.subr.bf16.mxu0 %v12613_v10  ;;  %10670 = vmatmul.mubr.msk.f32.vlgmr.msra.gmra.mrb[10].mxu1 %vm692_vm2, %v12738_v54 }
  0xd6   : > { %11414 = vmatprep.subr.bf16.mxu1 %v12626_v19  ;;  %11440 = vmatpush3.bf16.msra.mxu0 %v12613_v10  ;;  %v398_v6 = vrot.slane %v362_v47, %v15478_v46  ;;  %v12856_v47 = vpop.permute.xlu1 %1317 }
  0xd7   : > { %11416 = vmatpush3.bf16.msra.mxu1 %v12626_v19  ;;  %11442 = vmatprep.subr.bf16.mxu0 %v12638_v25 }
  0xd8   : > { %11418 = vmatprep.subr.bf16.mxu1 %v12633_v23  ;;  %10734 = vmatprep.mubr.msk.f32.mxu0 %vm692_vm2, %v12715_v52 }
  0xd9   : > { %10695 = vmatprep.mubr.msk.f32.mxu1 %vm692_vm2, %v12715_v52 }
  0xda   : > { %11444 = vmatpush3.bf16.msra.mxu0 %v12638_v25 }
  0xdb   : > { %11420 = vmatpush3.bf16.msra.mxu1 %v12633_v23  ;;  %10732 = vmatprep.subr.msk.mxu0 %vm561_vm0, %v12651_v28 }
  0xdc   : > { %10693 = vmatprep.subr.msk.mxu1 %vm561_vm0, %v12601_v3 }
  0xde   : > { %10733 = vmatpush3.msk.msra.mxu0 %vm561_vm0, %v12651_v28 }
  0xdf   : > { %10694 = vmatpush3.msk.msra.mxu1 %vm561_vm0, %v12601_v3  ;;  %10735 = vmatmul.mubr.msk.f32.vlgmr.msra.gmra.mrb[22].mxu0 %vm692_vm2, %v12738_v54 }
  0xe0   : > { %11454 = vmatprep.subr.bf16.mxu0 %v12660_v2  ;;  %10696 = vmatmul.mubr.msk.f32.vlgmr.msra.gmra.mrb[12].mxu1 %vm692_vm2, %v12738_v54 }
  0xe1   : > { %11430 = vmatprep.subr.bf16.mxu1 %v12669_v41  ;;  %11456 = vmatpush3.bf16.msra.mxu0 %v12660_v2 }
  0xe2   : > { %11432 = vmatpush3.bf16.msra.mxu1 %v12669_v41  ;;  %11458 = vmatprep.subr.bf16.mxu0 %v12677_v45 }
  0xe3   : > { %11434 = vmatprep.subr.bf16.mxu1 %v12664_v43  ;;  %10760 = vmatprep.mubr.msk.f32.mxu0 %vm692_vm2, %v12715_v52 }
  0xe4   : > { %10721 = vmatprep.mubr.msk.f32.mxu1 %vm692_vm2, %v12715_v52 }
  0xe5   : > { %11460 = vmatpush3.bf16.msra.mxu0 %v12677_v45 }
  0xe6   : > { %11436 = vmatpush3.bf16.msra.mxu1 %v12664_v43  ;;  %10758 = vmatprep.subr.msk.mxu0 %vm561_vm0, %v12687_v48 }
  0xe7   : > { %10719 = vmatprep.subr.msk.mxu1 %vm561_vm0, %v12645_v27 }
  0xe9   : > { %10759 = vmatpush3.msk.msra.mxu0 %vm561_vm0, %v12687_v48 }
  0xea   : > { %10720 = vmatpush3.msk.msra.mxu1 %vm561_vm0, %v12645_v27  ;;  %10761 = vmatmul.mubr.msk.f32.vlgmr.msra.gmra.mrb[24].mxu0 %vm692_vm2, %v12738_v54 }
  0xeb   : > { %10722 = vmatmul.mubr.msk.f32.vlgmr.msra.gmra.mrb[14].mxu1 %vm692_vm2, %v12738_v54  ;;  %11446 = vmatprep.subr.bf16.mxu1 %v12702_v51 }
  0xec   : > { %11448 = vmatpush3.bf16.msra.mxu1 %v12702_v51  ;;  %10747 = vmatprep.mubr.msk.f32.mxu1 %vm692_vm2, %v12715_v52 }
  0xed   : > { %11450 = vmatprep.subr.bf16.mxu1 %v12708_v1 }
  0xf0   : > { %11452 = vmatpush3.bf16.msra.mxu1 %v12708_v1 }
  0xf1   : > { %10745 = vmatprep.subr.msk.mxu1 %vm561_vm0, %v12723_v55 }
  0xf2   : > { %v10539_v56 = vpop.f32.mrb[0].mxu0 }
  0xf3   : > { %v508_v11 = vadd.f32 %v10539_v56, %v398_v6  ;;  %v502_v57 = vpop.f32.mrb[1].mxu0 }
  0xf4   : > { %10746 = vmatpush3.msk.msra.mxu1 %vm561_vm0, %v12723_v55  ;;  %v503_v59 = vadd.f32 %v502_v57, %v398_v6 }
  0xf5   : > { %10748 = vmatmul.mubr.msk.f32.vlgmr.msra.gmra.mrb[16].mxu1 %vm692_vm2, %v12738_v54  ;;  %v2851_v20 = vcombine.high %v508_v11, %v508_v11 }
  0xf6   : > { %v2850_v61 = vcombine.high %v503_v59, %v503_v59  ;;  %v10542_v16 = vpop.f32.mrb[2].mxu0 }
  0xf7   : > { %v518_v62 = vadd.f32 %v10542_v16, %v398_v6  ;;  %v512_v8 = vpop.f32.mrb[3].mxu0 }
  0xf8   : > { %v2862_v63 = vcombine.low %v503_v59, %v2850_v61  ;;  %v513_v0 = vadd.f32 %v512_v8, %v398_v6 }
  0xf9   : > { %v2853_v3 = vcombine.high %v518_v62, %v518_v62 }
  0xfa   : > { %v12840_v5 = vpack.c.bf16 %v508_v11, %v2862_v63  ;;  %v2852_v9 = vcombine.high %v513_v0, %v513_v0  ;;  %v2947_v10 = vcombine.low %v2851_v20, %v513_v0  ;;  %v10545_v12 = vpop.f32.mrb[4].mxu0  ;;  %v12858_v11 = vpop.permute.xlu1 %684 }
  0xfb   : > { %v3032_v13 = vcombine.low %v518_v62, %v2853_v3  ;;  %v528_v14 = vadd.f32 %v10545_v12, %v398_v6  ;;  %v522_v17 = vpop.f32.mrb[5].mxu0 }
  0xfc   : > { %v12842_v42 = vpack.c.bf16 %v2852_v9, %v2947_v10  ;;  %v523_v37 = vadd.f32 %v522_v17, %v398_v6 }
  0xfd   : > { %v2855_v19 = vcombine.high %v528_v14, %v528_v14 }
  0xfe   : > { %v2854_v18 = vcombine.high %v523_v37, %v523_v37  ;;  %v12844_v21 = vpack.c.bf16 %v523_v37, %v3032_v13  ;;  %v10548_v23 = vpop.f32.mrb[6].mxu0 }
  0xff   : > { %v538_v24 = vadd.f32 %v10548_v23, %v398_v6  ;;  %v532_v15 = vpop.f32.mrb[7].mxu0 }
 0x100   : > { %v3117_v25 = vcombine.low %v2854_v18, %v528_v14  ;;  %v533_v26 = vadd.f32 %v532_v15, %v398_v6  ;;  %v12872_v14 = vpop.permute.xlu0 %1322 }
 0x101   : > { %v2857_v28 = vcombine.high %v538_v24, %v538_v24 }
 0x102   : > { %v12846_v27 = vpack.c.bf16 %v2855_v19, %v3117_v25  ;;  %v2856_v29 = vcombine.high %v533_v26, %v533_v26  ;;  %v10551_v32 = vpop.f32.mrb[8].mxu0 }
 0x103   : > { %v548_v34 = vadd.f32 %v10551_v32, %v398_v6  ;;  %v542_v2 = vpop.f32.mrb[9].mxu0 }
 0x104   : > { %v3202_v35 = vcombine.low %v533_v26, %v2856_v29  ;;  %v543_v39 = vadd.f32 %v542_v2, %v398_v6  ;;  %v12890_v26 = vpop.permute.xlu1 %689 }
 0x105   : > { %v2859_v43 = vcombine.high %v548_v34, %v548_v34 }
 0x106   : > { %v12848_v41 = vpack.c.bf16 %v538_v24, %v3202_v35  ;;  %v2858_v58 = vcombine.high %v543_v39, %v543_v39  ;;  %v3287_v45 = vcombine.low %v2857_v28, %v543_v39  ;;  %v10554_v36 = vpop.f32.mrb[10].mxu0 }
 0x107   : > { %v3372_v48 = vcombine.low %v548_v34, %v2859_v43  ;;  %v558_v49 = vadd.f32 %v10554_v36, %v398_v6  ;;  %v552_v7 = vpop.f32.mrb[11].mxu0 }
 0x108   : > { %v12850_v50 = vpack.c.bf16 %v2858_v58, %v3287_v45  ;;  %v553_v51 = vadd.f32 %v552_v7, %v398_v6 }
 0x109   : > { %v2861_v1 = vcombine.high %v558_v49, %v558_v49 }
 0x10a   : > { %v2860_v52 = vcombine.high %v553_v51, %v553_v51  ;;  %v12852_v55 = vpack.c.bf16 %v553_v51, %v3372_v48 }
 0x10c   : > { %v3457_v54 = vcombine.low %v2860_v52, %v558_v49 }
 0x10e   : > { %v12854_v31 = vpack.c.bf16 %v2861_v1, %v3457_v54 }
 0x173   : > { %v10567_v56 = vpop.f32.mrb[0].mxu1 }
 0x174   : > { %v767_v57 = vpop.f32.mrb[1].mxu1 }
 0x175   : > { %v768_v59 = vadd.f32 %v767_v57, %v12858_v11 }
 0x177   : > { %10767 = vmatprep.mubr.msk.f32.mxu1 %vm1931_vm3, %v768_v59 }
 0x17b   : > { %v10606_v20 = vpop.f32.mrb[12].mxu0 }
 0x17c   : > { %v998_v6 = vpop.f32.mrb[13].mxu0  ;;  %v1004_v7 = vadd.f32 %v10606_v20, %v12890_v26 }
 0x17d   : > { %v10580_v61 = vpop.f32.mrb[2].mxu1  ;;  %v999_v58 = vadd.f32 %v998_v6, %v12858_v11 }
 0x17e   : > { %v844_v16 = vpop.f32.mrb[3].mxu1  ;;  %v850_v2 = vadd.f32 %v10580_v61, %v12890_v26  ;;  %v773_v61 = vadd.f32 %v10567_v56, %v12890_v26 }
 0x17f   : > { %v845_v62 = vadd.f32 %v844_v16, %v12858_v11 }
 0x181   : > { %10774 = vmatprep.mubr.msk.f32.mxu0 %vm1931_vm3, %v845_v62 }
 0x187   : > { %v12864_v8 = vpop.f32.mrb[4].mxu1 }
 0x188   : > { %v921_v63 = vpop.f32.mrb[5].mxu1  ;;  %v10632_v0 = vpop.f32.mrb[14].mxu0 }
 0x189   : > { %v1152_v3 = vpop.f32.mrb[15].mxu0  ;;  %v922_v16 = vadd.f32 %v921_v63, %v12858_v11  ;;  %v1158_v63 = vadd.f32 %v10632_v0, %v12890_v26 }
 0x18a   : > { %v1153_v54 = vadd.f32 %v1152_v3, %v12858_v11 }
 0x191   : > { %v12866_v9 = vpop.f32.mrb[6].mxu1 }
 0x192   : > { %v12868_v10 = vpop.f32.mrb[7].mxu1 }
 0x193   : > { %v12870_v12 = vpop.f32.mrb[16].mxu0 }
 0x194   : > { %v1306_v13 = vpop.f32.mrb[17].mxu0 }
 0x19c   : > { %v12874_v17 = vpop.f32.mrb[8].mxu1 }
 0x19d   : > { %v10684_v37 = vpop.f32.mrb[18].mxu0  ;;  %v12876_v19 = vpop.f32.mrb[9].mxu1 }
 0x19e   : > { %v1472_v18 = vpop.f32.mrb[19].mxu0  ;;  %v1478_v23 = vadd.f32 %v10684_v37, %v12872_v14 }
 0x19f   : > { %v1473_v24 = vadd.f32 %v1472_v18, %v12856_v47 }
 0x1a1   : > { %v11467_v25 = vpack.c.bf16 %v1478_v23, %v1473_v24  ;;  %v927_v24 = vadd.f32 %v12864_v8, %v12890_v26 }
 0x1a3   : > { %11469 = vmatprep.subr.msk.bf16.mxu0 %vm12882_vm4, %v11467_v25 }
 0x1a4   : > { %11472 = vmatpush3.bf16.xpose.msk.msra.mxu0 %vm12882_vm4, %v11467_v25  ;;  %v1307_v25 = vadd.f32 %v1306_v13, %v12858_v11 }
 0x1a7   : > { %v10710_v28 = vpop.f32.mrb[20].mxu0 }
 0x1a8   : > { %v1628_v29 = vadd.f32 %v10710_v28, %v12872_v14  ;;  %v10671_v32 = vpop.f32.mrb[10].mxu1  ;;  %v1622_v34 = vpop.f32.mrb[21].mxu0 }
 0x1a9   : > { %v1403_v35 = vadd.f32 %v10671_v32, %v12872_v14  ;;  %v1623_v39 = vadd.f32 %v1622_v34, %v12856_v47  ;;  %v1397_v43 = vpop.f32.mrb[11].mxu1  ;;  %v1076_v34 = vadd.f32 %v12868_v10, %v12858_v11 }
 0x1aa   : > { %v1398_v45 = vadd.f32 %v1397_v43, %v12856_v47 }
 0x1ab   : > { %v11479_v36 = vpack.c.bf16 %v1628_v29, %v1623_v39  ;;  %10775 = vmatmul.mubr.msk.f32.vlgmr.msra.gmra.mrb[26].mxu0 %vm1931_vm3, %v850_v2 }
 0x1ac   : > { %v11461_v48 = vpack.c.bf16 %v1403_v35, %v1398_v45  ;;  %10788 = vmatprep.mubr.msk.f32.mxu0 %vm1931_vm3, %v999_v58  ;;  %v1312_v35 = vadd.f32 %v12870_v12, %v12890_v26  ;;  %v1081_v58 = vadd.f32 %v12866_v9, %v12890_v26 }
 0x1ad   : > { %11481 = vmatprep.subr.msk.bf16.mxu0 %vm12882_vm4, %v11479_v36 }
 0x1ae   : > { %11463 = vmatprep.subr.msk.bf16.mxu1 %vm12882_vm4, %v11461_v48  ;;  %11484 = vmatpush3.bf16.xpose.msk.msra.mxu0 %vm12882_vm4, %v11479_v36  ;;  %v1230_v36 = vadd.f32 %v12876_v19, %v12858_v11 }
 0x1af   : > { %11466 = vmatpush3.bf16.xpose.msk.msra.mxu1 %vm12882_vm4, %v11461_v48 }
 0x1b2   : > { %v10736_v49 = vpop.f32.mrb[22].mxu0 }
 0x1b3   : > { %v1778_v51 = vadd.f32 %v10736_v49, %v12872_v14  ;;  %v10697_v1 = vpop.f32.mrb[12].mxu1  ;;  %v1772_v52 = vpop.f32.mrb[23].mxu0 }
 0x1b4   : > { %v1553_v57 = vadd.f32 %v10697_v1, %v12872_v14  ;;  %v1773_v59 = vadd.f32 %v1772_v52, %v12856_v47  ;;  %v1547_v6 = vpop.f32.mrb[13].mxu1 }
 0x1b5   : > { %v1548_v62 = vadd.f32 %v1547_v6, %v12856_v47  ;;  %10789 = vmatmul.mubr.msk.f32.vlgmr.msra.gmra.mrb[28].mxu0 %vm1931_vm3, %v1004_v7 }
 0x1b6   : > { %v11491_v20 = vpack.c.bf16 %v1778_v51, %v1773_v59  ;;  %10768 = vmatmul.mubr.msk.f32.vlgmr.msra.gmra.mrb[18].mxu1 %vm1931_vm3, %v773_v61  ;;  %10802 = vmatprep.mubr.msk.f32.mxu0 %vm1931_vm3, %v1153_v54 }
 0x1b7   : > { %v11473_v37 = vpack.c.bf16 %v1553_v57, %v1548_v62  ;;  %10781 = vmatprep.mubr.msk.f32.mxu1 %vm1931_vm3, %v922_v16 }
 0x1b8   : > { %11493 = vmatprep.subr.msk.bf16.mxu0 %vm12882_vm4, %v11491_v20 }
 0x1b9   : > { %11475 = vmatprep.subr.msk.bf16.mxu1 %vm12882_vm4, %v11473_v37  ;;  %11496 = vmatpush3.bf16.xpose.msk.msra.mxu0 %vm12882_vm4, %v11491_v20 }
 0x1ba   : > { %11478 = vmatpush3.bf16.xpose.msk.msra.mxu1 %vm12882_vm4, %v11473_v37 }
 0x1bd   : > { %v10762_v56 = vpop.f32.mrb[24].mxu0 }
 0x1be   : > { %v1928_v3 = vadd.f32 %v10762_v56, %v12872_v14  ;;  %v10723_v18 = vpop.f32.mrb[14].mxu1  ;;  %v1922_v23 = vpop.f32.mrb[25].mxu0 }
 0x1bf   : > { %v1703_v28 = vadd.f32 %v10723_v18, %v12872_v14  ;;  %v1923_v29 = vadd.f32 %v1922_v23, %v12856_v47  ;;  %v1697_v32 = vpop.f32.mrb[15].mxu1 }
 0x1c0   : > { %v1698_v2 = vadd.f32 %v1697_v32, %v12856_v47  ;;  %10803 = vmatmul.mubr.msk.f32.vlgmr.msra.gmra.mrb[30].mxu0 %vm1931_vm3, %v1158_v63 }
 0x1c1   : > { %v11503_v0 = vpack.c.bf16 %v1928_v3, %v1923_v29  ;;  %10782 = vmatmul.mubr.msk.f32.vlgmr.msra.gmra.mrb[20].mxu1 %vm1931_vm3, %v927_v24  ;;  %10816 = vmatprep.mubr.msk.f32.mxu0 %vm1931_vm3, %v1307_v25 }
 0x1c2   : > { %v11485_v8 = vpack.c.bf16 %v1703_v28, %v1698_v2  ;;  %10795 = vmatprep.mubr.msk.f32.mxu1 %vm1931_vm3, %v1076_v34 }
 0x1c3   : > { %11505 = vmatprep.subr.msk.bf16.mxu0 %vm12882_vm4, %v11503_v0 }
 0x1c4   : > { %11487 = vmatprep.subr.msk.bf16.mxu1 %vm12882_vm4, %v11485_v8  ;;  %11508 = vmatpush3.bf16.xpose.msk.msra.mxu0 %vm12882_vm4, %v11503_v0 }
 0x1c5   : > { %11490 = vmatpush3.bf16.xpose.msk.msra.mxu1 %vm12882_vm4, %v11485_v8  ;;  %11517 = vmatprep.subr.msk.bf16.mxu0 %vm12943_vm6, %v12842_v42 }
 0x1c8   : > { %v10749_v10 = vpop.f32.mrb[16].mxu1 }
 0x1c9   : > { %v1853_v39 = vadd.f32 %v10749_v10, %v12872_v14  ;;  %v1847_v43 = vpop.f32.mrb[17].mxu1 }
 0x1ca   : > { %v1848_v45 = vadd.f32 %v1847_v43, %v12856_v47  ;;  %v1235_v47 = vadd.f32 %v12874_v17, %v12890_v26 }
 0x1cb   : > { %10817 = vmatmul.mubr.msk.f32.vlgmr.msra.gmra.mrb[32].mxu0 %vm1931_vm3, %v1312_v35 }
 0x1cc   : > { %v11497_v48 = vpack.c.bf16 %v1853_v39, %v1848_v45  ;;  %10796 = vmatmul.mubr.msk.f32.vlgmr.msra.gmra.mrb[22].mxu1 %vm1931_vm3, %v1081_v58  ;;  %11520 = vmatpush3.bf16.msk.msra.mxu0 %vm12943_vm6, %v12842_v42 }
 0x1cd   : > { %10809 = vmatprep.mubr.msk.f32.mxu1 %vm1931_vm3, %v1230_v36  ;;  %11529 = vmatprep.subr.msk.bf16.mxu0 %vm12943_vm6, %v12846_v27 }
 0x1ce   : > { %11499 = vmatprep.subr.msk.bf16.mxu1 %vm12882_vm4, %v11497_v48 }
 0x1cf   : > { %11502 = vmatpush3.bf16.xpose.msk.msra.mxu1 %vm12882_vm4, %v11497_v48 }
 0x1d0   : > { %11511 = vmatprep.subr.msk.bf16.mxu1 %vm12943_vm6, %v12840_v5 }
 0x1d6   : > { %10810 = vmatmul.mubr.msk.f32.vlgmr.msra.gmra.mrb[24].mxu1 %vm1931_vm3, %v1235_v47 }
 0x1d7   : > { %11514 = vmatpush3.bf16.msk.msra.mxu1 %vm12943_vm6, %v12840_v5 }
 0x1d8   : > { %11523 = vmatprep.subr.msk.bf16.mxu1 %vm12943_vm6, %v12844_v21 }
 0x27e   : > { %v10776_v42 = vpop.f32.mrb[26].mxu0 }
 0x27f   : > { %v2097_v11 = vpop.f32.mrb[27].mxu0  ;;  %v13001_v51 = vmul.f32 0.17677669, %v10776_v42 }
 0x280   : > { %v12991_v9 = vmul.f32 0.17677669, %v2097_v11 }
 0x281   : > { %v2655_v52 = vsel %vm2648_vm8, %v13001_v51, -inf }
 0x282   : > { %v2652_v12 = vsel %vm2644_vm7, %v12991_v9, -inf }
 0x283   : > { %2653 = vmax.xlane.f32.xlu0 %v2652_v12 }
 0x288   : > { %v10790_v14 = vpop.f32.mrb[28].mxu0 }
 0x289   : > { %v10769_v17 = vpop.f32.mrb[18].mxu1  ;;  %v2271_v19 = vpop.f32.mrb[29].mxu0  ;;  %v13011_v62 = vmul.f32 0.17677669, %v10790_v14 }
 0x28a   : > { %v12995_v26 = vmul.f32 0.17677669, %v10769_v17  ;;  %v2010_v49 = vpop.f32.mrb[19].mxu1  ;;  %v13015_v37 = vmul.f32 0.17677669, %v2271_v19 }
 0x28b   : > { %v12997_v5 = vmul.f32 0.17677669, %v2010_v49  ;;  %v2667_v63 = vsel %vm2648_vm8, %v13011_v62, -inf }
 0x28c   : > { %v2649_v7 = vsel %vm2648_vm8, %v12995_v26, -inf  ;;  %v2664_v3 = vsel %vm2644_vm7, %v13015_v37, -inf }
 0x28d   : > { %2650 = vmax.xlane.f32.xlu1 %v2649_v7  ;;  %v2645_v1 = vsel %vm2644_vm7, %v12997_v5, -inf }
 0x28e   : > { %2646 = vmax.xlane.f32.xlu0 %v2645_v1 }
 0x292   : > { %2656 = vmax.xlane.f32.xlu0 %v2655_v52 }
 0x293   : > { %v10804_v54 = vpop.f32.mrb[30].mxu0 }
 0x294   : > { %v10783_v57 = vpop.f32.mrb[20].mxu1  ;;  %v2445_v59 = vpop.f32.mrb[31].mxu0  ;;  %v13027_v32 = vmul.f32 0.17677669, %v10804_v54 }
 0x295   : > { %v13007_v6 = vmul.f32 0.17677669, %v10783_v57  ;;  %v2184_v61 = vpop.f32.mrb[21].mxu1  ;;  %v13031_v2 = vmul.f32 0.17677669, %v2445_v59 }
 0x296   : > { %v13009_v16 = vmul.f32 0.17677669, %v2184_v61  ;;  %v2679_v8 = vsel %vm2648_vm8, %v13027_v32, -inf }
 0x297   : > { %v2661_v20 = vsel %vm2648_vm8, %v13007_v6, -inf  ;;  %v2676_v10 = vsel %vm2644_vm7, %v13031_v2, -inf }
 0x298   : > { %2662 = vmax.xlane.f32.xlu0 %v2661_v20  ;;  %v2658_v56 = vsel %vm2644_vm7, %v13009_v16, -inf }
 0x299   : > { %2659 = vmax.xlane.f32.xlu1 %v2658_v56 }
 0x29c   : > { %2668 = vmax.xlane.f32.xlu0 %v2667_v63 }
 0x29d   : > { %2665 = vmax.xlane.f32.xlu1 %v2664_v3 }
 0x29e   : > { %v10818_v18 = vpop.f32.mrb[32].mxu0 }
 0x29f   : > { %v10797_v23 = vpop.f32.mrb[22].mxu1  ;;  %v2619_v24 = vpop.f32.mrb[33].mxu0  ;;  %v13043_v45 = vmul.f32 0.17677669, %v10818_v18 }
 0x2a0   : > { %v13023_v25 = vmul.f32 0.17677669, %v10797_v23  ;;  %v2358_v28 = vpop.f32.mrb[23].mxu1  ;;  %v13047_v48 = vmul.f32 0.17677669, %v2619_v24 }
 0x2a1   : > { %v13025_v29 = vmul.f32 0.17677669, %v2358_v28  ;;  %v2691_v42 = vsel %vm2648_vm8, %v13043_v45, -inf }
 0x2a2   : > { %v2673_v34 = vsel %vm2648_vm8, %v13023_v25, -inf  ;;  %v2688_v11 = vsel %vm2644_vm7, %v13047_v48, -inf }
 0x2a3   : > { %2674 = vmax.xlane.f32.xlu0 %v2673_v34  ;;  %v2670_v0 = vsel %vm2644_vm7, %v13025_v29, -inf }
 0x2a4   : > { %2671 = vmax.xlane.f32.xlu1 %v2670_v0 }
 0x2a7   : > { %2680 = vmax.xlane.f32.xlu0 %v2679_v8 }
 0x2a8   : > { %2677 = vmax.xlane.f32.xlu1 %v2676_v10 }
 0x2a9   : > { %v10811_v35 = vpop.f32.mrb[24].mxu1 }
 0x2aa   : > { %v13039_v39 = vmul.f32 0.17677669, %v10811_v35  ;;  %v2532_v43 = vpop.f32.mrb[25].mxu1 }
 0x2ab   : > { %v13041_v58 = vmul.f32 0.17677669, %v2532_v43 }
 0x2ac   : > { %v2685_v36 = vsel %vm2648_vm8, %v13039_v39, -inf }
 0x2ad   : > { %2686 = vmax.xlane.f32.xlu0 %v2685_v36  ;;  %v2682_v47 = vsel %vm2644_vm7, %v13041_v58, -inf }
 0x2ae   : > { %2683 = vmax.xlane.f32.xlu1 %v2682_v47 }
 0x2b1   : > { %2692 = vmax.xlane.f32.xlu0 %v2691_v42 }
 0x2b2   : > { %2689 = vmax.xlane.f32.xlu1 %v2688_v11 }
 0x310   : > { %v2654_v12 = vpop.xlane.xlu0 %2653 }
 0x311   : > { %v2696_v14 = vsub.f32 %v12991_v9, %v2654_v12 }
 0x313   : > { %v2714_v52 = vmul.f32 1.442695, %v2696_v14 }
 0x31a   : > { %v2651_v17 = vpop.xlane.xlu1 %2650 }
 0x31b   : > { %v2695_v19 = vsub.f32 %v12995_v26, %v2651_v17  ;;  %v2647_v49 = vpop.xlane.xlu0 %2646 }
 0x31c   : > { %v2694_v7 = vsub.f32 %v12997_v5, %v2647_v49 }
 0x31d   : > { %v2712_v1 = vmul.f32 1.442695, %v2695_v19 }
 0x31e   : > { %v2710_v54 = vmul.f32 1.442695, %v2694_v7 }
 0x31f   : > { %11986 = vpow2.f32 %v2712_v1  ;;  %v2657_v57 = vpop.xlane.xlu0 %2656 }
 0x320   : > { %11988 = vpow2.f32 %v2710_v54  ;;  %v2697_v59 = vsub.f32 %v13001_v51, %v2657_v57 }
 0x321   : > { %11990 = vpow2.f32 %v2714_v52 }
 0x322   : > { %v2716_v61 = vmul.f32 1.442695, %v2697_v59 }
 0x324   : > { %11992 = vpow2.f32 %v2716_v61 }
 0x325   : > { %v2663_v20 = vpop.xlane.xlu0 %2662 }
 0x326   : > { %v2699_v9 = vsub.f32 %v13007_v6, %v2663_v20  ;;  %v2660_v56 = vpop.xlane.xlu1 %2659 }
 0x327   : > { %v2698_v26 = vsub.f32 %v13009_v16, %v2660_v56 }
 0x328   : > { %v2720_v63 = vmul.f32 1.442695, %v2699_v9 }
 0x329   : > { %v13061_v3 = vpop.eup %11986  ;;  %v2718_v5 = vmul.f32 1.442695, %v2698_v26  ;;  %v2669_v18 = vpop.xlane.xlu0 %2668 }
 0x32a   : > { %v13063_v23 = vpop.eup %11988  ;;  %11994 = vpow2.f32 %v2720_v63  ;;  %v2701_v24 = vsub.f32 %v13011_v62, %v2669_v18  ;;  %v2666_v51 = vpop.xlane.xlu1 %2665  ;;  %v2745_v28 = vsel %vm2648_vm8, %v13061_v3, 0.0 }
 0x32b   : > { %11996 = vpow2.f32 %v2718_v5  ;;  %v2700_v6 = vsub.f32 %v13015_v37, %v2666_v51  ;;  %2746 = vadd.xlane.f32.xlu0 %v2745_v28  ;;  %v2742_v16 = vsel %vm2644_vm7, %v13063_v23, 0.0  ;;  %v13071_v34 = vpop.eup %11990 }
 0x32c   : > { %v2724_v0 = vmul.f32 1.442695, %v2701_v24  ;;  %2743 = vadd.xlane.f32.xlu1 %v2742_v16  ;;  %v2748_v35 = vsel %vm2644_vm7, %v13071_v34, 0.0 }
 0x32d   : > { %v2722_v8 = vmul.f32 1.442695, %v2700_v6 }
 0x32e   : > { %v13073_v10 = vpop.eup %11992  ;;  %11998 = vpow2.f32 %v2724_v0 }
 0x32f   : > { %12000 = vpow2.f32 %v2722_v8  ;;  %v2751_v62 = vsel %vm2648_vm8, %v13073_v10, 0.0 }
 0x330   : > { %v2675_v37 = vpop.xlane.xlu0 %2674  ;;  %2752 = vadd.xlane.f32.xlu0 %v2751_v62  ;;  %2749 = vadd.xlane.f32.xlu1 %v2748_v35 }
 0x331   : > { %v2703_v43 = vsub.f32 %v13023_v25, %v2675_v37  ;;  %v2672_v36 = vpop.xlane.xlu1 %2671 }
 0x332   : > { %v2702_v47 = vsub.f32 %v13025_v29, %v2672_v36 }
 0x333   : > { %v2728_v42 = vmul.f32 1.442695, %v2703_v43 }
 0x334   : > { %v13081_v11 = vpop.eup %11994  ;;  %v2726_v12 = vmul.f32 1.442695, %v2702_v47  ;;  %v2681_v14 = vpop.xlane.xlu0 %2680 }
 0x335   : > { %v13083_v17 = vpop.eup %11996  ;;  %12002 = vpow2.f32 %v2728_v42  ;;  %v2705_v19 = vsub.f32 %v13027_v32, %v2681_v14  ;;  %v2678_v49 = vpop.xlane.xlu1 %2677  ;;  %v2757_v7 = vsel %vm2648_vm8, %v13081_v11, 0.0 }
 0x336   : > { %12004 = vpow2.f32 %v2726_v12  ;;  %v2704_v25 = vsub.f32 %v13031_v2, %v2678_v49  ;;  %2758 = vadd.xlane.f32.xlu0 %v2757_v7  ;;  %v2754_v29 = vsel %vm2644_vm7, %v13083_v17, 0.0 }
 0x337   : > { %v2732_v1 = vmul.f32 1.442695, %v2705_v19  ;;  %2755 = vadd.xlane.f32.xlu1 %v2754_v29 }
 0x338   : > { %v13091_v52 = vpop.eup %11998  ;;  %v2730_v54 = vmul.f32 1.442695, %v2704_v25 }
 0x339   : > { %v13093_v57 = vpop.eup %12000  ;;  %12006 = vpow2.f32 %v2732_v1  ;;  %v2763_v32 = vsel %vm2648_vm8, %v13091_v52, 0.0 }
 0x33a   : > { %12008 = vpow2.f32 %v2730_v54  ;;  %v2687_v59 = vpop.xlane.xlu0 %2686  ;;  %2764 = vadd.xlane.f32.xlu0 %v2763_v32  ;;  %v2760_v2 = vsel %vm2644_vm7, %v13093_v57, 0.0 }
 0x33b   : > { %v2707_v61 = vsub.f32 %v13039_v39, %v2687_v59  ;;  %v2684_v20 = vpop.xlane.xlu1 %2683  ;;  %2761 = vadd.xlane.f32.xlu1 %v2760_v2 }
 0x33c   : > { %v2706_v9 = vsub.f32 %v13041_v58, %v2684_v20 }
 0x33d   : > { %v2736_v56 = vmul.f32 1.442695, %v2707_v61 }
 0x33e   : > { %v2734_v26 = vmul.f32 1.442695, %v2706_v9  ;;  %v2693_v63 = vpop.xlane.xlu0 %2692 }
 0x33f   : > { %v13101_v5 = vpop.eup %12002  ;;  %12010 = vpow2.f32 %v2736_v56  ;;  %v2709_v18 = vsub.f32 %v13043_v45, %v2693_v63  ;;  %v2690_v24 = vpop.xlane.xlu1 %2689 }
 0x340   : > { %v13104_v51 = vpop.eup %12004  ;;  %12012 = vpow2.f32 %v2734_v26  ;;  %v2708_v28 = vsub.f32 %v13047_v48, %v2690_v24  ;;  %v2769_v39 = vsel %vm2648_vm8, %v13101_v5, 0.0 }
 0x341   : > { %v2740_v6 = vmul.f32 1.442695, %v2709_v18  ;;  %2770 = vadd.xlane.f32.xlu0 %v2769_v39  ;;  %v2766_v58 = vsel %vm2644_vm7, %v13104_v51, 0.0 }
 0x342   : > { %v2738_v16 = vmul.f32 1.442695, %v2708_v28  ;;  %2767 = vadd.xlane.f32.xlu1 %v2766_v58 }
 0x343   : > { %v13111_v0 = vpop.eup %12006  ;;  %12014 = vpow2.f32 %v2740_v6 }
 0x344   : > { %v13113_v45 = vpop.eup %12008  ;;  %12016 = vpow2.f32 %v2738_v16  ;;  %v2775_v8 = vsel %vm2648_vm8, %v13111_v0, 0.0 }
 0x345   : > { %2776 = vadd.xlane.f32.xlu0 %v2775_v8  ;;  %v2772_v48 = vsel %vm2644_vm7, %v13113_v45, 0.0 }
 0x346   : > { %2773 = vadd.xlane.f32.xlu1 %v2772_v48 }
 0x349   : > { %v13119_v62 = vpop.eup %12010 }
 0x34a   : > { %v13121_v35 = vpop.eup %12012  ;;  %v2781_v37 = vsel %vm2648_vm8, %v13119_v62, 0.0 }
 0x34b   : > { %2782 = vadd.xlane.f32.xlu0 %v2781_v37  ;;  %v2778_v43 = vsel %vm2644_vm7, %v13121_v35, 0.0 }
 0x34c   : > { %2779 = vadd.xlane.f32.xlu1 %v2778_v43 }
 0x34d   : > { %v13127_v36 = vpop.eup %12014 }
 0x34e   : > { %v13129_v47 = vpop.eup %12016  ;;  %v2787_v42 = vsel %vm2648_vm8, %v13127_v36, 0.0 }
 0x34f   : > { %2788 = vadd.xlane.f32.xlu0 %v2787_v42  ;;  %v2784_v12 = vsel %vm2644_vm7, %v13129_v47, 0.0 }
 0x350   : > { %2785 = vadd.xlane.f32.xlu1 %v2784_v12 }
 0x3b8   : > { %v2747_v14 = vpop.xlane.xlu0 %2746 }
 0x3b9   : > { %12018 = vrcp.f32 %v2747_v14  ;;  %v2744_v19 = vpop.xlane.xlu1 %2743 }
 0x3ba   : > { %12020 = vrcp.f32 %v2744_v19  ;;  %v12210_v19 = vld [vmem:[%s12357_s19] sm:$0xff] }
 0x3bd   : > { %v2753_v49 = vpop.xlane.xlu0 %2752  ;;  %v2750_v7 = vpop.xlane.xlu1 %2749 }
 0x3be   : > { %12022 = vrcp.f32 %v2753_v49 }
 0x3bf   : > { %12024 = vrcp.f32 %v2750_v7 }
 0x3c3   : > { %v12019_v25 = vpop.eup %12018  ;;  %v2759_v29 = vpop.xlane.xlu0 %2758 }
 0x3c4   : > { %v12021_v1 = vpop.eup %12020  ;;  %12026 = vrcp.f32 %v2759_v29  ;;  %v2756_v54 = vpop.xlane.xlu1 %2755  ;;  %v13139_v59 = vmul.f32 %v12019_v25, %v13061_v3  ;;  %v12211_v29 = vld [vmem:[%s12357_s19 + $0x8] sm:$0xf] }
 0x3c5   : > { %12028 = vrcp.f32 %v2756_v54  ;;  %v13136_v32 = vmul.f32 %v12021_v1, %v13063_v23 }
 0x3c7   : > { %v2765_v2 = vpop.xlane.xlu0 %2764  ;;  %10823 = vmatprep.mubr.msk.f32.mxu1 %vm2644_vm7, %v13136_v32 }
 0x3c8   : > { %v12023_v61 = vpop.eup %12022  ;;  %12030 = vrcp.f32 %v2765_v2  ;;  %v2762_v20 = vpop.xlane.xlu1 %2761  ;;  %10824 = vmatmul.mubr.msk.f32.vlgmr.msra.gmra.mrb[26].mxu1 %vm2644_vm7, %v13139_v59  ;;  %v12212_v2 = vld [vmem:[%s12357_s19 + $0x10] sm:$0xff] }
 0x3c9   : > { %v12025_v9 = vpop.eup %12024  ;;  %12032 = vrcp.f32 %v2762_v20  ;;  %11526 = vmatpush3.bf16.msk.msra.mxu1 %vm12943_vm6, %v12844_v21  ;;  %v13149_v23 = vmul.f32 %v12023_v61, %v13073_v10 }
 0x3ca   : > { %11535 = vmatprep.subr.msk.bf16.mxu1 %vm12943_vm6, %v12848_v41  ;;  %v13155_v3 = vmul.f32 %v12025_v9, %v13071_v34  ;;  %v12213_v9 = vld [vmem:[%s12357_s19 + $0x18] sm:$0xf] }
 0x3cc   : > { %10830 = vmatprep.mubr.msk.f32.mxu0 %vm2644_vm7, %v13155_v3 }
 0x3cd   : > { %10831 = vmatmul.mubr.msk.f32.vlgmr.msra.gmra.mrb[34].mxu0 %vm2644_vm7, %v13149_v23 }
 0x3ce   : > { %v12027_v56 = vpop.eup %12026  ;;  %v2771_v26 = vpop.xlane.xlu0 %2770  ;;  %11532 = vmatpush3.bf16.msk.msra.mxu0 %vm12943_vm6, %v12846_v27 }
 0x3cf   : > { %v12029_v21 = vpop.eup %12028  ;;  %12034 = vrcp.f32 %v2771_v26  ;;  %v2768_v10 = vpop.xlane.xlu1 %2767  ;;  %11541 = vmatprep.subr.msk.bf16.mxu0 %vm12943_vm6, %v12850_v50  ;;  %v13171_v63 = vmul.f32 %v12027_v56, %v13081_v11 }
 0x3d0   : > { %12036 = vrcp.f32 %v2768_v10  ;;  %v13168_v34 = vmul.f32 %v12029_v21, %v13083_v17 }
 0x3d2   : > { %v12031_v18 = vpop.eup %12030  ;;  %v2777_v24 = vpop.xlane.xlu0 %2776  ;;  %10837 = vmatprep.mubr.msk.f32.mxu1 %vm2644_vm7, %v13168_v34 }
 0x3d3   : > { %v12033_v27 = vpop.eup %12032  ;;  %12038 = vrcp.f32 %v2777_v24  ;;  %v2774_v28 = vpop.xlane.xlu1 %2773  ;;  %10838 = vmatmul.mubr.msk.f32.vlgmr.msra.gmra.mrb[28].mxu1 %vm2644_vm7, %v13171_v63  ;;  %v13187_v11 = vmul.f32 %v12031_v18, %v13091_v52 }
 0x3d4   : > { %12040 = vrcp.f32 %v2774_v28  ;;  %11538 = vmatpush3.bf16.msk.msra.mxu1 %vm12943_vm6, %v12848_v41  ;;  %v13181_v17 = vmul.f32 %v12033_v27, %v13093_v57 }
 0x3d5   : > { %11547 = vmatprep.subr.msk.bf16.mxu1 %vm12943_vm6, %v12852_v55 }
 0x3d6   : > { %10844 = vmatprep.mubr.msk.f32.mxu0 %vm2644_vm7, %v13181_v17 }
 0x3d7   : > { %10845 = vmatmul.mubr.msk.f32.vlgmr.msra.gmra.mrb[36].mxu0 %vm2644_vm7, %v13187_v11 }
 0x3d8   : > { %v2783_v39 = vpop.xlane.xlu0 %2782  ;;  %11544 = vmatpush3.bf16.msk.msra.mxu0 %vm12943_vm6, %v12850_v50 }
 0x3d9   : > { %v12035_v41 = vpop.eup %12034  ;;  %12042 = vrcp.f32 %v2783_v39  ;;  %v2780_v57 = vpop.xlane.xlu1 %2779  ;;  %11553 = vmatprep.subr.msk.bf16.mxu0 %vm12943_vm6, %v12854_v31 }
 0x3da   : > { %v12037_v52 = vpop.eup %12036  ;;  %12044 = vrcp.f32 %v2780_v57  ;;  %v13203_v16 = vmul.f32 %v12035_v41, %v13101_v5 }
 0x3db   : > { %v13200_v6 = vmul.f32 %v12037_v52, %v13104_v51 }
 0x3dc   : > { %v2789_v58 = vpop.xlane.xlu0 %2788 }
 0x3dd   : > { %v12039_v8 = vpop.eup %12038  ;;  %12046 = vrcp.f32 %v2789_v58  ;;  %v2786_v48 = vpop.xlane.xlu1 %2785  ;;  %10851 = vmatprep.mubr.msk.f32.mxu1 %vm2644_vm7, %v13200_v6  ;;  %v12215_v58 = vld [vmem:[%s12357_s19 + $0x28] sm:$0xf] }
 0x3de   : > { %v12041_v50 = vpop.eup %12040  ;;  %12048 = vrcp.f32 %v2786_v48  ;;  %10852 = vmatmul.mubr.msk.f32.vlgmr.msra.gmra.mrb[30].mxu1 %vm2644_vm7, %v13203_v16  ;;  %v13216_v5 = vmul.f32 %v12039_v8, %v13111_v0 }
 0x3df   : > { %11550 = vmatpush3.bf16.msk.msra.mxu1 %vm12943_vm6, %v12852_v55  ;;  %v13213_v51 = vmul.f32 %v12041_v50, %v13113_v45  ;;  %v12216_v50 = vld [vmem:[%s12357_s19 + $0x30] sm:$0xff] }
 0x3e1   : > { %10858 = vmatprep.mubr.msk.f32.mxu0 %vm2644_vm7, %v13213_v51 }
 0x3e2   : > { %10859 = vmatmul.mubr.msk.f32.vlgmr.msra.gmra.mrb[38].mxu0 %vm2644_vm7, %v13216_v5 }
 0x3e3   : > { %v12043_v37 = vpop.eup %12042  ;;  %11556 = vmatpush3.bf16.msk.msra.mxu0 %vm12943_vm6, %v12854_v31 }
 0x3e4   : > { %v12045_v43 = vpop.eup %12044  ;;  %v13229_v45 = vmul.f32 %v12043_v37, %v13119_v62 }
 0x3e5   : > { %v13226_v55 = vmul.f32 %v12045_v43, %v13121_v35 }
 0x3e7   : > { %v12047_v0 = vpop.eup %12046  ;;  %10865 = vmatprep.mubr.msk.f32.mxu1 %vm2644_vm7, %v13226_v55 }
 0x3e8   : > { %v12049_v42 = vpop.eup %12048  ;;  %10866 = vmatmul.mubr.msk.f32.vlgmr.msra.gmra.mrb[32].mxu1 %vm2644_vm7, %v13229_v45  ;;  %v13239_v31 = vmul.f32 %v12047_v0, %v13127_v36  ;;  %v12217_v0 = vld [vmem:[%s12357_s19 + $0x38] sm:$0xf] }
 0x3e9   : > { %v13236_v12 = vmul.f32 %v12049_v42, %v13129_v47 }
 0x3ea   : > { %15511 = vst [vmem:[#allocation4_spill] sm:$0xff] %v13239_v31 }
 0x3eb   : > { %15510 = vst [vmem:[#allocation3_spill] sm:$0xff] %v13236_v12  ;;  %10872 = vmatprep.mubr.msk.f32.mxu0 %vm2644_vm7, %v13236_v12 }
 0x3ec   : > { %10873 = vmatmul.mubr.msk.f32.vlgmr.msra.gmra.mrb[40].mxu0 %vm2644_vm7, %v13239_v31 }
 0x49b   : > { %v10825_v62 = vpop.f32.mrb[26].mxu1 }
 0x49c   : > { %v2938_v35 = vpop.f32.mrb[27].mxu1  ;;  %v13254_v1 = vadd.f32 %v12211_v29, %v10825_v62  ;;  %v12218_v29 = vld [vmem:[%s12357_s19 + $0x40] sm:$0xff] }
 0x49d   : > { %v3550_v14 = vcombine.high %v2938_v35, %v2938_v35  ;;  %v13246_v49 = vadd.f32 %v12210_v19, %v2938_v35 }
 0x49f   : > { %v13249_v47 = vadd.f32 %v3550_v14, %v12391_v22 }
 0x4a0   : > { %v10832_v7 = vpop.f32.mrb[34].mxu0 }
 0x4a1   : > { %v3023_v25 = vpop.f32.mrb[35].mxu0  ;;  %v3614_v36 = vcombine.low %v13246_v49, %v13249_v47  ;;  %v13261_v56 = vadd.f32 %v12213_v9, %v10832_v7 }
 0x4a2   : > { %v3551_v54 = vcombine.high %v3023_v25, %v3023_v25  ;;  %v13257_v61 = vadd.f32 %v12212_v2, %v3023_v25 }
 0x4a3   : > { %v3638_v20 = vsel %vm411_vm1, %v3614_v36, 0.0 }
 0x4a4   : > { %v13264_v22 = vadd.f32 %v3551_v54, %v12407_v30  ;;  %3639 = vadd.xlane.f32.xlu1 %v3638_v20  ;;  %v3615_v26 = vcombine.low %v13254_v1, %v13257_v61  ;;  %v12214_v30 = vld [vmem:[%s12357_s19 + $0x20] sm:$0xff] }
 0x4a6   : > { %v10839_v21 = vpop.f32.mrb[28].mxu1  ;;  %v3641_v10 = vsel %vm411_vm1, %v3615_v26, 0.0  ;;  %v3616_v18 = vcombine.low %v13264_v22, %v13261_v56  ;;  %v12219_v26 = vld [vmem:[%s12357_s19 + $0x48] sm:$0xf] }
 0x4a7   : > { %3642 = vadd.xlane.f32.xlu0 %v3641_v10  ;;  %v3108_v24 = vpop.f32.mrb[29].mxu1  ;;  %v13279_v8 = vadd.f32 %v12215_v58, %v10839_v21 }
 0x4a8   : > { %v3552_v27 = vcombine.high %v3108_v24, %v3108_v24  ;;  %v3644_v28 = vsel %vm411_vm1, %v3616_v18, 0.0  ;;  %v13273_v39 = vadd.f32 %v12214_v30, %v3108_v24  ;;  %v12220_v18 = vld [vmem:[%s12357_s19 + $0x50] sm:$0xff] }
 0x4a9   : > { %3645 = vadd.xlane.f32.xlu1 %v3644_v28  ;;  %v12221_v28 = vld [vmem:[%s12357_s19 + $0x58] sm:$0xf] }
 0x4aa   : > { %v13276_v41 = vadd.f32 %v3552_v27, %v12417_v33  ;;  %v10846_v57 = vpop.f32.mrb[36].mxu0 }
 0x4ab   : > { %v3193_v52 = vpop.f32.mrb[37].mxu0  ;;  %v13287_v42 = vadd.f32 %v12217_v0, %v10846_v57 }
 0x4ac   : > { %v3553_v48 = vcombine.high %v3193_v52, %v3193_v52  ;;  %v13282_v37 = vadd.f32 %v12216_v50, %v3193_v52  ;;  %v3617_v43 = vcombine.low %v13273_v39, %v13276_v41 }
 0x4ae   : > { %v13290_v62 = vadd.f32 %v3553_v48, %v12437_v40  ;;  %v3647_v33 = vsel %vm411_vm1, %v3617_v43, 0.0  ;;  %v3618_v35 = vcombine.low %v13279_v8, %v13282_v37 }
 0x4af   : > { %3648 = vadd.xlane.f32.xlu0 %v3647_v33  ;;  %v12222_v33 = vld [vmem:[%s12357_s19 + $0x60] sm:$0xff] }
 0x4b0   : > { %v3650_v14 = vsel %vm411_vm1, %v3618_v35, 0.0  ;;  %v3619_v19 = vcombine.low %v13290_v62, %v13287_v42 }
 0x4b1   : > { %v10853_v7 = vpop.f32.mrb[30].mxu1  ;;  %3651 = vadd.xlane.f32.xlu1 %v3650_v14 }
 0x4b2   : > { %v3278_v25 = vpop.f32.mrb[31].mxu1  ;;  %v3653_v40 = vsel %vm411_vm1, %v3619_v19, 0.0  ;;  %v13306_v21 = vadd.f32 %v12219_v26, %v10853_v7  ;;  %v12225_v26 = vld [vmem:[%s12357_s19 + $0x78] sm:$0xf] }
 0x4b3   : > { %v3554_v36 = vcombine.high %v3278_v25, %v3278_v25  ;;  %3654 = vadd.xlane.f32.xlu0 %v3653_v40  ;;  %v13300_v54 = vadd.f32 %v12218_v29, %v3278_v25  ;;  %v12223_v25 = vld [vmem:[%s12357_s19 + $0x68] sm:$0xf]  ;;  %v12224_v29 = vld [vmem:[%s12357_s19 + $0x70] sm:$0xff] }
 0x4b5   : > { %v13303_v2 = vadd.f32 %v3554_v36, %v12452_v44  ;;  %v10860_v20 = vpop.f32.mrb[38].mxu0 }
 0x4b6   : > { %v3363_v9 = vpop.f32.mrb[39].mxu0  ;;  %v13314_v30 = vadd.f32 %v12221_v28, %v10860_v20 }
 0x4b7   : > { %v3555_v10 = vcombine.high %v3363_v9, %v3363_v9  ;;  %v13309_v24 = vadd.f32 %v12220_v18, %v3363_v9  ;;  %v3620_v27 = vcombine.low %v13300_v54, %v13303_v2 }
 0x4b9   : > { %v13317_v57 = vadd.f32 %v3555_v10, %v12471_v53  ;;  %v3656_v44 = vsel %vm411_vm1, %v3620_v27, 0.0  ;;  %v3621_v52 = vcombine.low %v13306_v21, %v13309_v24 }
 0x4ba   : > { %3657 = vadd.xlane.f32.xlu1 %v3656_v44 }
 0x4bb   : > { %v10867_v58 = vpop.f32.mrb[32].mxu1  ;;  %v3659_v48 = vsel %vm411_vm1, %v3621_v52, 0.0  ;;  %v3622_v50 = vcombine.low %v13317_v57, %v13314_v30 }
 0x4bc   : > { %3660 = vadd.xlane.f32.xlu0 %v3659_v48  ;;  %v3448_v43 = vpop.f32.mrb[33].mxu1  ;;  %v13333_v40 = vadd.f32 %v12223_v25, %v10867_v58  ;;  %v12272_v58 = vmov 839922192  }
 0x4bd   : > { %v3556_v0 = vcombine.high %v3448_v43, %v3448_v43  ;;  %v3662_v53 = vsel %vm411_vm1, %v3622_v50, 0.0  ;;  %v13327_v35 = vadd.f32 %v12222_v33, %v3448_v43  ;;  %v3700_v48 = vunpack.c.l.s4 %v12272_v58 }
 0x4be   : > { %3663 = vadd.xlane.f32.xlu1 %v3662_v53  ;;  %v12273_v50 = vmov 1985246804  }
 0x4bf   : > { %v13330_v14 = vadd.f32 %v3556_v0, %v12488_v60  ;;  %v10874_v19 = vpop.f32.mrb[40].mxu0  ;;  %v3701_v43 = vunpack.c.0.s8 %v3700_v48 }
 0x4c0   : > { %v3533_v7 = vpop.f32.mrb[41].mxu0  ;;  %v13341_v10 = vadd.f32 %v12225_v26, %v10874_v19 }
 0x4c1   : > { %v3557_v36 = vcombine.high %v3533_v7, %v3533_v7  ;;  %v13336_v20 = vadd.f32 %v12224_v29, %v3533_v7  ;;  %v3623_v9 = vcombine.low %v13327_v35, %v13330_v14  ;;  %v13354_v53 = vsub.s32 %v3701_v43, %v12825_v38 }
 0x4c3   : > { %v13344_v18 = vadd.f32 %v3557_v36, %v12509_v4  ;;  %v3665_v60 = vsel %vm411_vm1, %v3623_v9, 0.0  ;;  %v3624_v27 = vcombine.low %v13333_v40, %v13336_v20  ;;  %v3707_v4 = vunpack.c.l.s4 %v12273_v50  ;;  %15512 = vst [vmem:[#allocation5_spill] sm:$0xff] %v13354_v53 }
 0x4c4   : > { %3666 = vadd.xlane.f32.xlu0 %v3665_v60 }
 0x4c5   : > { %v3668_v28 = vsel %vm411_vm1, %v3624_v27, 0.0  ;;  %v3625_v44 = vcombine.low %v13344_v18, %v13341_v10  ;;  %v3708_v0 = vunpack.c.0.s8 %v3707_v4 }
 0x4c6   : > { %3669 = vadd.xlane.f32.xlu1 %v3668_v28 }
 0x4c7   : > { %v3671_v52 = vsel %vm411_vm1, %v3625_v44, 0.0  ;;  %v13357_v33 = vsub.s32 %v3708_v0, %v12825_v38 }
 0x4c8   : > { %3672 = vadd.xlane.f32.xlu0 %v3671_v52 }
 0x4c9   : > { %15513 = vst [vmem:[#allocation6_spill] sm:$0xff] %v13357_v33 }
 0x531   : > { %v3640_v19 = vpop.xlane.xlu1 %3639 }
 0x532   : > { %v3675_v7 = vmul.f32 0.03125, %v3640_v19 }
 0x534   : > { %v3705_v25 = vrot.slane %v3675_v7, %v13354_v53  ;;  %v3712_v36 = vrot.slane %v3675_v7, %v13357_v33  ;;  %v3643_v29 = vpop.xlane.xlu0 %3642 }
 0x535   : > { %v3676_v9 = vmul.f32 0.03125, %v3643_v29 }
 0x536   : > { %v13362_v26 = vsub.f32 %v13246_v49, %v3705_v25  ;;  %v13365_v60 = vsub.f32 %v13249_v47, %v3712_v36  ;;  %v3646_v27 = vpop.xlane.xlu1 %3645 }
 0x537   : > { %v3719_v28 = vrot.slane %v3676_v9, %v13354_v53  ;;  %v3726_v44 = vrot.slane %v3676_v9, %v13357_v33  ;;  %v3677_v52 = vmul.f32 0.03125, %v3646_v27 }
 0x538   : > { %v3915_v58 = vmul.f32 %v13362_v26, %v13362_v26  ;;  %v3916_v48 = vmul.f32 %v13365_v60, %v13365_v60 }
 0x539   : > { %v13374_v50 = vsub.f32 %v13254_v1, %v3719_v28  ;;  %v13377_v49 = vsub.f32 %v13257_v61, %v3726_v44  ;;  %v3733_v47 = vrot.slane %v3677_v52, %v13354_v53  ;;  %v3740_v4 = vrot.slane %v3677_v52, %v13357_v33 }
 0x53a   : > { %v3963_v43 = vcombine.low %v3915_v58, %v3916_v48 }
 0x53b   : > { %v13382_v0 = vsub.f32 %v13264_v22, %v3733_v47  ;;  %v13385_v19 = vsub.f32 %v13261_v56, %v3740_v4  ;;  %v3917_v7 = vmul.f32 %v13374_v50, %v13374_v50  ;;  %v3918_v1 = vmul.f32 %v13377_v49, %v13377_v49 }
 0x53c   : > { %v3649_v25 = vpop.xlane.xlu0 %3648  ;;  %v3987_v61 = vsel %vm411_vm1, %v3963_v43, 0.0 }
 0x53d   : > { %v3678_v36 = vmul.f32 0.03125, %v3649_v25  ;;  %3988 = vadd.xlane.f32.xlu1 %v3987_v61  ;;  %v3964_v29 = vcombine.low %v3917_v7, %v3918_v1  ;;  %v3919_v9 = vmul.f32 %v13382_v0, %v13382_v0  ;;  %v3920_v22 = vmul.f32 %v13385_v19, %v13385_v19 }
 0x53e   : > { %v3652_v56 = vpop.xlane.xlu1 %3651 }
 0x53f   : > { %v3747_v27 = vrot.slane %v3678_v36, %v13354_v53  ;;  %v3754_v28 = vrot.slane %v3678_v36, %v13357_v33  ;;  %v3679_v44 = vmul.f32 0.03125, %v3652_v56  ;;  %v3990_v52 = vsel %vm411_vm1, %v3964_v29, 0.0 }
 0x540   : > { %v3655_v58 = vpop.xlane.xlu0 %3654  ;;  %3991 = vadd.xlane.f32.xlu0 %v3990_v52  ;;  %v3965_v48 = vcombine.low %v3919_v9, %v3920_v22 }
 0x541   : > { %v13400_v47 = vsub.f32 %v13273_v39, %v3747_v27  ;;  %v13403_v4 = vsub.f32 %v13276_v41, %v3754_v28  ;;  %v3761_v43 = vrot.slane %v3679_v44, %v13354_v53  ;;  %v3768_v7 = vrot.slane %v3679_v44, %v13357_v33 }
 0x542   : > { %v3680_v1 = vmul.f32 0.03125, %v3655_v58  ;;  %v3993_v25 = vsel %vm411_vm1, %v3965_v48, 0.0 }
 0x543   : > { %v13409_v61 = vsub.f32 %v13279_v8, %v3761_v43  ;;  %v13412_v36 = vsub.f32 %v13282_v37, %v3768_v7  ;;  %3994 = vadd.xlane.f32.xlu1 %v3993_v25  ;;  %v3921_v39 = vmul.f32 %v13400_v47, %v13400_v47  ;;  %v3922_v41 = vmul.f32 %v13403_v4, %v13403_v4 }
 0x544   : > { %v3775_v29 = vrot.slane %v3680_v1, %v13354_v53  ;;  %v3782_v9 = vrot.slane %v3680_v1, %v13357_v33 }
 0x545   : > { %v3966_v22 = vcombine.low %v3921_v39, %v3922_v41  ;;  %v3923_v56 = vmul.f32 %v13409_v61, %v13409_v61  ;;  %v3924_v8 = vmul.f32 %v13412_v36, %v13412_v36 }
 0x546   : > { %v13425_v37 = vsub.f32 %v13290_v62, %v3775_v29  ;;  %v13428_v27 = vsub.f32 %v13287_v42, %v3782_v9 }
 0x547   : > { %v3658_v28 = vpop.xlane.xlu1 %3657  ;;  %v3996_v44 = vsel %vm411_vm1, %v3966_v22, 0.0  ;;  %v3967_v52 = vcombine.low %v3923_v56, %v3924_v8 }
 0x548   : > { %v3681_v58 = vmul.f32 0.03125, %v3658_v28  ;;  %3997 = vadd.xlane.f32.xlu0 %v3996_v44  ;;  %v3925_v48 = vmul.f32 %v13425_v37, %v13425_v37  ;;  %v3926_v43 = vmul.f32 %v13428_v27, %v13428_v27 }
 0x549   : > { %v3661_v7 = vpop.xlane.xlu0 %3660  ;;  %v3999_v1 = vsel %vm411_vm1, %v3967_v52, 0.0 }
 0x54a   : > { %v3789_v62 = vrot.slane %v3681_v58, %v13354_v53  ;;  %v3796_v42 = vrot.slane %v3681_v58, %v13357_v33  ;;  %v3682_v25 = vmul.f32 0.03125, %v3661_v7  ;;  %4000 = vadd.xlane.f32.xlu1 %v3999_v1  ;;  %v3968_v39 = vcombine.low %v3925_v48, %v3926_v43 }
 0x54b   : > { %v3664_v41 = vpop.xlane.xlu1 %3663 }
 0x54c   : > { %v13439_v29 = vsub.f32 %v13300_v54, %v3789_v62  ;;  %v13442_v9 = vsub.f32 %v13303_v2, %v3796_v42  ;;  %v3803_v22 = vrot.slane %v3682_v25, %v13354_v53  ;;  %v3810_v56 = vrot.slane %v3682_v25, %v13357_v33 }
 0x54d   : > { %v3683_v8 = vmul.f32 0.03125, %v3664_v41  ;;  %v4002_v28 = vsel %vm411_vm1, %v3968_v39, 0.0 }
 0x54e   : > { %v13448_v44 = vsub.f32 %v13306_v21, %v3803_v22  ;;  %v13451_v52 = vsub.f32 %v13309_v24, %v3810_v56  ;;  %4003 = vadd.xlane.f32.xlu0 %v4002_v28  ;;  %v3927_v54 = vmul.f32 %v13439_v29, %v13439_v29  ;;  %v3928_v2 = vmul.f32 %v13442_v9, %v13442_v9 }
 0x54f   : > { %v3817_v58 = vrot.slane %v3683_v8, %v13354_v53  ;;  %v3824_v48 = vrot.slane %v3683_v8, %v13357_v33 }
 0x550   : > { %v3969_v43 = vcombine.low %v3927_v54, %v3928_v2  ;;  %v3929_v7 = vmul.f32 %v13448_v44, %v13448_v44  ;;  %v3930_v21 = vmul.f32 %v13451_v52, %v13451_v52 }
 0x551   : > { %v13464_v24 = vsub.f32 %v13317_v57, %v3817_v58  ;;  %v13467_v1 = vsub.f32 %v13314_v30, %v3824_v48  ;;  %v3667_v62 = vpop.xlane.xlu0 %3666 }
 0x552   : > { %v3684_v42 = vmul.f32 0.03125, %v3667_v62  ;;  %v4005_v25 = vsel %vm411_vm1, %v3969_v43, 0.0  ;;  %v3970_v39 = vcombine.low %v3929_v7, %v3930_v21 }
 0x553   : > { %4006 = vadd.xlane.f32.xlu1 %v4005_v25  ;;  %v3670_v41 = vpop.xlane.xlu1 %3669  ;;  %v3931_v22 = vmul.f32 %v13464_v24, %v13464_v24  ;;  %v3932_v56 = vmul.f32 %v13467_v1, %v13467_v1 }
 0x554   : > { %v3831_v8 = vrot.slane %v3684_v42, %v13354_v53  ;;  %v3838_v57 = vrot.slane %v3684_v42, %v13357_v33  ;;  %v3685_v28 = vmul.f32 0.03125, %v3670_v41  ;;  %v4008_v30 = vsel %vm411_vm1, %v3970_v39, 0.0 }
 0x555   : > { %4009 = vadd.xlane.f32.xlu0 %v4008_v30  ;;  %v3673_v54 = vpop.xlane.xlu0 %3672  ;;  %v3971_v2 = vcombine.low %v3931_v22, %v3932_v56 }
 0x556   : > { %v13478_v58 = vsub.f32 %v13327_v35, %v3831_v8  ;;  %v13481_v48 = vsub.f32 %v13330_v14, %v3838_v57  ;;  %v3845_v43 = vrot.slane %v3685_v28, %v13354_v53  ;;  %v3852_v7 = vrot.slane %v3685_v28, %v13357_v33 }
 0x557   : > { %v3686_v21 = vmul.f32 0.03125, %v3673_v54  ;;  %v4011_v62 = vsel %vm411_vm1, %v3971_v2, 0.0 }
 0x558   : > { %v13487_v42 = vsub.f32 %v13333_v40, %v3845_v43  ;;  %v13490_v25 = vsub.f32 %v13336_v20, %v3852_v7  ;;  %4012 = vadd.xlane.f32.xlu1 %v4011_v62  ;;  %v3933_v35 = vmul.f32 %v13478_v58, %v13478_v58  ;;  %v3934_v14 = vmul.f32 %v13481_v48, %v13481_v48  ;;  %v9768_v62 = vld [vmem:[%s15472_s3 + $0x30] sm:$0xff] }
 0x559   : > { %v3859_v39 = vrot.slane %v3686_v21, %v13354_v53  ;;  %v3866_v41 = vrot.slane %v3686_v21, %v13357_v33 }
 0x55a   : > { %v3972_v22 = vcombine.low %v3933_v35, %v3934_v14  ;;  %v3935_v56 = vmul.f32 %v13487_v42, %v13487_v42  ;;  %v3936_v40 = vmul.f32 %v13490_v25, %v13490_v25  ;;  %v9769_v35 = vld [vmem:[%s15472_s3 + $0x38] sm:$0xff] }
 0x55b   : > { %v13503_v20 = vsub.f32 %v13344_v18, %v3859_v39  ;;  %v13506_v8 = vsub.f32 %v13341_v10, %v3866_v41  ;;  %v9766_v18 = vld [vmem:[%s15472_s3 + $0x20] sm:$0xff]  ;;  %v9767_v10 = vld [vmem:[%s15472_s3 + $0x28] sm:$0xff]  ;;  %v11561_v14 = vpack.c.bf16 %v9769_v35, %v9768_v62  ;;  %v15477_v35 = vsub.s32 4, %v12825_v38 }
 0x55c   : > { %v4014_v57 = vsel %vm411_vm1, %v3972_v22, 0.0  ;;  %v3973_v28 = vcombine.low %v3935_v56, %v3936_v40  ;;  %v11557_v7 = vpack.c.bf16 %v9767_v10, %v9766_v18  ;;  %v9770_v39 = vld [vmem:[%s15472_s3 + $0x40] sm:$0xff]  ;;  %v9771_v41 = vld [vmem:[%s15472_s3 + $0x48] sm:$0xff]  ;;  %v15476_v10 = vsub.s32 3, %v12825_v38 }
 0x55d   : > { %4015 = vadd.xlane.f32.xlu0 %v4014_v57  ;;  %v3937_v30 = vmul.f32 %v13503_v20, %v13503_v20  ;;  %v3938_v54 = vmul.f32 %v13506_v8, %v13506_v8  ;;  %v11565_v22 = vpack.c.bf16 %v9771_v41, %v9770_v39 }
 0x55e   : > { %v4017_v2 = vsel %vm411_vm1, %v3973_v28, 0.0  ;;  %11558 = vmatprep.subr.bf16.mxu1 %v11557_v7 }
 0x55f   : > { %4018 = vadd.xlane.f32.xlu1 %v4017_v2  ;;  %v3974_v43 = vcombine.low %v3937_v30, %v3938_v54  ;;  %11560 = vmatpush3.bf16.msra.mxu1 %v11557_v7 }
 0x560   : > { %11562 = vmatprep.subr.bf16.mxu1 %v11561_v14  ;;  %11566 = vmatprep.subr.bf16.mxu0 %v11565_v22 }
 0x561   : > { %v4020_v21 = vsel %vm411_vm1, %v3974_v43, 0.0  ;;  %11568 = vmatpush3.bf16.msra.mxu0 %v11565_v22 }
 0x562   : > { %4021 = vadd.xlane.f32.xlu0 %v4020_v21  ;;  %v13537_v21 = vld [vmem:[%s15473_s4] sm:$0x7f] }
 0x563   : > { %11564 = vmatpush3.bf16.msra.mxu1 %v11561_v14  ;;  %v13542_v62 = vrot.slane %v13537_v21, %v15476_v10 }
 0x5ca   : > { %v3989_v56 = vpop.xlane.xlu1 %3988 }
 0x5cb   : > { %v4023_v40 = vmul.f32 0.03125, %v3989_v56 }
 0x5cd   : > { %v4035_v57 = vadd.f32 1e-05, %v4023_v40  ;;  %v3992_v28 = vpop.xlane.xlu0 %3991  ;;  %v13547_v40 = vcombine.high %v13542_v62, %v13542_v62 }
 0x5ce   : > { %v4024_v30 = vmul.f32 0.03125, %v3992_v28 }
 0x5cf   : > { %12050 = vrsqrt.f32 %v4035_v57  ;;  %v13552_v57 = vrot.slane %v13537_v21, %v15477_v35 }
 0x5d0   : > { %v4036_v54 = vadd.f32 1e-05, %v4024_v30  ;;  %v3995_v2 = vpop.xlane.xlu1 %3994 }
 0x5d1   : > { %v4025_v18 = vmul.f32 0.03125, %v3995_v2  ;;  %v13562_v35 = vcombine.high %v13552_v57, %v13552_v57 }
 0x5d2   : > { %12052 = vrsqrt.f32 %v4036_v54 }
 0x5d3   : > { %v4037_v43 = vadd.f32 1e-05, %v4025_v18 }
 0x5d5   : > { %12054 = vrsqrt.f32 %v4037_v43  ;;  %v3998_v7 = vpop.xlane.xlu0 %3997 }
 0x5d6   : > { %v4026_v14 = vmul.f32 0.03125, %v3998_v7 }
 0x5d7   : > { %v4001_v39 = vpop.xlane.xlu1 %4000 }
 0x5d8   : > { %v4038_v41 = vadd.f32 1e-05, %v4026_v14  ;;  %v4027_v22 = vmul.f32 0.03125, %v4001_v39 }
 0x5d9   : > { %v12051_v56 = vpop.eup %12050 }
 0x5da   : > { %v4077_v28 = vrot.slane %v12051_v56, %v13354_v53  ;;  %v4084_v30 = vrot.slane %v12051_v56, %v13357_v33  ;;  %12056 = vrsqrt.f32 %v4038_v41  ;;  %v4039_v54 = vadd.f32 1e-05, %v4027_v22 }
 0x5db   : > { %v4004_v2 = vpop.xlane.xlu0 %4003 }
 0x5dc   : > { %v12053_v18 = vpop.eup %12052  ;;  %12058 = vrsqrt.f32 %v4039_v54  ;;  %v4028_v43 = vmul.f32 0.03125, %v4004_v2  ;;  %v4263_v7 = vmul.f32 %v4077_v28, %v13362_v26  ;;  %v4264_v14 = vmul.f32 %v4084_v30, %v13365_v60 }
 0x5dd   : > { %v4091_v39 = vrot.slane %v12053_v18, %v13354_v53  ;;  %v4098_v10 = vrot.slane %v12053_v18, %v13357_v33 }
 0x5de   : > { %v4040_v46 = vadd.f32 1e-05, %v4028_v43  ;;  %v4294_v41 = vmul.f32 %v13542_v62, %v4263_v7  ;;  %v4295_v22 = vmul.f32 %v13547_v40, %v4264_v14 }
 0x5df   : > { %v12055_v56 = vpop.eup %12054  ;;  %v4265_v54 = vmul.f32 %v4091_v39, %v13374_v50  ;;  %v4266_v26 = vmul.f32 %v4098_v10, %v13377_v49 }
 0x5e0   : > { %v4105_v60 = vrot.slane %v12055_v56, %v13354_v53  ;;  %v4112_v28 = vrot.slane %v12055_v56, %v13357_v33  ;;  %12060 = vrsqrt.f32 %v4040_v46  ;;  %v4007_v30 = vpop.xlane.xlu1 %4006  ;;  %v4325_v2 = vadd.f32 %v13552_v57, %v4294_v41 }
 0x5e1   : > { %v4029_v18 = vmul.f32 0.03125, %v4007_v30  ;;  %v4326_v43 = vadd.f32 %v13562_v35, %v4295_v22  ;;  %v4296_v7 = vmul.f32 %v13542_v62, %v4265_v54  ;;  %v4297_v14 = vmul.f32 %v13547_v40, %v4266_v26 }
 0x5e2   : > { %v4010_v12 = vpop.xlane.xlu0 %4009  ;;  %v4267_v50 = vmul.f32 %v4105_v60, %v13382_v0  ;;  %v4268_v49 = vmul.f32 %v4112_v28, %v13385_v19 }
 0x5e3   : > { %v4041_v10 = vadd.f32 1e-05, %v4029_v18  ;;  %v4030_v39 = vmul.f32 0.03125, %v4010_v12  ;;  %v13576_v31 = vcombine.low %v4325_v2, %v4326_v43  ;;  %v4327_v46 = vadd.f32 %v13552_v57, %v4296_v7 }
 0x5e4   : > { %v12057_v56 = vpop.eup %12056  ;;  %v4328_v41 = vadd.f32 %v13562_v35, %v4297_v14  ;;  %v4298_v22 = vmul.f32 %v13542_v62, %v4267_v50  ;;  %v4299_v54 = vmul.f32 %v13547_v40, %v4268_v49 }
 0x5e5   : > { %v4119_v26 = vrot.slane %v12057_v56, %v13354_v53  ;;  %v4126_v30 = vrot.slane %v12057_v56, %v13357_v33  ;;  %12062 = vrsqrt.f32 %v4041_v10  ;;  %v4042_v0 = vadd.f32 1e-05, %v4030_v39  ;;  %v4013_v19 = vpop.xlane.xlu1 %4012  ;;  %10883 = vmatprep.mubr.msk.f32.mxu1 %vm411_vm1, %v13576_v31 }
 0x5e6   : > { %v12059_v12 = vpop.eup %12058  ;;  %v4031_v60 = vmul.f32 0.03125, %v4013_v19  ;;  %v13586_v28 = vcombine.low %v4327_v46, %v4328_v41  ;;  %v4329_v2 = vadd.f32 %v13552_v57, %v4298_v22  ;;  %v4330_v18 = vadd.f32 %v13562_v35, %v4299_v54 }
 0x5e7   : > { %v4133_v43 = vrot.slane %v12059_v12, %v13354_v53  ;;  %v4140_v7 = vrot.slane %v12059_v12, %v13357_v33  ;;  %12064 = vrsqrt.f32 %v4042_v0  ;;  %v4269_v14 = vmul.f32 %v4119_v26, %v13400_v47 }
 0x5e8   : > { %v4043_v50 = vadd.f32 1e-05, %v4031_v60  ;;  %10884 = vmatmul.mubr.msk.f32.vlgmr.msra.gmra.mrb[34].mxu1 %vm411_vm1, %v13586_v28  ;;  %v13595_v49 = vcombine.low %v4329_v2, %v4330_v18  ;;  %v4270_v10 = vmul.f32 %v4126_v30, %v13403_v4 }
 0x5e9   : > { %v4300_v39 = vmul.f32 %v13542_v62, %v4269_v14  ;;  %v4271_v46 = vmul.f32 %v4133_v43, %v13409_v61  ;;  %v4272_v56 = vmul.f32 %v4140_v7, %v13412_v36 }
 0x5ea   : > { %v12061_v41 = vpop.eup %12060  ;;  %12066 = vrsqrt.f32 %v4043_v50  ;;  %10886 = vmatprep.mubr.msk.f32.mxu1 %vm411_vm1, %v13595_v49  ;;  %v4016_v47 = vpop.xlane.xlu0 %4015  ;;  %v4301_v22 = vmul.f32 %v13547_v40, %v4270_v10 }
 0x5eb   : > { %v4147_v54 = vrot.slane %v12061_v41, %v13354_v53  ;;  %v4154_v26 = vrot.slane %v12061_v41, %v13357_v33  ;;  %v4032_v0 = vmul.f32 0.03125, %v4016_v47  ;;  %v4331_v4 = vadd.f32 %v13552_v57, %v4300_v39 }
 0x5ec   : > { %v4019_v30 = vpop.xlane.xlu1 %4018  ;;  %v4332_v61 = vadd.f32 %v13562_v35, %v4301_v22  ;;  %v4302_v36 = vmul.f32 %v13542_v62, %v4271_v46  ;;  %v4303_v19 = vmul.f32 %v13547_v40, %v4272_v56 }
 0x5ed   : > { %v4044_v12 = vadd.f32 1e-05, %v4032_v0  ;;  %v4033_v60 = vmul.f32 0.03125, %v4019_v30  ;;  %v4273_v2 = vmul.f32 %v4147_v54, %v13425_v37  ;;  %v4274_v18 = vmul.f32 %v4154_v26, %v13428_v27 }
 0x5ee   : > { %v13612_v43 = vcombine.low %v4331_v4, %v4332_v61  ;;  %v4333_v7 = vadd.f32 %v13552_v57, %v4302_v36  ;;  %v4334_v14 = vadd.f32 %v13562_v35, %v4303_v19 }
 0x5ef   : > { %v12063_v50 = vpop.eup %12062  ;;  %12068 = vrsqrt.f32 %v4044_v12  ;;  %v4045_v10 = vadd.f32 1e-05, %v4033_v60  ;;  %v4022_v39 = vpop.xlane.xlu0 %4021  ;;  %v4304_v46 = vmul.f32 %v13542_v62, %v4273_v2  ;;  %v4305_v56 = vmul.f32 %v13547_v40, %v4274_v18 }
 0x5f0   : > { %v4161_v41 = vrot.slane %v12063_v50, %v13354_v53  ;;  %v4168_v37 = vrot.slane %v12063_v50, %v13357_v33  ;;  %v4034_v47 = vmul.f32 0.03125, %v4022_v39  ;;  %10887 = vmatmul.mubr.msk.f32.gmra.mrb[36].mxu1 %vm411_vm1, %v13612_v43  ;;  %v13622_v27 = vcombine.low %v4333_v7, %v4334_v14 }
 0x5f1   : > { %v12065_v22 = vpop.eup %12064  ;;  %12070 = vrsqrt.f32 %v4045_v10  ;;  %v4335_v54 = vadd.f32 %v13552_v57, %v4304_v46  ;;  %v4336_v26 = vadd.f32 %v13562_v35, %v4305_v56 }
 0x5f2   : > { %v4175_v0 = vrot.slane %v12065_v22, %v13354_v53  ;;  %v4182_v4 = vrot.slane %v12065_v22, %v13357_v33  ;;  %v4046_v30 = vadd.f32 1e-05, %v4034_v47  ;;  %10889 = vmatprep.mubr.msk.f32.mxu1 %vm411_vm1, %v13622_v27  ;;  %v4275_v61 = vmul.f32 %v4161_v41, %v13439_v29 }
 0x5f3   : > { %v13631_v36 = vcombine.low %v4335_v54, %v4336_v26  ;;  %v4276_v19 = vmul.f32 %v4168_v37, %v13442_v9 }
 0x5f4   : > { %v12067_v12 = vpop.eup %12066  ;;  %12072 = vrsqrt.f32 %v4046_v30  ;;  %v4306_v60 = vmul.f32 %v13542_v62, %v4275_v61  ;;  %v4277_v2 = vmul.f32 %v4175_v0, %v13448_v44  ;;  %v4278_v18 = vmul.f32 %v4182_v4, %v13451_v52 }
 0x5f5   : > { %v4189_v7 = vrot.slane %v12067_v12, %v13354_v53  ;;  %v4196_v14 = vrot.slane %v12067_v12, %v13357_v33  ;;  %10890 = vmatmul.mubr.msk.f32.gmra.mrb[38].mxu1 %vm411_vm1, %v13631_v36  ;;  %v4307_v29 = vmul.f32 %v13547_v40, %v4276_v19 }
 0x5f6   : > { %v4337_v50 = vadd.f32 %v13552_v57, %v4306_v60  ;;  %v4308_v9 = vmul.f32 %v13542_v62, %v4277_v2  ;;  %v4309_v10 = vmul.f32 %v13547_v40, %v4278_v18 }
 0x5f7   : > { %v4338_v39 = vadd.f32 %v13562_v35, %v4307_v29  ;;  %v4279_v44 = vmul.f32 %v4189_v7, %v13464_v24  ;;  %v4280_v52 = vmul.f32 %v4196_v14, %v13467_v1 }
 0x5f8   : > { %v4339_v46 = vadd.f32 %v13552_v57, %v4308_v9  ;;  %v4340_v56 = vadd.f32 %v13562_v35, %v4309_v10 }
 0x5f9   : > { %v12069_v41 = vpop.eup %12068  ;;  %v13650_v37 = vcombine.low %v4337_v50, %v4338_v39  ;;  %v4310_v47 = vmul.f32 %v13542_v62, %v4279_v44  ;;  %v4311_v22 = vmul.f32 %v13547_v40, %v4280_v52 }
 0x5fa   : > { %v4203_v54 = vrot.slane %v12069_v41, %v13354_v53  ;;  %v4210_v26 = vrot.slane %v12069_v41, %v13357_v33  ;;  %v13656_v0 = vcombine.low %v4339_v46, %v4340_v56 }
 0x5fb   : > { %v12071_v24 = vpop.eup %12070  ;;  %10892 = vmatprep.mubr.msk.f32.mxu1 %vm411_vm1, %v13650_v37  ;;  %v4341_v1 = vadd.f32 %v13552_v57, %v4310_v47  ;;  %v4342_v4 = vadd.f32 %v13562_v35, %v4311_v22 }
 0x5fc   : > { %v4217_v30 = vrot.slane %v12071_v24, %v13354_v53  ;;  %v4224_v61 = vrot.slane %v12071_v24, %v13357_v33  ;;  %10893 = vmatmul.mubr.msk.f32.gmra.mrb[40].mxu1 %vm411_vm1, %v13656_v0  ;;  %v4281_v19 = vmul.f32 %v4203_v54, %v13478_v58  ;;  %v4282_v12 = vmul.f32 %v4210_v26, %v13481_v48 }
 0x5fd   : > { %v13668_v60 = vcombine.low %v4341_v1, %v4342_v4 }
 0x5fe   : > { %v12073_v2 = vpop.eup %12072  ;;  %v4312_v18 = vmul.f32 %v13542_v62, %v4281_v19  ;;  %v4313_v7 = vmul.f32 %v13547_v40, %v4282_v12  ;;  %v4283_v14 = vmul.f32 %v4217_v30, %v13487_v42  ;;  %v4284_v29 = vmul.f32 %v4224_v61, %v13490_v25 }
 0x5ff   : > { %v4231_v50 = vrot.slane %v12073_v2, %v13354_v53  ;;  %v4238_v9 = vrot.slane %v12073_v2, %v13357_v33  ;;  %10895 = vmatprep.mubr.msk.f32.mxu1 %vm411_vm1, %v13668_v60 }
 0x600   : > { %v4343_v58 = vadd.f32 %v13552_v57, %v4312_v18  ;;  %v4344_v48 = vadd.f32 %v13562_v35, %v4313_v7  ;;  %v4314_v10 = vmul.f32 %v13542_v62, %v4283_v14  ;;  %v4315_v39 = vmul.f32 %v13547_v40, %v4284_v29 }
 0x601   : > { %v4285_v44 = vmul.f32 %v4231_v50, %v13503_v20  ;;  %v4286_v42 = vmul.f32 %v4238_v9, %v13506_v8 }
 0x602   : > { %v13684_v25 = vcombine.low %v4343_v58, %v4344_v48  ;;  %v4345_v52 = vadd.f32 %v13552_v57, %v4314_v10  ;;  %v4346_v46 = vadd.f32 %v13562_v35, %v4315_v39 }
 0x603   : > { %v4316_v56 = vmul.f32 %v13542_v62, %v4285_v44  ;;  %v4317_v41 = vmul.f32 %v13547_v40, %v4286_v42  ;;  %v9772_v62 = vld [vmem:[%s15472_s3 + $0x50] sm:$0xff]  ;;  %v9773_v40 = vld [vmem:[%s15472_s3 + $0x58] sm:$0xff] }
 0x604   : > { %10896 = vmatmul.mubr.msk.f32.gmra.mrb[42].mxu1 %vm411_vm1, %v13684_v25  ;;  %v13692_v47 = vcombine.low %v4345_v52, %v4346_v46  ;;  %v11569_v54 = vpack.c.bf16 %v9773_v40, %v9772_v62 }
 0x605   : > { %v4347_v22 = vadd.f32 %v13552_v57, %v4316_v56  ;;  %v4348_v20 = vadd.f32 %v13562_v35, %v4317_v41  ;;  %v15484_v35 = vsub.s32 1, %v12825_v38 }
 0x606   : > { %10898 = vmatprep.mubr.msk.f32.mxu1 %vm411_vm1, %v13692_v47  ;;  %11570 = vmatprep.subr.bf16.mxu0 %v11569_v54 }
 0x607   : > { %v13698_v8 = vcombine.low %v4347_v22, %v4348_v20  ;;  %11572 = vmatpush3.bf16.msra.mxu0 %v11569_v54  ;;  %v4352_v57 = vrot.slane %v13537_v21, %v15484_v35 }
 0x609   : > { %10899 = vmatmul.mubr.msk.f32.gmra.mrb[44].mxu1 %vm411_vm1, %v13698_v8 }
 0x6bb   : > { %v10885_v26 = vpop.f32.mrb[34].mxu1 }
 0x6bc   : > { %v4485_v24 = vadd.f32 %v10885_v26, %v4352_v57  ;;  %v4479_v1 = vpop.f32.mrb[35].mxu1 }
 0x6bd   : > { %v4480_v4 = vadd.f32 %v4479_v1, %v4352_v57 }
 0x6be   : > { %v4539_v61 = vmax.f32 %v4485_v24, 0.0 }
 0x6bf   : > { %v4538_v30 = vmax.f32 %v4480_v4, 0.0 }
 0x6c1   : > { %10909 = vmatprep.mubr.msk.f32.mxu0 %vm411_vm1, %v4538_v30 }
 0x6c2   : > { %10910 = vmatmul.mubr.msk.f32.vlgmr.msra.gmra.mrb[42].mxu0 %vm411_vm1, %v4539_v61 }
 0x6c3   : > { %v10888_v19 = vpop.f32.mrb[36].mxu1 }
 0x6c4   : > { %v4495_v12 = vadd.f32 %v10888_v19, %v4352_v57  ;;  %v4489_v2 = vpop.f32.mrb[37].mxu1  ;;  %v15483_v19 = vsub.s32 2, %v12825_v38 }
 0x6c5   : > { %v4490_v18 = vadd.f32 %v4489_v2, %v4352_v57 }
 0x6c6   : > { %v4541_v14 = vmax.f32 %v4495_v12, 0.0  ;;  %v4553_v12 = vrot.slane %v13537_v21, %v15483_v19 }
 0x6c7   : > { %v4540_v7 = vmax.f32 %v4490_v18, 0.0 }
 0x6c8   : > { %v10891_v29 = vpop.f32.mrb[38].mxu1 }
 0x6c9   : > { %v4505_v50 = vadd.f32 %v10891_v29, %v4352_v57  ;;  %v4499_v9 = vpop.f32.mrb[39].mxu1  ;;  %10912 = vmatprep.mubr.msk.f32.mxu0 %vm411_vm1, %v4540_v7 }
 0x6ca   : > { %v4500_v58 = vadd.f32 %v4499_v9, %v4352_v57  ;;  %10913 = vmatmul.mubr.msk.f32.gmra.mrb[44].mxu0 %vm411_vm1, %v4541_v14 }
 0x6cb   : > { %v4543_v10 = vmax.f32 %v4505_v50, 0.0 }
 0x6cc   : > { %v4542_v48 = vmax.f32 %v4500_v58, 0.0 }
 0x6ce   : > { %10915 = vmatprep.mubr.msk.f32.mxu0 %vm411_vm1, %v4542_v48 }
 0x6cf   : > { %10916 = vmatmul.mubr.msk.f32.gmra.mrb[46].mxu0 %vm411_vm1, %v4543_v10  ;;  %v10894_v39 = vpop.f32.mrb[40].mxu1 }
 0x6d0   : > { %v4515_v44 = vadd.f32 %v10894_v39, %v4352_v57  ;;  %v4509_v42 = vpop.f32.mrb[41].mxu1 }
 0x6d1   : > { %v4510_v52 = vadd.f32 %v4509_v42, %v4352_v57 }
 0x6d2   : > { %v4545_v56 = vmax.f32 %v4515_v44, 0.0 }
 0x6d3   : > { %v4544_v46 = vmax.f32 %v4510_v52, 0.0 }
 0x6d5   : > { %10918 = vmatprep.mubr.msk.f32.mxu0 %vm411_vm1, %v4544_v46 }
 0x6d6   : > { %10919 = vmatmul.mubr.msk.f32.gmra.mrb[48].mxu0 %vm411_vm1, %v4545_v56 }
 0x6d7   : > { %v10897_v41 = vpop.f32.mrb[42].mxu1 }
 0x6d8   : > { %v4525_v22 = vadd.f32 %v10897_v41, %v4352_v57  ;;  %v4519_v20 = vpop.f32.mrb[43].mxu1 }
 0x6d9   : > { %v4520_v62 = vadd.f32 %v4519_v20, %v4352_v57 }
 0x6da   : > { %v4547_v54 = vmax.f32 %v4525_v22, 0.0 }
 0x6db   : > { %v4546_v40 = vmax.f32 %v4520_v62, 0.0 }
 0x6dc   : > { %v10900_v26 = vpop.f32.mrb[44].mxu1 }
 0x6dd   : > { %v4535_v24 = vadd.f32 %v10900_v26, %v4352_v57  ;;  %v4529_v1 = vpop.f32.mrb[45].mxu1  ;;  %10921 = vmatprep.mubr.msk.f32.mxu0 %vm411_vm1, %v4546_v40 }
 0x6de   : > { %v4530_v4 = vadd.f32 %v4529_v1, %v4352_v57  ;;  %10922 = vmatmul.mubr.msk.f32.gmra.mrb[50].mxu0 %vm411_vm1, %v4547_v54 }
 0x6df   : > { %v4549_v61 = vmax.f32 %v4535_v24, 0.0 }
 0x6e0   : > { %v4548_v30 = vmax.f32 %v4530_v4, 0.0 }
 0x6e2   : > { %10924 = vmatprep.mubr.msk.f32.mxu0 %vm411_vm1, %v4548_v30 }
 0x6e3   : > { %10925 = vmatmul.mubr.msk.f32.gmra.mrb[52].mxu0 %vm411_vm1, %v4549_v61 }
 0x795   : > { %v10911_v2 = vpop.f32.mrb[42].mxu0 }
 0x796   : > { %v4662_v18 = vadd.f32 %v10911_v2, %v4553_v12  ;;  %v4656_v7 = vpop.f32.mrb[43].mxu0 }
 0x797   : > { %v4657_v14 = vadd.f32 %v4656_v7, %v4553_v12 }
 0x798   : > { %v4728_v57 = vadd.f32 %v4662_v18, %v13586_v28 }
 0x799   : > { %v4727_v29 = vadd.f32 %v4657_v14, %v13576_v31 }
 0x79a   : > { %v4742_v50 = vsel %vm411_vm1, %v4728_v57, 0.0 }
 0x79b   : > { %4743 = vadd.xlane.f32.xlu0 %v4742_v50  ;;  %v4739_v9 = vsel %vm411_vm1, %v4727_v29, 0.0 }
 0x79c   : > { %4740 = vadd.xlane.f32.xlu1 %v4739_v9 }
 0x79d   : > { %v10914_v58 = vpop.f32.mrb[44].mxu0 }
 0x79e   : > { %v4672_v48 = vadd.f32 %v10914_v58, %v4553_v12  ;;  %v4666_v10 = vpop.f32.mrb[45].mxu0 }
 0x79f   : > { %v4667_v39 = vadd.f32 %v4666_v10, %v4553_v12 }
 0x7a0   : > { %v4730_v44 = vadd.f32 %v4672_v48, %v13612_v43 }
 0x7a1   : > { %v4729_v42 = vadd.f32 %v4667_v39, %v13595_v49 }
 0x7a2   : > { %v10917_v52 = vpop.f32.mrb[46].mxu0  ;;  %v4748_v46 = vsel %vm411_vm1, %v4730_v44, 0.0 }
 0x7a3   : > { %v4682_v28 = vadd.f32 %v10917_v52, %v4553_v12  ;;  %v4676_v56 = vpop.f32.mrb[47].mxu0  ;;  %4749 = vadd.xlane.f32.xlu0 %v4748_v46  ;;  %v4745_v31 = vsel %vm411_vm1, %v4729_v42, 0.0 }
 0x7a4   : > { %v4677_v41 = vadd.f32 %v4676_v56, %v4553_v12  ;;  %4746 = vadd.xlane.f32.xlu1 %v4745_v31 }
 0x7a5   : > { %v4732_v22 = vadd.f32 %v4682_v28, %v13631_v36 }
 0x7a6   : > { %v13738_v20 = vadd.f32 %v4677_v41, %v13622_v27 }
 0x7a7   : > { %v4754_v62 = vsel %vm411_vm1, %v4732_v22, 0.0 }
 0x7a8   : > { %4755 = vadd.xlane.f32.xlu0 %v4754_v62  ;;  %v4751_v49 = vsel %vm411_vm1, %v13738_v20, 0.0 }
 0x7a9   : > { %4752 = vadd.xlane.f32.xlu1 %v4751_v49  ;;  %v10920_v43 = vpop.f32.mrb[48].mxu0 }
 0x7aa   : > { %v4692_v40 = vadd.f32 %v10920_v43, %v4553_v12  ;;  %v4686_v54 = vpop.f32.mrb[49].mxu0 }
 0x7ab   : > { %v4687_v26 = vadd.f32 %v4686_v54, %v4553_v12 }
 0x7ac   : > { %v13744_v24 = vadd.f32 %v4692_v40, %v13656_v0 }
 0x7ad   : > { %v13747_v1 = vadd.f32 %v4687_v26, %v13650_v37 }
 0x7ae   : > { %v4760_v27 = vsel %vm411_vm1, %v13744_v24, 0.0 }
 0x7af   : > { %4761 = vadd.xlane.f32.xlu0 %v4760_v27  ;;  %v4757_v36 = vsel %vm411_vm1, %v13747_v1, 0.0 }
 0x7b0   : > { %4758 = vadd.xlane.f32.xlu1 %v4757_v36 }
 0x7b1   : > { %v10923_v4 = vpop.f32.mrb[50].mxu0 }
 0x7b2   : > { %v4702_v30 = vadd.f32 %v10923_v4, %v4553_v12  ;;  %v4696_v61 = vpop.f32.mrb[51].mxu0 }
 0x7b3   : > { %v4697_v2 = vadd.f32 %v4696_v61, %v4553_v12 }
 0x7b4   : > { %v13754_v18 = vadd.f32 %v4702_v30, %v13684_v25 }
 0x7b5   : > { %v13757_v0 = vadd.f32 %v4697_v2, %v13668_v60 }
 0x7b6   : > { %v10926_v37 = vpop.f32.mrb[52].mxu0  ;;  %v4766_v7 = vsel %vm411_vm1, %v13754_v18, 0.0 }
 0x7b7   : > { %v4712_v14 = vadd.f32 %v10926_v37, %v4553_v12  ;;  %v4706_v50 = vpop.f32.mrb[53].mxu0  ;;  %4767 = vadd.xlane.f32.xlu0 %v4766_v7  ;;  %v4763_v9 = vsel %vm411_vm1, %v13757_v0, 0.0 }
 0x7b8   : > { %v4707_v58 = vadd.f32 %v4706_v50, %v4553_v12  ;;  %4764 = vadd.xlane.f32.xlu1 %v4763_v9 }
 0x7b9   : > { %v13764_v48 = vadd.f32 %v4712_v14, %v13698_v8 }
 0x7ba   : > { %v13767_v25 = vadd.f32 %v4707_v58, %v13692_v47 }
 0x7bb   : > { %v4772_v60 = vsel %vm411_vm1, %v13764_v48, 0.0 }
 0x7bc   : > { %4773 = vadd.xlane.f32.xlu0 %v4772_v60  ;;  %v4769_v10 = vsel %vm411_vm1, %v13767_v25, 0.0 }
 0x7bd   : > { %4770 = vadd.xlane.f32.xlu1 %v4769_v10 }
 0x828   : > { %v4744_v39 = vpop.xlane.xlu0 %4743 }
 0x829   : > { %v4776_v52 = vmul.f32 0.03125, %v4744_v39  ;;  %v4741_v46 = vpop.xlane.xlu1 %4740 }
 0x82a   : > { %v4775_v28 = vmul.f32 0.03125, %v4741_v46 }
 0x82b   : > { %v13773_v12 = vsub.f32 %v4728_v57, %v4776_v52 }
 0x82c   : > { %v13775_v56 = vsub.f32 %v4727_v29, %v4775_v28 }
 0x82d   : > { %v4800_v47 = vmul.f32 %v13773_v12, %v13773_v12 }
 0x82e   : > { %v4799_v8 = vmul.f32 %v13775_v56, %v13775_v56 }
 0x82f   : > { %v4814_v31 = vsel %vm411_vm1, %v4800_v47, 0.0 }
 0x830   : > { %4815 = vadd.xlane.f32.xlu0 %v4814_v31  ;;  %v4750_v41 = vpop.xlane.xlu0 %4749  ;;  %v4811_v62 = vsel %vm411_vm1, %v4799_v8, 0.0 }
 0x831   : > { %v4778_v49 = vmul.f32 0.03125, %v4750_v41  ;;  %v4747_v43 = vpop.xlane.xlu1 %4746  ;;  %4812 = vadd.xlane.f32.xlu1 %v4811_v62 }
 0x832   : > { %v4777_v40 = vmul.f32 0.03125, %v4747_v43 }
 0x833   : > { %v13783_v57 = vsub.f32 %v4730_v44, %v4778_v49 }
 0x834   : > { %v13785_v29 = vsub.f32 %v4729_v42, %v4777_v40 }
 0x835   : > { %v4756_v54 = vpop.xlane.xlu0 %4755  ;;  %v4802_v26 = vmul.f32 %v13783_v57, %v13783_v57 }
 0x836   : > { %v4780_v27 = vmul.f32 0.03125, %v4756_v54  ;;  %v4753_v36 = vpop.xlane.xlu1 %4752  ;;  %v4801_v4 = vmul.f32 %v13785_v29, %v13785_v29 }
 0x837   : > { %v4779_v30 = vmul.f32 0.03125, %v4753_v36  ;;  %v4820_v61 = vsel %vm411_vm1, %v4802_v26, 0.0 }
 0x838   : > { %v13792_v2 = vsub.f32 %v4732_v22, %v4780_v27  ;;  %4821 = vadd.xlane.f32.xlu0 %v4820_v61  ;;  %v4817_v44 = vsel %vm411_vm1, %v4801_v4, 0.0 }
 0x839   : > { %v13796_v42 = vsub.f32 %v13738_v20, %v4779_v30  ;;  %4818 = vadd.xlane.f32.xlu1 %v4817_v44 }
 0x83a   : > { %v4804_v37 = vmul.f32 %v13792_v2, %v13792_v2 }
 0x83b   : > { %v4803_v7 = vmul.f32 %v13796_v42, %v13796_v42 }
 0x83c   : > { %v4826_v14 = vsel %vm411_vm1, %v4804_v37, 0.0  ;;  %v4762_v50 = vpop.xlane.xlu0 %4761 }
 0x83d   : > { %4827 = vadd.xlane.f32.xlu0 %v4826_v14  ;;  %v4782_v9 = vmul.f32 0.03125, %v4762_v50  ;;  %v4759_v22 = vpop.xlane.xlu1 %4758  ;;  %v4823_v58 = vsel %vm411_vm1, %v4803_v7, 0.0  ;;  %v9925_v7 = vld [vmem:[%s15472_s3 + $0x78] sm:$0xff] }
 0x83e   : > { %v4781_v60 = vmul.f32 0.03125, %v4759_v22  ;;  %4824 = vadd.xlane.f32.xlu1 %v4823_v58 }
 0x83f   : > { %v13805_v20 = vsub.f32 %v13744_v24, %v4782_v9 }
 0x840   : > { %v13808_v10 = vsub.f32 %v13747_v1, %v4781_v60 }
 0x841   : > { %v4806_v39 = vmul.f32 %v13805_v20, %v13805_v20 }
 0x842   : > { %v4805_v52 = vmul.f32 %v13808_v10, %v13808_v10 }
 0x843   : > { %v4832_v46 = vsel %vm411_vm1, %v4806_v39, 0.0 }
 0x844   : > { %4833 = vadd.xlane.f32.xlu0 %v4832_v46  ;;  %v4768_v28 = vpop.xlane.xlu0 %4767  ;;  %v4829_v47 = vsel %vm411_vm1, %v4805_v52, 0.0 }
 0x845   : > { %v4784_v8 = vmul.f32 0.03125, %v4768_v28  ;;  %v4765_v31 = vpop.xlane.xlu1 %4764  ;;  %4830 = vadd.xlane.f32.xlu1 %v4829_v47 }
 0x846   : > { %v4783_v24 = vmul.f32 0.03125, %v4765_v31 }
 0x847   : > { %v13817_v41 = vsub.f32 %v13754_v18, %v4784_v8  ;;  %v9922_v18 = vld [vmem:[%s15472_s3 + $0x60] sm:$0xff]  ;;  %v15482_v8 = vsub.s32 5, %v12825_v38 }
 0x848   : > { %v13820_v1 = vsub.f32 %v13757_v0, %v4783_v24  ;;  %v9923_v0 = vld [vmem:[%s15472_s3 + $0x68] sm:$0xff] }
 0x849   : > { %v4774_v62 = vpop.xlane.xlu0 %4773  ;;  %v4808_v49 = vmul.f32 %v13817_v41, %v13817_v41  ;;  %v11573_v30 = vpack.c.bf16 %v9923_v0, %v9922_v18 }
 0x84a   : > { %v4786_v43 = vmul.f32 0.03125, %v4774_v62  ;;  %v4771_v40 = vpop.xlane.xlu1 %4770  ;;  %v4807_v54 = vmul.f32 %v13820_v1, %v13820_v1 }
 0x84b   : > { %v4785_v26 = vmul.f32 0.03125, %v4771_v40  ;;  %v4838_v27 = vsel %vm411_vm1, %v4808_v49, 0.0  ;;  %11574 = vmatprep.subr.bf16.mxu1 %v11573_v30  ;;  %v13857_v40 = vrot.slane %v13537_v21, %v15482_v8 }
 0x84c   : > { %v13834_v36 = vsub.f32 %v13764_v48, %v4786_v43  ;;  %4839 = vadd.xlane.f32.xlu0 %v4838_v27  ;;  %v4835_v4 = vsel %vm411_vm1, %v4807_v54, 0.0  ;;  %11576 = vmatpush3.bf16.msra.mxu1 %v11573_v30  ;;  %v9924_v48 = vld [vmem:[%s15472_s3 + $0x70] sm:$0xff]  ;;  %v15481_v43 = vsub.s32 6, %v12825_v38 }
 0x84d   : > { %v13838_v61 = vsub.f32 %v13767_v25, %v4785_v26  ;;  %4836 = vadd.xlane.f32.xlu1 %v4835_v4  ;;  %v11577_v14 = vpack.c.bf16 %v9925_v7, %v9924_v48 }
 0x84e   : > { %v4810_v44 = vmul.f32 %v13834_v36, %v13834_v36  ;;  %v13864_v48 = vrot.slane %v13537_v21, %v15481_v43 }
 0x84f   : > { %v4809_v37 = vmul.f32 %v13838_v61, %v13838_v61  ;;  %11578 = vmatprep.subr.bf16.mxu1 %v11577_v14 }
 0x850   : > { %v4844_v25 = vsel %vm411_vm1, %v4810_v44, 0.0  ;;  %11580 = vmatpush3.bf16.msra.mxu1 %v11577_v14 }
 0x851   : > { %4845 = vadd.xlane.f32.xlu0 %v4844_v25  ;;  %v4841_v50 = vsel %vm411_vm1, %v4809_v37, 0.0 }
 0x852   : > { %4842 = vadd.xlane.f32.xlu1 %v4841_v50 }
 0x8bd   : > { %v4816_v9 = vpop.xlane.xlu0 %4815 }
 0x8be   : > { %v4848_v22 = vmul.f32 0.03125, %v4816_v9  ;;  %v4813_v58 = vpop.xlane.xlu1 %4812 }
 0x8bf   : > { %v4847_v60 = vmul.f32 0.03125, %v4813_v58 }
 0x8c0   : > { %v4860_v39 = vadd.f32 1e-05, %v4848_v22 }
 0x8c1   : > { %v4859_v52 = vadd.f32 1e-05, %v4847_v60 }
 0x8c2   : > { %12074 = vrsqrt.f32 %v4860_v39 }
 0x8c3   : > { %12076 = vrsqrt.f32 %v4859_v52 }
 0x8c5   : > { %v4822_v46 = vpop.xlane.xlu0 %4821 }
 0x8c6   : > { %v4850_v28 = vmul.f32 0.03125, %v4822_v46  ;;  %v4819_v47 = vpop.xlane.xlu1 %4818 }
 0x8c7   : > { %v4849_v31 = vmul.f32 0.03125, %v4819_v47 }
 0x8c8   : > { %v4862_v24 = vadd.f32 1e-05, %v4850_v28 }
 0x8c9   : > { %v4861_v62 = vadd.f32 1e-05, %v4849_v31 }
 0x8ca   : > { %12078 = vrsqrt.f32 %v4862_v24  ;;  %v4828_v49 = vpop.xlane.xlu0 %4827 }
 0x8cb   : > { %12080 = vrsqrt.f32 %v4861_v62  ;;  %v4852_v54 = vmul.f32 0.03125, %v4828_v49  ;;  %v4825_v26 = vpop.xlane.xlu1 %4824 }
 0x8cc   : > { %v12075_v27 = vpop.eup %12074  ;;  %v4851_v18 = vmul.f32 0.03125, %v4825_v26 }
 0x8cd   : > { %v12077_v0 = vpop.eup %12076  ;;  %v4884_v4 = vmul.f32 %v12075_v27, %v13773_v12  ;;  %v4864_v30 = vadd.f32 1e-05, %v4852_v54 }
 0x8ce   : > { %v4883_v44 = vmul.f32 %v12077_v0, %v13775_v56  ;;  %v4863_v37 = vadd.f32 1e-05, %v4851_v18 }
 0x8cf   : > { %v4900_v7 = vmul.f32 %v13857_v40, %v4884_v4  ;;  %12082 = vrsqrt.f32 %v4864_v30 }
 0x8d0   : > { %12084 = vrsqrt.f32 %v4863_v37  ;;  %v4899_v25 = vmul.f32 %v13857_v40, %v4883_v44 }
 0x8d1   : > { %v4834_v14 = vpop.xlane.xlu0 %4833  ;;  %v13872_v56 = vadd.f32 %v13864_v48, %v4900_v7 }
 0x8d2   : > { %v4854_v50 = vmul.f32 0.03125, %v4834_v14  ;;  %v4831_v9 = vpop.xlane.xlu1 %4830  ;;  %v13869_v12 = vadd.f32 %v13864_v48, %v4899_v25 }
 0x8d3   : > { %v4853_v22 = vmul.f32 0.03125, %v4831_v9  ;;  %v13897_v4 = vcombine.high %v13872_v56, %v13872_v56 }
 0x8d4   : > { %v12079_v58 = vpop.eup %12078  ;;  %v4866_v60 = vadd.f32 1e-05, %v4854_v50  ;;  %10935 = vmatprep.mubr.msk.f32.mxu1 %vm411_vm1, %v13869_v12  ;;  %v13878_v21 = vcombine.high %v13869_v12, %v13869_v12  ;;  %v5153_v47 = vcombine.low %v13869_v12, %v13869_v12  ;;  %v13921_v50 = vld [vmem:[%s15470_s1 + $0x20] sm:$0xff] }
 0x8d5   : > { %v12081_v39 = vpop.eup %12080  ;;  %v4886_v52 = vmul.f32 %v12079_v58, %v13783_v57  ;;  %v4865_v46 = vadd.f32 1e-05, %v4853_v22  ;;  %10936 = vmatmul.mubr.msk.f32.vlgmr.msra.gmra.mrb[46].mxu1 %vm411_vm1, %v13872_v56  ;;  %10963 = vmatprep.mubr.msk.f32.mxu0 %vm692_vm2, %v13921_v50 }
 0x8d6   : > { %v4885_v28 = vmul.f32 %v12081_v39, %v13785_v29  ;;  %12086 = vrsqrt.f32 %v4866_v60  ;;  %v5154_v31 = vcombine.low %v13878_v21, %v13872_v56 }
 0x8d7   : > { %12088 = vrsqrt.f32 %v4865_v46  ;;  %v4902_v24 = vmul.f32 %v13857_v40, %v4886_v52 }
 0x8d8   : > { %v11924_v62 = vpack.i.bf16 %v5154_v31, %v5153_v47  ;;  %v4901_v49 = vmul.f32 %v13857_v40, %v4885_v28 }
 0x8d9   : > { %v12083_v57 = vpop.eup %12082  ;;  %v4840_v54 = vpop.xlane.xlu0 %4839  ;;  %v13901_v37 = vadd.f32 %v13864_v48, %v4902_v24 }
 0x8da   : > { %v12085_v26 = vpop.eup %12084  ;;  %v4888_v27 = vmul.f32 %v12083_v57, %v13792_v2  ;;  %v4856_v18 = vmul.f32 0.03125, %v4840_v54  ;;  %v4837_v29 = vpop.xlane.xlu1 %4836  ;;  %11925 = vrot.lane.b32.xlu1 %v11924_v62, %s12268_s20  ;;  %v13893_v0 = vadd.f32 %v13864_v48, %v4901_v49  ;;  %v13905_v2 = vcombine.low %v13869_v12, %v13878_v21 }
 0x8db   : > { %v4887_v30 = vmul.f32 %v12085_v26, %v13796_v42  ;;  %v4855_v44 = vmul.f32 0.03125, %v4837_v29  ;;  %v13942_v49 = vcombine.high %v13901_v37, %v13901_v37  ;;  %v5157_v29 = vcombine.low %v13901_v37, %v13901_v37 }
 0x8dc   : > { %v4868_v7 = vadd.f32 1e-05, %v4856_v18  ;;  %10938 = vmatprep.mubr.msk.f32.mxu1 %vm411_vm1, %v13893_v0  ;;  %v13911_v25 = vcombine.low %v13897_v4, %v13893_v0  ;;  %v4904_v14 = vmul.f32 %v13857_v40, %v4888_v27  ;;  %v13916_v42 = vcombine.high %v13893_v0, %v13893_v0 }
 0x8dd   : > { %v4903_v9 = vmul.f32 %v13857_v40, %v4887_v30  ;;  %v4867_v22 = vadd.f32 1e-05, %v4855_v44  ;;  %10939 = vmatmul.mubr.msk.f32.gmra.mrb[48].mxu1 %vm411_vm1, %v13901_v37  ;;  %15514 = vst [vmem:[#allocation7_spill] sm:$0xff] %v13942_v49 }
 0x8de   : > { %12090 = vrsqrt.f32 %v4868_v7  ;;  %v4846_v58 = vpop.xlane.xlu0 %4845  ;;  %v11929_v60 = vpack.i.bf16 %v13911_v25, %v13905_v2  ;;  %v13931_v39 = vadd.f32 %v13864_v48, %v4904_v14  ;;  %v5156_v52 = vcombine.low %v13893_v0, %v13916_v42 }
 0x8df   : > { %12092 = vrsqrt.f32 %v4867_v22  ;;  %v4858_v46 = vmul.f32 0.03125, %v4846_v58  ;;  %v4843_v28 = vpop.xlane.xlu1 %4842  ;;  %v13936_v47 = vadd.f32 %v13864_v48, %v4903_v9 }
 0x8e0   : > { %v12087_v31 = vpop.eup %12086  ;;  %v4857_v24 = vmul.f32 0.03125, %v4843_v28  ;;  %11930 = vrot.lane.b32.xlu0 %v11929_v60, %s12269_s28  ;;  %v11934_v62 = vpack.i.bf16 %v5156_v52, %v13897_v4  ;;  %v13946_v57 = vcombine.high %v13931_v39, %v13931_v39 }
 0x8e1   : > { %v12089_v54 = vpop.eup %12088  ;;  %v4890_v26 = vmul.f32 %v12087_v31, %v13805_v20  ;;  %v4870_v27 = vadd.f32 1e-05, %v4858_v46  ;;  %10941 = vmatprep.mubr.msk.f32.mxu1 %vm411_vm1, %v13936_v47  ;;  %v13953_v18 = vcombine.high %v13936_v47, %v13936_v47  ;;  %v5158_v20 = vcombine.low %v13942_v49, %v13936_v47 }
 0x8e2   : > { %15515 = vst [vmem:[#allocation8_spill] sm:$0xff] %v13946_v57  ;;  %v4889_v30 = vmul.f32 %v12089_v54, %v13808_v10  ;;  %v4869_v44 = vadd.f32 1e-05, %v4857_v24  ;;  %10942 = vmatmul.mubr.msk.f32.gmra.mrb[50].mxu1 %vm411_vm1, %v13931_v39  ;;  %11935 = vrot.lane.b32.xlu1 %v11934_v62, %s12268_s20  ;;  %v5160_v9 = vcombine.low %v13931_v39, %v13946_v57 }
 0x8e3   : > { %v4906_v7 = vmul.f32 %v13857_v40, %v4890_v26  ;;  %12094 = vrsqrt.f32 %v4870_v27  ;;  %v11939_v14 = vpack.i.bf16 %v13953_v18, %v5157_v29  ;;  %v13987_v31 = vcombine.low %v13953_v18, %v13931_v39 }
 0x8e4   : > { %12096 = vrsqrt.f32 %v4869_v44  ;;  %v4905_v10 = vmul.f32 %v13857_v40, %v4889_v30  ;;  %v11944_v60 = vpack.i.bf16 %v5160_v9, %v5158_v20  ;;  %v13999_v27 = vcombine.low %v13901_v37, %v13942_v49 }
 0x8e5   : > { %11940 = vrot.lane.b32.xlu0 %v11939_v14, %s12268_s20  ;;  %v13970_v22 = vadd.f32 %v13864_v48, %v4906_v7 }
 0x8e6   : > { %5219 = vrot.lane.b32.xlu1 %v13872_v56, %s12269_s28  ;;  %v13975_v58 = vadd.f32 %v13864_v48, %v4905_v10 }
 0x8e7   : > { %15516 = vst [vmem:[#allocation9_spill] sm:$0xff] %v13970_v22  ;;  %v13979_v52 = vcombine.high %v13970_v22, %v13970_v22 }
 0x8e8   : > { %15517 = vst [vmem:[#allocation10_spill] sm:$0xff] %v13975_v58  ;;  %v12091_v46 = vpop.eup %12090  ;;  %10944 = vmatprep.mubr.msk.f32.mxu1 %vm411_vm1, %v13975_v58  ;;  %v5161_v28 = vcombine.low %v13975_v58, %v13975_v58  ;;  %v14007_v44 = vcombine.high %v13975_v58, %v13975_v58 }
 0x8e9   : > { %15518 = vst [vmem:[#allocation11_spill] sm:$0xff] %v13979_v52  ;;  %v12093_v24 = vpop.eup %12092  ;;  %v4892_v62 = vmul.f32 %v12091_v46, %v13817_v41  ;;  %11945 = vrot.lane.b32.xlu0 %v11944_v60, %s12268_s20  ;;  %10945 = vmatmul.mubr.msk.f32.gmra.mrb[52].mxu1 %vm411_vm1, %v13970_v22  ;;  %v11949_v41 = vpack.i.bf16 %v13987_v31, %v13999_v27 }
 0x8ea   : > { %v4891_v54 = vmul.f32 %v12093_v24, %v13820_v1  ;;  %5223 = vrot.lane.b32.xlu1 %v13916_v42, %s12269_s28  ;;  %v11954_v26 = vpack.i.bf16 %v13979_v52, %v5161_v28  ;;  %15519 = vst [vmem:[#allocation12_spill] sm:$0xff] %v14007_v44  ;;  %v14023_v60 = vcombine.low %v13975_v58, %v14007_v44 }
 0x8eb   : > { %v4908_v29 = vmul.f32 %v13857_v40, %v4892_v62 }
 0x8ec   : > { %v4907_v30 = vmul.f32 %v13857_v40, %v4891_v54 }
 0x8ed   : > { %v12095_v1 = vpop.eup %12094  ;;  %11955 = vrot.lane.b32.xlu0 %v11954_v26, %s12268_s20  ;;  %v14017_v10 = vadd.f32 %v13864_v48, %v4908_v29 }
 0x8ee   : > { %v12097_v20 = vpop.eup %12096  ;;  %v4894_v7 = vmul.f32 %v12095_v1, %v13834_v36  ;;  %11950 = vrot.lane.b32.xlu1 %v11949_v41, %s12269_s28  ;;  %v14013_v14 = vadd.f32 %v13864_v48, %v4907_v30 }
 0x8ef   : > { %v4893_v9 = vmul.f32 %v12097_v20, %v13838_v61  ;;  %15521 = vst [vmem:[#allocation14_spill] sm:$0xff] %v14017_v10  ;;  %v14070_v1 = vcombine.high %v14017_v10, %v14017_v10 }
 0x8f0   : > { %15520 = vst [vmem:[#allocation13_spill] sm:$0xff] %v14013_v14  ;;  %10947 = vmatprep.mubr.msk.f32.mxu1 %vm411_vm1, %v14013_v14  ;;  %v14027_v36 = vcombine.low %v13979_v52, %v14013_v14  ;;  %v4910_v46 = vmul.f32 %v13857_v40, %v4894_v7  ;;  %v14032_v28 = vcombine.high %v14013_v14, %v14013_v14 }
 0x8f1   : > { %v4909_v61 = vmul.f32 %v13857_v40, %v4893_v9  ;;  %10948 = vmatmul.mubr.msk.f32.gmra.mrb[54].mxu1 %vm411_vm1, %v14017_v10  ;;  %v5162_v40 = vcombine.low %v14007_v44, %v13970_v22  ;;  %15526 = vst [vmem:[#allocation19_spill] sm:$0xff] %v14070_v1  ;;  %v14077_v20 = vcombine.low %v14017_v10, %v14070_v1 }
 0x8f2   : > { %15522 = vst [vmem:[#allocation15_spill] sm:$0xff] %v14032_v28  ;;  %5227 = vrot.lane.b32.xlu1 %v13936_v47, %s12269_s28  ;;  %v11959_v24 = vpack.i.bf16 %v14027_v36, %v14023_v60  ;;  %v5164_v62 = vcombine.low %v14013_v14, %v14032_v28  ;;  %v14048_v26 = vadd.f32 %v13864_v48, %v4910_v46 }
 0x8f3   : > { %v14044_v54 = vadd.f32 %v13864_v48, %v4909_v61  ;;  %v5165_v48 = vcombine.low %v14017_v10, %v14017_v10 }
 0x8f4   : > { %11960 = vrot.lane.b32.xlu0 %v11959_v24, %s12269_s28  ;;  %15524 = vst [vmem:[#allocation17_spill] sm:$0xff] %v14048_v26  ;;  %v11964_v41 = vpack.i.bf16 %v5164_v62, %v5162_v40  ;;  %v14083_v7 = vcombine.high %v14048_v26, %v14048_v26  ;;  %v9920_v24 = vld [vmem:[%s15471_s2 + $0x30] sm:$0xff]  ;;  %v9921_v62 = vld [vmem:[%s15471_s2 + $0x38] sm:$0xf]  ;;  %v9918_v40 = vld [vmem:[%s15471_s2 + $0x20] sm:$0xff] }
 0x8f5   : > { %15523 = vst [vmem:[#allocation16_spill] sm:$0xff] %v14044_v54  ;;  %10950 = vmatprep.mubr.msk.f32.mxu1 %vm411_vm1, %v14044_v54  ;;  %v14056_v29 = vcombine.high %v14044_v54, %v14044_v54  ;;  %v5166_v9 = vcombine.low %v14070_v1, %v14044_v54 }
 0x8f6   : > { %10951 = vmatmul.mubr.msk.f32.gmra.mrb[56].mxu1 %vm411_vm1, %v14048_v26  ;;  %5231 = vrot.lane.b32.xlu1 %v13946_v57, %s12269_s28  ;;  %15527 = vst [vmem:[#allocation20_spill] sm:$0xff] %v14083_v7  ;;  %v5168_v46 = vcombine.low %v14048_v26, %v14083_v7 }
 0x8f7   : > { %15525 = vst [vmem:[#allocation18_spill] sm:$0xff] %v14056_v29  ;;  %11002 = vmatprep.mubr.msk.f32.mxu1 %vm692_vm2, %v13921_v50  ;;  %v11969_v30 = vpack.i.bf16 %v14056_v29, %v5165_v48  ;;  %v14095_v61 = vcombine.low %v14056_v29, %v14048_v26 }
 0x8f8   : > { %11965 = vrot.lane.b32.xlu0 %v11964_v41, %s12268_s20  ;;  %v9919_v41 = vld [vmem:[%s15471_s2 + $0x28] sm:$0xf] }
 0x8fa   : > { %11970 = vrot.lane.b32.xlu1 %v11969_v30, %s12268_s20 }
 0x8fc   : > { %5235 = vrot.lane.b32.xlu0 %v13970_v22, %s12269_s28 }
 0x8fe   : > { %5241 = vrot.lane.b32.xlu1 %v14077_v20, %s12269_s28 }
 0x900   : > { %5239 = vrot.lane.b32.xlu0 %v14032_v28, %s12269_s28 }
 0x902   : > { %5195 = vrot.lane.b32.xlu1 %v5166_v9, %s12268_s20 }
 0x904   : > { %5199 = vrot.lane.b32.xlu0 %v5168_v46, %s12268_s20 }
 0x906   : > { %5245 = vrot.lane.b32.xlu1 %v14095_v61, %s12269_s28 }
 0x908   : > { %5243 = vrot.lane.b32.xlu0 %v14044_v54, %s12269_s28 }
 0x90a   : > { %5247 = vrot.lane.b32.xlu1 %v14083_v7, %s12269_s28 }
 0x90c   : > { %5899 = vperm.xlu0 %11923, %v9920_v24  }
 0x90e   : > { %5904 = vperm.xlu1 %11922, %v9921_v62  }
 0x910   : > { %5267 = vperm.xlu0 %11923, %v9918_v40  }
 0x912   : > { %5272 = vperm.xlu1 %11922, %v9919_v41  }
 0x94c   : > { %v11926_v48 = vpop.permute.xlu1 %11925 }
 0x94d   : > { %v11927_v30 = vunpack.i.l.bf16 %v11926_v48  ;;  %v11928_v43 = vunpack.i.h.bf16 %v11926_v48 }
 0x94f   : > { %v5257_v9 = vsel %vm561_vm0, %v13872_v56, %v11927_v30 }
 0x950   : > { %v14118_v46 = vpack.c.bf16 %v5257_v9, %v13905_v2 }
 0x952   : > { %11582 = vmatprep.subr.bf16.mxu0 %v14118_v46  ;;  %v11931_v24 = vpop.permute.xlu0 %11930 }
 0x953   : > { %v11932_v8 = vunpack.i.l.bf16 %v11931_v24  ;;  %11584 = vmatpush3.bf16.msra.mxu0 %v14118_v46  ;;  %v11933_v53 = vunpack.i.h.bf16 %v11931_v24 }
 0x954   : > { %v11936_v62 = vpop.permute.xlu1 %11935 }
 0x955   : > { %v14122_v19 = vpack.c.bf16 %v11932_v8, %v11928_v43  ;;  %v11937_v40 = vunpack.i.l.bf16 %v11936_v62  ;;  %v11938_v48 = vunpack.i.h.bf16 %v11936_v62  ;;  %v14137_v43 = vld [vmem:[%s15470_s1 + $0x28] sm:$0xf] }
 0x957   : > { %v11941_v41 = vpop.permute.xlu0 %11940  ;;  %11586 = vmatprep.subr.bf16.mxu0 %v14122_v19  ;;  %v5258_v2 = vsel %vm561_vm0, %v13916_v42, %v11937_v40 }
 0x958   : > { %v11943_v35 = vunpack.i.h.bf16 %v11941_v41  ;;  %v14125_v33 = vpop.permute.xlu1 %5219  ;;  %11588 = vmatpush3.bf16.msra.mxu0 %v14122_v19  ;;  %v14147_v62 = vpack.c.bf16 %v5258_v2, %v13911_v25 }
 0x959   : > { %10961 = vmatprep.subr.msk.mxu0 %vm561_vm0, %v14125_v33 }
 0x95a   : > { %v5260_v8 = vsel %vm561_vm0, %v13946_v57, %v11943_v35  ;;  %v14152_v35 = vpack.c.bf16 %v11933_v53, %v11938_v48 }
 0x95b   : > { %v11946_v30 = vpop.permute.xlu0 %11945  ;;  %v14140_v9 = vpack.c.bf16 %v5260_v8, %v13987_v31  ;;  %v11942_v31 = vunpack.i.l.bf16 %v11941_v41 }
 0x95c   : > { %v14142_v26 = vpop.permute.xlu1 %5223  ;;  %10962 = vmatpush3.msk.msra.mxu0 %vm561_vm0, %v14125_v33  ;;  %v11948_v40 = vunpack.i.h.bf16 %v11946_v30  ;;  %v11947_v1 = vunpack.i.l.bf16 %v11946_v30 }
 0x95d   : > { %11606 = vmatprep.subr.bf16.mxu1 %v14140_v9  ;;  %10964 = vmatmul.mubr.msk.f32.vlgmr.msra.gmra.mrb[54].mxu0 %vm692_vm2, %v14137_v43  ;;  %v5259_v53 = vsel %vm561_vm0, %v13936_v47, %v11942_v31 }
 0x95e   : > { %11590 = vmatprep.subr.bf16.mxu0 %v14147_v62  ;;  %11608 = vmatpush3.bf16.msra.mxu1 %v14140_v9  ;;  %v14174_v31 = vpack.c.bf16 %v5259_v53, %v13999_v27 }
 0x95f   : > { %v11956_v24 = vpop.permute.xlu0 %11955  ;;  %11592 = vmatpush3.bf16.msra.mxu0 %v14147_v62  ;;  %10976 = vmatprep.mubr.msk.f32.mxu0 %vm692_vm2, %v13921_v50 }
 0x960   : > { %11594 = vmatprep.subr.bf16.mxu0 %v14152_v35  ;;  %v11951_v25 = vpop.permute.xlu1 %11950  ;;  %v11958_v8 = vunpack.i.h.bf16 %v11956_v24 }
 0x961   : > { %v11953_v2 = vunpack.i.h.bf16 %v11951_v25  ;;  %v11952_v41 = vunpack.i.l.bf16 %v11951_v25 }
 0x962   : > { %v5262_v10 = vsel %vm561_vm0, %v14032_v28, %v11958_v8 }
 0x963   : > { %v14162_v48 = vpack.c.bf16 %v11953_v2, %v11948_v40  ;;  %11596 = vmatpush3.bf16.msra.mxu0 %v14152_v35  ;;  %v14178_v25 = vpack.c.bf16 %v11952_v41, %v11947_v1  ;;  %v11957_v40 = vunpack.i.l.bf16 %v11956_v24  ;;  %v14189_v27 = vpack.c.bf16 %v5262_v10, %v14027_v36 }
 0x964   : > { %10974 = vmatprep.subr.msk.mxu0 %vm561_vm0, %v14142_v26  ;;  %v14167_v29 = vpop.permute.xlu1 %5227 }
 0x965   : > { %11610 = vmatprep.subr.bf16.mxu1 %v14162_v48  ;;  %v5261_v10 = vsel %vm561_vm0, %v13970_v22, %v11957_v40 }
 0x966   : > { %v11961_v14 = vpop.permute.xlu0 %11960  ;;  %11612 = vmatpush3.bf16.msra.mxu1 %v14162_v48 }
 0x967   : > { %10975 = vmatpush3.msk.msra.mxu0 %vm561_vm0, %v14142_v26  ;;  %v11963_v2 = vunpack.i.h.bf16 %v11961_v14  ;;  %v11962_v52 = vunpack.i.l.bf16 %v11961_v14 }
 0x968   : > { %10977 = vmatmul.mubr.msk.f32.vlgmr.msra.gmra.mrb[56].mxu0 %vm692_vm2, %v14137_v43  ;;  %11598 = vmatprep.subr.bf16.mxu0 %v14174_v31  ;;  %v14183_v30 = vpop.permute.xlu1 %5231 }
 0x969   : > { %11600 = vmatpush3.bf16.msra.mxu0 %v14174_v31  ;;  %11000 = vmatprep.subr.msk.mxu1 %vm561_vm0, %v14183_v30 }
 0x96a   : > { %11602 = vmatprep.subr.bf16.mxu0 %v14178_v25  ;;  %v11966_v1 = vpop.permute.xlu0 %11965  ;;  %11001 = vmatpush3.msk.msra.mxu1 %vm561_vm0, %v14183_v30 }
 0x96b   : > { %v11968_v8 = vunpack.i.h.bf16 %v11966_v1  ;;  %11003 = vmatmul.mubr.msk.f32.vlgmr.msra.gmra.mrb[58].mxu1 %vm692_vm2, %v14137_v43  ;;  %11622 = vmatprep.subr.bf16.mxu1 %v14189_v27  ;;  %v11967_v41 = vunpack.i.l.bf16 %v11966_v1 }
 0x96c   : > { %v11971_v24 = vpop.permute.xlu1 %11970  ;;  %11624 = vmatpush3.bf16.msra.mxu1 %v14189_v27  ;;  %10989 = vmatprep.mubr.msk.f32.mxu0 %vm692_vm2, %v13921_v50 }
 0x96d   : > { %v14202_v36 = vpack.c.bf16 %v11963_v2, %v11968_v8  ;;  %v11973_v53 = vunpack.i.h.bf16 %v11971_v24  ;;  %11604 = vmatpush3.bf16.msra.mxu0 %v14178_v25  ;;  %11028 = vmatprep.mubr.msk.f32.mxu1 %vm692_vm2, %v13921_v50  ;;  %v14216_v8 = vpack.c.bf16 %v5261_v10, %v14023_v60  ;;  %v14220_v1 = vpack.c.bf16 %v11962_v52, %v11967_v41 }
 0x96e   : > { %10987 = vmatprep.subr.msk.mxu0 %vm561_vm0, %v14167_v29  ;;  %v14209_v28 = vpop.permute.xlu0 %5235  ;;  %v11972_v22 = vunpack.i.l.bf16 %v11971_v24 }
 0x96f   : > { %11626 = vmatprep.subr.bf16.mxu1 %v14202_v36  ;;  %v5264_v40 = vsel %vm561_vm0, %v14083_v7, %v11973_v53 }
 0x970   : > { %v5242_v2 = vpop.permute.xlu1 %5241  ;;  %11628 = vmatpush3.bf16.msra.mxu1 %v14202_v36  ;;  %v14228_v53 = vpack.c.bf16 %v5264_v40, %v14095_v61  ;;  %v5263_v60 = vsel %vm561_vm0, %v14044_v54, %v11972_v22 }
 0x971   : > { %10988 = vmatpush3.msk.msra.mxu0 %vm561_vm0, %v14167_v29  ;;  %v14252_v41 = vpack.c.bf16 %v5263_v60, %v14077_v20  ;;  %v14274_v20 = vld [vmem:[%s15470_s1 + $0x30] sm:$0xff] }
 0x972   : > { %10990 = vmatmul.mubr.msk.f32.vlgmr.msra.gmra.mrb[58].mxu0 %vm692_vm2, %v14137_v43  ;;  %11614 = vmatprep.subr.bf16.mxu0 %v14216_v8  ;;  %v14225_v14 = vpop.permute.xlu0 %5239 }
 0x973   : > { %11616 = vmatpush3.bf16.msra.mxu0 %v14216_v8  ;;  %11026 = vmatprep.subr.msk.mxu1 %vm561_vm0, %v14225_v14 }
 0x974   : > { %11618 = vmatprep.subr.bf16.mxu0 %v14220_v1  ;;  %v5196_v52 = vpop.permute.xlu1 %5195  ;;  %11027 = vmatpush3.msk.msra.mxu1 %vm561_vm0, %v14225_v14 }
 0x975   : > { %11029 = vmatmul.mubr.msk.f32.vlgmr.msra.gmra.mrb[60].mxu1 %vm692_vm2, %v14137_v43  ;;  %11638 = vmatprep.subr.bf16.mxu1 %v14228_v53  ;;  %v14257_v22 = vpack.c.bf16 %v5242_v2, %v5196_v52 }
 0x976   : > { %11640 = vmatpush3.bf16.msra.mxu1 %v14228_v53  ;;  %11015 = vmatprep.mubr.msk.f32.mxu0 %vm692_vm2, %v13921_v50  ;;  %v5200_v61 = vpop.permute.xlu0 %5199 }
 0x977   : > { %11620 = vmatpush3.bf16.msra.mxu0 %v14220_v1  ;;  %11054 = vmatprep.mubr.msk.f32.mxu1 %vm692_vm2, %v13921_v50 }
 0x978   : > { %11013 = vmatprep.subr.msk.mxu0 %vm561_vm0, %v14209_v28  ;;  %v5246_v24 = vpop.permute.xlu1 %5245 }
 0x979   : > { %v14249_v10 = vpack.c.bf16 %v5246_v24, %v5200_v61 }
 0x97a   : > { %v14276_v2 = vpop.permute.xlu0 %5243 }
 0x97b   : > { %11014 = vmatpush3.msk.msra.mxu0 %vm561_vm0, %v14209_v28  ;;  %11642 = vmatprep.subr.bf16.mxu1 %v14249_v10 }
 0x97c   : > { %11016 = vmatmul.mubr.msk.f32.vlgmr.msra.gmra.mrb[60].mxu0 %vm692_vm2, %v14137_v43  ;;  %11630 = vmatprep.subr.bf16.mxu0 %v14252_v41  ;;  %v14262_v40 = vpop.permute.xlu1 %5247 }
 0x97d   : > { %11632 = vmatpush3.bf16.msra.mxu0 %v14252_v41  ;;  %11644 = vmatpush3.bf16.msra.mxu1 %v14249_v10 }
 0x97e   : > { %11634 = vmatprep.subr.bf16.mxu0 %v14257_v22  ;;  %11052 = vmatprep.subr.msk.mxu1 %vm561_vm0, %v14262_v40 }
 0x97f   : > { %11041 = vmatprep.mubr.msk.f32.mxu0 %vm692_vm2, %v13921_v50  ;;  %v9917_v50 = vld [vmem:[%s15470_s1 + $0x38] sm:$0xf] }
 0x981   : > { %11636 = vmatpush3.bf16.msra.mxu0 %v14257_v22  ;;  %11053 = vmatpush3.msk.msra.mxu1 %vm561_vm0, %v14262_v40 }
 0x982   : > { %11039 = vmatprep.subr.msk.mxu0 %vm561_vm0, %v14276_v2  ;;  %11055 = vmatmul.mubr.msk.f32.vlgmr.msra.gmra.mrb[62].mxu1 %vm692_vm2, %v14137_v43 }
 0x983   : > { %11654 = vmatprep.subr.bf16.mxu1 %v14147_v62  ;;  %11080 = vmatprep.mubr.msk.f32.mxu1 %vm692_vm2, %v14274_v20 }
 0x984   : > { %11656 = vmatpush3.bf16.msra.mxu1 %v14147_v62 }
 0x985   : > { %11658 = vmatprep.subr.bf16.mxu1 %v14152_v35  ;;  %11040 = vmatpush3.msk.msra.mxu0 %vm561_vm0, %v14276_v2 }
 0x986   : > { %11042 = vmatmul.mubr.msk.f32.vlgmr.msra.gmra.mrb[62].mxu0 %vm692_vm2, %v14137_v43  ;;  %11646 = vmatprep.subr.bf16.mxu0 %v14118_v46 }
 0x987   : > { %11648 = vmatpush3.bf16.msra.mxu0 %v14118_v46  ;;  %11067 = vmatprep.mubr.msk.f32.mxu0 %vm692_vm2, %v14274_v20 }
 0x988   : > { %11660 = vmatpush3.bf16.msra.mxu1 %v14152_v35  ;;  %11650 = vmatprep.subr.bf16.mxu0 %v14122_v19 }
 0x989   : > { %11078 = vmatprep.subr.msk.mxu1 %vm561_vm0, %v14142_v26 }
 0x98b   : > { %11652 = vmatpush3.bf16.msra.mxu0 %v14122_v19  ;;  %v15528_v19 = vsub.s32 0, %v12825_v38 }
 0x98c   : > { %11079 = vmatpush3.msk.msra.mxu1 %vm561_vm0, %v14142_v26  ;;  %11065 = vmatprep.subr.msk.mxu0 %vm561_vm0, %v14125_v33 }
 0x98d   : > { %11081 = vmatmul.mubr.msk.f32.vlgmr.msra.gmra.mrb[64].mxu1 %vm692_vm2, %v9917_v50  ;;  %11670 = vmatprep.subr.bf16.mxu1 %v14140_v9 }
 0x98e   : > { %11672 = vmatpush3.bf16.msra.mxu1 %v14140_v9  ;;  %11106 = vmatprep.mubr.msk.f32.mxu1 %vm692_vm2, %v14274_v20 }
 0x98f   : > { %11674 = vmatprep.subr.bf16.mxu1 %v14162_v48  ;;  %11066 = vmatpush3.msk.msra.mxu0 %vm561_vm0, %v14125_v33  ;;  %v9934_v33 = vld [vmem:[%s15473_s4 + $0x8] sm:$0x7f] }
 0x990   : > { %11068 = vmatmul.mubr.msk.f32.vlgmr.msra.gmra.mrb[64].mxu0 %vm692_vm2, %v9917_v50  ;;  %11662 = vmatprep.subr.bf16.mxu0 %v14174_v31 }
 0x991   : > { %11664 = vmatpush3.bf16.msra.mxu0 %v14174_v31  ;;  %11093 = vmatprep.mubr.msk.f32.mxu0 %vm692_vm2, %v14274_v20 }
 0x992   : > { %11676 = vmatpush3.bf16.msra.mxu1 %v14162_v48  ;;  %11666 = vmatprep.subr.bf16.mxu0 %v14178_v25 }
 0x993   : > { %11104 = vmatprep.subr.msk.mxu1 %vm561_vm0, %v14183_v30 }
 0x995   : > { %11668 = vmatpush3.bf16.msra.mxu0 %v14178_v25 }
 0x996   : > { %11105 = vmatpush3.msk.msra.mxu1 %vm561_vm0, %v14183_v30  ;;  %11091 = vmatprep.subr.msk.mxu0 %vm561_vm0, %v14167_v29 }
 0x997   : > { %11107 = vmatmul.mubr.msk.f32.vlgmr.msra.gmra.mrb[66].mxu1 %vm692_vm2, %v9917_v50  ;;  %11686 = vmatprep.subr.bf16.mxu1 %v14189_v27 }
 0x998   : > { %11688 = vmatpush3.bf16.msra.mxu1 %v14189_v27  ;;  %11132 = vmatprep.mubr.msk.f32.mxu1 %vm692_vm2, %v14274_v20 }
 0x999   : > { %11690 = vmatprep.subr.bf16.mxu1 %v14202_v36  ;;  %11092 = vmatpush3.msk.msra.mxu0 %vm561_vm0, %v14167_v29 }
 0x99a   : > { %11094 = vmatmul.mubr.msk.f32.vlgmr.msra.gmra.mrb[66].mxu0 %vm692_vm2, %v9917_v50  ;;  %11678 = vmatprep.subr.bf16.mxu0 %v14216_v8 }
 0x99b   : > { %11680 = vmatpush3.bf16.msra.mxu0 %v14216_v8  ;;  %11119 = vmatprep.mubr.msk.f32.mxu0 %vm692_vm2, %v14274_v20 }
 0x99c   : > { %11692 = vmatpush3.bf16.msra.mxu1 %v14202_v36  ;;  %11682 = vmatprep.subr.bf16.mxu0 %v14220_v1 }
 0x99d   : > { %11130 = vmatprep.subr.msk.mxu1 %vm561_vm0, %v14225_v14 }
 0x99f   : > { %11684 = vmatpush3.bf16.msra.mxu0 %v14220_v1 }
 0x9a0   : > { %11131 = vmatpush3.msk.msra.mxu1 %vm561_vm0, %v14225_v14  ;;  %11117 = vmatprep.subr.msk.mxu0 %vm561_vm0, %v14209_v28 }
 0x9a1   : > { %11133 = vmatmul.mubr.msk.f32.vlgmr.msra.gmra.mrb[68].mxu1 %vm692_vm2, %v9917_v50  ;;  %11702 = vmatprep.subr.bf16.mxu1 %v14228_v53 }
 0x9a2   : > { %11704 = vmatpush3.bf16.msra.mxu1 %v14228_v53  ;;  %11158 = vmatprep.mubr.msk.f32.mxu1 %vm692_vm2, %v14274_v20 }
 0x9a3   : > { %11706 = vmatprep.subr.bf16.mxu1 %v14249_v10  ;;  %11118 = vmatpush3.msk.msra.mxu0 %vm561_vm0, %v14209_v28  ;;  %v4987_v28 = vrot.slane %v9934_v33, %v15528_v19 }
 0x9a4   : > { %11120 = vmatmul.mubr.msk.f32.vlgmr.msra.gmra.mrb[68].mxu0 %vm692_vm2, %v9917_v50  ;;  %11694 = vmatprep.subr.bf16.mxu0 %v14252_v41 }
 0x9a5   : > { %11696 = vmatpush3.bf16.msra.mxu0 %v14252_v41  ;;  %11145 = vmatprep.mubr.msk.f32.mxu0 %vm692_vm2, %v14274_v20 }
 0x9a6   : > { %11708 = vmatpush3.bf16.msra.mxu1 %v14249_v10  ;;  %11698 = vmatprep.subr.bf16.mxu0 %v14257_v22 }
 0x9a7   : > { %11156 = vmatprep.subr.msk.mxu1 %vm561_vm0, %v14262_v40 }
 0x9a8   : > { %v10937_v26 = vpop.f32.mrb[46].mxu1 }
 0x9a9   : > { %11700 = vmatpush3.bf16.msra.mxu0 %v14257_v22  ;;  %v5078_v29 = vpop.f32.mrb[47].mxu1  ;;  %v5084_v9 = vadd.f32 %v10937_v26, %v4987_v28 }
 0x9aa   : > { %11157 = vmatpush3.msk.msra.mxu1 %vm561_vm0, %v14262_v40  ;;  %v5079_v46 = vadd.f32 %v5078_v29, %v4987_v28  ;;  %11143 = vmatprep.subr.msk.mxu0 %vm561_vm0, %v14276_v2 }
 0x9ab   : > { %11159 = vmatmul.mubr.msk.f32.vlgmr.msra.gmra.mrb[70].mxu1 %vm692_vm2, %v9917_v50  ;;  %v7430_v30 = vcombine.high %v5084_v9, %v5084_v9 }
 0x9ac   : > { %v7429_v43 = vcombine.high %v5079_v46, %v5079_v46 }
 0x9ad   : > { %11144 = vmatpush3.msk.msra.mxu0 %vm561_vm0, %v14276_v2 }
 0x9ae   : > { %v7441_v62 = vcombine.low %v5079_v46, %v7429_v43  ;;  %11146 = vmatmul.mubr.msk.f32.vlgmr.msra.gmra.mrb[70].mxu0 %vm692_vm2, %v9917_v50 }
 0x9b0   : > { %v14385_v35 = vpack.c.bf16 %v5084_v9, %v7441_v62  ;;  %v10940_v48 = vpop.f32.mrb[48].mxu1 }
 0x9b1   : > { %v5094_v31 = vadd.f32 %v10940_v48, %v4987_v28  ;;  %v5088_v25 = vpop.f32.mrb[49].mxu1 }
 0x9b2   : > { %v5089_v27 = vadd.f32 %v5088_v25, %v4987_v28 }
 0x9b3   : > { %v7432_v36 = vcombine.high %v5094_v31, %v5094_v31 }
 0x9b4   : > { %v7431_v8 = vcombine.high %v5089_v27, %v5089_v27  ;;  %v7526_v1 = vcombine.low %v7430_v30, %v5089_v27 }
 0x9b5   : > { %v7611_v14 = vcombine.low %v5094_v31, %v7432_v36  ;;  %v10943_v53 = vpop.f32.mrb[50].mxu1 }
 0x9b6   : > { %v14387_v52 = vpack.c.bf16 %v7431_v8, %v7526_v1  ;;  %v5098_v60 = vpop.f32.mrb[51].mxu1  ;;  %v5104_v61 = vadd.f32 %v10943_v53, %v4987_v28 }
 0x9b7   : > { %v5099_v24 = vadd.f32 %v5098_v60, %v4987_v28 }
 0x9b8   : > { %v7434_v22 = vcombine.high %v5104_v61, %v5104_v61 }
 0x9b9   : > { %v7433_v10 = vcombine.high %v5099_v24, %v5099_v24  ;;  %v14389_v41 = vpack.c.bf16 %v5099_v24, %v7611_v14 }
 0x9bb   : > { %v7696_v40 = vcombine.low %v7433_v10, %v5104_v61 }
 0x9bc   : > { %v10946_v20 = vpop.f32.mrb[52].mxu1 }
 0x9bd   : > { %v14391_v2 = vpack.c.bf16 %v7434_v22, %v7696_v40  ;;  %v5114_v50 = vadd.f32 %v10946_v20, %v4987_v28  ;;  %v5108_v33 = vpop.f32.mrb[53].mxu1  ;;  %v14401_v20 = vpop.permute.xlu0 %5899 }
 0x9be   : > { %v5109_v19 = vadd.f32 %v5108_v33, %v4987_v28 }
 0x9bf   : > { %v7436_v48 = vcombine.high %v5114_v50, %v5114_v50 }
 0x9c0   : > { %v7435_v26 = vcombine.high %v5109_v19, %v5109_v19 }
 0x9c1   : > { %v14403_v33 = vpop.permute.xlu0 %5267 }
 0x9c2   : > { %v7781_v29 = vcombine.low %v5109_v19, %v7435_v26 }
 0x9c4   : > { %v14393_v46 = vpack.c.bf16 %v5114_v50, %v7781_v29  ;;  %v10949_v43 = vpop.f32.mrb[54].mxu1 }
 0x9c5   : > { %v5124_v9 = vadd.f32 %v10949_v43, %v4987_v28  ;;  %v5118_v62 = vpop.f32.mrb[55].mxu1 }
 0x9c6   : > { %v5119_v31 = vadd.f32 %v5118_v62, %v4987_v28 }
 0x9c7   : > { %v7438_v25 = vcombine.high %v5124_v9, %v5124_v9 }
 0x9c8   : > { %v7437_v30 = vcombine.high %v5119_v31, %v5119_v31  ;;  %v7866_v27 = vcombine.low %v7436_v48, %v5119_v31 }
 0x9c9   : > { %v7951_v36 = vcombine.low %v5124_v9, %v7438_v25  ;;  %v10952_v8 = vpop.f32.mrb[56].mxu1 }
 0x9ca   : > { %v14395_v1 = vpack.c.bf16 %v7437_v30, %v7866_v27  ;;  %v5134_v14 = vadd.f32 %v10952_v8, %v4987_v28  ;;  %v5128_v53 = vpop.f32.mrb[57].mxu1 }
 0x9cb   : > { %v5129_v60 = vadd.f32 %v5128_v53, %v4987_v28 }
 0x9cc   : > { %v7440_v10 = vcombine.high %v5134_v14, %v5134_v14 }
 0x9cd   : > { %v7439_v61 = vcombine.high %v5129_v60, %v5129_v60  ;;  %v14397_v24 = vpack.c.bf16 %v5129_v60, %v7951_v36 }
 0x9cf   : > { %v8036_v22 = vcombine.low %v7439_v61, %v5134_v14  ;;  %v14421_v61 = vpop.permute.xlu1 %5904 }
 0x9d1   : > { %v14399_v40 = vpack.c.bf16 %v7440_v10, %v8036_v22 }
 0xa30   : > { %v10965_v50 = vpop.f32.mrb[54].mxu0 }
 0xa31   : > { %v5349_v19 = vpop.f32.mrb[55].mxu0 }
 0xa32   : > { %v5350_v26 = vadd.f32 %v5349_v19, %v14403_v33 }
 0xa34   : > { %11165 = vmatprep.mubr.msk.f32.mxu0 %vm1931_vm3, %v5350_v26 }
 0xa3b   : > { %v10978_v29 = vpop.f32.mrb[56].mxu0 }
 0xa3c   : > { %v5426_v43 = vpop.f32.mrb[57].mxu0 }
 0xa3d   : > { %v5427_v28 = vadd.f32 %v5426_v43, %v14403_v33 }
 0xa3e   : > { %v11004_v9 = vpop.f32.mrb[58].mxu1 }
 0xa3f   : > { %11172 = vmatprep.mubr.msk.f32.mxu1 %vm1931_vm3, %v5427_v28  ;;  %v5580_v62 = vpop.f32.mrb[59].mxu1 }
 0xa45   : > { %v10991_v48 = vpop.f32.mrb[58].mxu0 }
 0xa46   : > { %v5503_v31 = vpop.f32.mrb[59].mxu0 }
 0xa48   : > { %v14409_v25 = vpop.f32.mrb[60].mxu1 }
 0xa49   : > { %v5734_v30 = vpop.f32.mrb[61].mxu1 }
 0xa4f   : > { %v14411_v27 = vpop.f32.mrb[60].mxu0 }
 0xa50   : > { %v5657_v36 = vpop.f32.mrb[61].mxu0 }
 0xa55   : > { %v14413_v8 = vpop.f32.mrb[62].mxu1 }
 0xa56   : > { %v14415_v14 = vpop.f32.mrb[63].mxu1 }
 0xa59   : > { %v14417_v53 = vpop.f32.mrb[62].mxu0 }
 0xa5a   : > { %v14419_v60 = vpop.f32.mrb[63].mxu0 }
 0xa60   : > { %v11082_v10 = vpop.f32.mrb[64].mxu1 }
 0xa61   : > { %v6060_v22 = vadd.f32 %v11082_v10, %v14421_v61  ;;  %v6054_v19 = vpop.f32.mrb[65].mxu1 }
 0xa62   : > { %v6055_v26 = vadd.f32 %v6054_v19, %v14401_v20 }
 0xa63   : > { %v11069_v43 = vpop.f32.mrb[64].mxu0 }
 0xa64   : > { %v11715_v28 = vpack.c.bf16 %v6060_v22, %v6055_v26  ;;  %v5985_v38 = vadd.f32 %v11069_v43, %v14421_v61  ;;  %v5979_v7 = vpop.f32.mrb[65].mxu0  ;;  %v14435_v22 = vpop.permute.xlu1 %5272 }
 0xa65   : > { %v5980_v54 = vadd.f32 %v5979_v7, %v14401_v20  ;;  %v5432_v7 = vadd.f32 %v10978_v29, %v14435_v22 }
 0xa66   : > { %11717 = vmatprep.subr.msk.bf16.mxu1 %vm12882_vm4, %v11715_v28 }
 0xa67   : > { %v11709_v44 = vpack.c.bf16 %v5985_v38, %v5980_v54  ;;  %11720 = vmatpush3.bf16.xpose.msk.msra.mxu1 %vm12882_vm4, %v11715_v28  ;;  %v5581_v38 = vadd.f32 %v5580_v62, %v14403_v33 }
 0xa69   : > { %11711 = vmatprep.subr.msk.bf16.mxu0 %vm12882_vm4, %v11709_v44 }
 0xa6a   : > { %v11108_v10 = vpop.f32.mrb[66].mxu1  ;;  %11714 = vmatpush3.bf16.xpose.msk.msra.mxu0 %vm12882_vm4, %v11709_v44  ;;  %v5355_v44 = vadd.f32 %v10965_v50, %v14435_v22 }
 0xa6b   : > { %v6210_v19 = vadd.f32 %v11108_v10, %v14421_v61  ;;  %v6204_v26 = vpop.f32.mrb[67].mxu1  ;;  %v5504_v10 = vadd.f32 %v5503_v31, %v14403_v33  ;;  %v5586_v31 = vadd.f32 %v11004_v9, %v14435_v22 }
 0xa6c   : > { %v6205_v43 = vadd.f32 %v6204_v26, %v14401_v20 }
 0xa6d   : > { %v11095_v54 = vpop.f32.mrb[66].mxu0 }
 0xa6e   : > { %v11727_v28 = vpack.c.bf16 %v6210_v19, %v6205_v43  ;;  %v6135_v58 = vadd.f32 %v11095_v54, %v14421_v61  ;;  %11173 = vmatmul.mubr.msk.f32.vlgmr.msra.gmra.mrb[72].mxu1 %vm1931_vm3, %v5432_v7  ;;  %v6129_v57 = vpop.f32.mrb[67].mxu0 }
 0xa6f   : > { %v6130_v49 = vadd.f32 %v6129_v57, %v14401_v20  ;;  %11186 = vmatprep.mubr.msk.f32.mxu1 %vm1931_vm3, %v5581_v38  ;;  %v5509_v38 = vadd.f32 %v10991_v48, %v14435_v22 }
 0xa70   : > { %11729 = vmatprep.subr.msk.bf16.mxu1 %vm12882_vm4, %v11727_v28 }
 0xa71   : > { %v11721_v29 = vpack.c.bf16 %v6135_v58, %v6130_v49  ;;  %11732 = vmatpush3.bf16.xpose.msk.msra.mxu1 %vm12882_vm4, %v11727_v28  ;;  %11166 = vmatmul.mubr.msk.f32.vlgmr.msra.gmra.mrb[72].mxu0 %vm1931_vm3, %v5355_v44  ;;  %v5735_v58 = vadd.f32 %v5734_v30, %v14403_v33  ;;  %v5658_v28 = vadd.f32 %v5657_v36, %v14403_v33 }
 0xa72   : > { %11179 = vmatprep.mubr.msk.f32.mxu0 %vm1931_vm3, %v5504_v10  ;;  %v5740_v44 = vadd.f32 %v14409_v25, %v14435_v22  ;;  %v5812_v25 = vadd.f32 %v14419_v60, %v14403_v33 }
 0xa73   : > { %11723 = vmatprep.subr.msk.bf16.mxu0 %vm12882_vm4, %v11721_v29 }
 0xa74   : > { %v11134_v50 = vpop.f32.mrb[68].mxu1  ;;  %11726 = vmatpush3.bf16.xpose.msk.msra.mxu0 %vm12882_vm4, %v11721_v29  ;;  %v5889_v29 = vadd.f32 %v14415_v14, %v14403_v33  ;;  %v5817_v33 = vadd.f32 %v14417_v53, %v14435_v22 }
 0xa75   : > { %v6360_v57 = vadd.f32 %v11134_v50, %v14421_v61  ;;  %v6354_v62 = vpop.f32.mrb[69].mxu1 }
 0xa76   : > { %v6355_v49 = vadd.f32 %v6354_v62, %v14401_v20 }
 0xa77   : > { %v11121_v19 = vpop.f32.mrb[68].mxu0 }
 0xa78   : > { %v11739_v26 = vpack.c.bf16 %v6360_v57, %v6355_v49  ;;  %v6285_v7 = vadd.f32 %v11121_v19, %v14421_v61  ;;  %11187 = vmatmul.mubr.msk.f32.vlgmr.msra.gmra.mrb[74].mxu1 %vm1931_vm3, %v5586_v31  ;;  %v6279_v43 = vpop.f32.mrb[69].mxu0  ;;  %v5663_v49 = vadd.f32 %v14411_v27, %v14435_v22 }
 0xa79   : > { %v6280_v54 = vadd.f32 %v6279_v43, %v14401_v20  ;;  %11200 = vmatprep.mubr.msk.f32.mxu1 %vm1931_vm3, %v5735_v58 }
 0xa7a   : > { %11741 = vmatprep.subr.msk.bf16.mxu1 %vm12882_vm4, %v11739_v26 }
 0xa7b   : > { %v11733_v9 = vpack.c.bf16 %v6285_v7, %v6280_v54  ;;  %11744 = vmatpush3.bf16.xpose.msk.msra.mxu1 %vm12882_vm4, %v11739_v26  ;;  %11180 = vmatmul.mubr.msk.f32.vlgmr.msra.gmra.mrb[74].mxu0 %vm1931_vm3, %v5509_v38 }
 0xa7c   : > { %11193 = vmatprep.mubr.msk.f32.mxu0 %vm1931_vm3, %v5658_v28 }
 0xa7d   : > { %11735 = vmatprep.subr.msk.bf16.mxu0 %vm12882_vm4, %v11733_v9 }
 0xa7e   : > { %v11160_v48 = vpop.f32.mrb[70].mxu1  ;;  %11738 = vmatpush3.bf16.xpose.msk.msra.mxu0 %vm12882_vm4, %v11733_v9 }
 0xa7f   : > { %v6510_v30 = vadd.f32 %v11160_v48, %v14421_v61  ;;  %v6504_v36 = vpop.f32.mrb[71].mxu1 }
 0xa80   : > { %v6505_v10 = vadd.f32 %v6504_v36, %v14401_v20 }
 0xa81   : > { %v11147_v50 = vpop.f32.mrb[70].mxu0 }
 0xa82   : > { %v11751_v57 = vpack.c.bf16 %v6510_v30, %v6505_v10  ;;  %v6435_v62 = vadd.f32 %v11147_v50, %v14421_v61  ;;  %11201 = vmatmul.mubr.msk.f32.vlgmr.msra.gmra.mrb[76].mxu1 %vm1931_vm3, %v5740_v44  ;;  %v6429_v31 = vpop.f32.mrb[71].mxu0 }
 0xa83   : > { %v6430_v58 = vadd.f32 %v6429_v31, %v14401_v20  ;;  %11214 = vmatprep.mubr.msk.f32.mxu1 %vm1931_vm3, %v5889_v29  ;;  %v5894_v20 = vadd.f32 %v14413_v8, %v14435_v22 }
 0xa84   : > { %11753 = vmatprep.subr.msk.bf16.mxu1 %vm12882_vm4, %v11751_v57 }
 0xa85   : > { %v11745_v14 = vpack.c.bf16 %v6435_v62, %v6430_v58  ;;  %11756 = vmatpush3.bf16.xpose.msk.msra.mxu1 %vm12882_vm4, %v11751_v57  ;;  %11194 = vmatmul.mubr.msk.f32.vlgmr.msra.gmra.mrb[76].mxu0 %vm1931_vm3, %v5663_v49 }
 0xa86   : > { %11765 = vmatprep.subr.msk.bf16.mxu1 %vm12943_vm6, %v14387_v52  ;;  %11207 = vmatprep.mubr.msk.f32.mxu0 %vm1931_vm3, %v5812_v25 }
 0xa87   : > { %11747 = vmatprep.subr.msk.bf16.mxu0 %vm12882_vm4, %v11745_v14 }
 0xa88   : > { %11750 = vmatpush3.bf16.xpose.msk.msra.mxu0 %vm12882_vm4, %v11745_v14 }
 0xa89   : > { %11759 = vmatprep.subr.msk.bf16.mxu0 %vm12943_vm6, %v14385_v35 }
 0xa8c   : > { %11215 = vmatmul.mubr.msk.f32.vlgmr.msra.gmra.mrb[78].mxu1 %vm1931_vm3, %v5894_v20 }
 0xa8d   : > { %11768 = vmatpush3.bf16.msk.msra.mxu1 %vm12943_vm6, %v14387_v52 }
 0xa8e   : > { %11777 = vmatprep.subr.msk.bf16.mxu1 %vm12943_vm6, %v14391_v2 }
 0xa8f   : > { %11208 = vmatmul.mubr.msk.f32.vlgmr.msra.gmra.mrb[78].mxu0 %vm1931_vm3, %v5817_v33 }
 0xa90   : > { %11762 = vmatpush3.bf16.msk.msra.mxu0 %vm12943_vm6, %v14385_v35 }
 0xa91   : > { %11771 = vmatprep.subr.msk.bf16.mxu0 %vm12943_vm6, %v14389_v41 }
 0xb41   : > { %v11174_v15 = vpop.f32.mrb[72].mxu1 }
 0xb42   : > { %v14525_v27 = vmul.f32 0.17677669, %v11174_v15  ;;  %v6678_v8 = vpop.f32.mrb[73].mxu1 }
 0xb43   : > { %v14527_v53 = vmul.f32 0.17677669, %v6678_v8 }
 0xb44   : > { %v7234_v52 = vsel %vm2648_vm8, %v14525_v27, -inf  ;;  %v11167_v60 = vpop.f32.mrb[72].mxu0 }
 0xb45   : > { %7235 = vmax.xlane.f32.xlu0 %v7234_v52  ;;  %v14531_v61 = vmul.f32 0.17677669, %v11167_v60  ;;  %v6591_v22 = vpop.f32.mrb[73].mxu0  ;;  %v7231_v26 = vsel %vm2644_vm7, %v14527_v53, -inf }
 0xb46   : > { %v14535_v19 = vmul.f32 0.17677669, %v6591_v22 }
 0xb47   : > { %v7228_v35 = vsel %vm2648_vm8, %v14531_v61, -inf }
 0xb48   : > { %7229 = vmax.xlane.f32.xlu1 %v7228_v35  ;;  %v7225_v54 = vsel %vm2644_vm7, %v14535_v19, -inf }
 0xb49   : > { %7232 = vmax.xlane.f32.xlu0 %v7231_v26 }
 0xb4b   : > { %v11188_v7 = vpop.f32.mrb[74].mxu1 }
 0xb4c   : > { %v14539_v43 = vmul.f32 0.17677669, %v11188_v7  ;;  %v6852_v38 = vpop.f32.mrb[75].mxu1 }
 0xb4d   : > { %v14543_v28 = vmul.f32 0.17677669, %v6852_v38  ;;  %7226 = vmax.xlane.f32.xlu0 %v7225_v54 }
 0xb4e   : > { %v11181_v9 = vpop.f32.mrb[74].mxu0  ;;  %v7246_v10 = vsel %vm2648_vm8, %v14539_v43, -inf }
 0xb4f   : > { %v7243_v48 = vsel %vm2644_vm7, %v14543_v28, -inf  ;;  %v6765_v30 = vpop.f32.mrb[75].mxu0  ;;  %v14547_v36 = vmul.f32 0.17677669, %v11181_v9 }
 0xb50   : > { %7244 = vmax.xlane.f32.xlu1 %v7243_v48  ;;  %v14549_v44 = vmul.f32 0.17677669, %v6765_v30 }
 0xb51   : > { %7247 = vmax.xlane.f32.xlu0 %v7246_v10  ;;  %v7240_v50 = vsel %vm2648_vm8, %v14547_v36, -inf }
 0xb52   : > { %v7237_v29 = vsel %vm2644_vm7, %v14549_v44, -inf }
 0xb54   : > { %7238 = vmax.xlane.f32.xlu1 %v7237_v29 }
 0xb55   : > { %v11202_v57 = vpop.f32.mrb[76].mxu1  ;;  %7241 = vmax.xlane.f32.xlu0 %v7240_v50 }
 0xb56   : > { %v7026_v62 = vpop.f32.mrb[77].mxu1  ;;  %v14561_v14 = vmul.f32 0.17677669, %v11202_v57 }
 0xb57   : > { %v14565_v33 = vmul.f32 0.17677669, %v7026_v62 }
 0xb58   : > { %v11195_v31 = vpop.f32.mrb[76].mxu0  ;;  %v7258_v52 = vsel %vm2648_vm8, %v14561_v14, -inf }
 0xb59   : > { %v14557_v49 = vmul.f32 0.17677669, %v11195_v31  ;;  %v6939_v58 = vpop.f32.mrb[77].mxu0  ;;  %v7255_v22 = vsel %vm2644_vm7, %v14565_v33, -inf }
 0xb5a   : > { %v14559_v25 = vmul.f32 0.17677669, %v6939_v58 }
 0xb5b   : > { %v7252_v20 = vsel %vm2648_vm8, %v14557_v49, -inf }
 0xb5c   : > { %7253 = vmax.xlane.f32.xlu0 %v7252_v20  ;;  %v7249_v15 = vsel %vm2644_vm7, %v14559_v25, -inf }
 0xb5d   : > { %7250 = vmax.xlane.f32.xlu1 %v7249_v15 }
 0xb5f   : > { %v11216_v8 = vpop.f32.mrb[78].mxu1 }
 0xb60   : > { %v7200_v60 = vpop.f32.mrb[79].mxu1  ;;  %7259 = vmax.xlane.f32.xlu0 %v7258_v52  ;;  %v14577_v54 = vmul.f32 0.17677669, %v11216_v8 }
 0xb61   : > { %7256 = vmax.xlane.f32.xlu1 %v7255_v22  ;;  %v14581_v48 = vmul.f32 0.17677669, %v7200_v60 }
 0xb62   : > { %v11209_v35 = vpop.f32.mrb[78].mxu0  ;;  %v7270_v10 = vsel %vm2648_vm8, %v14577_v54, -inf }
 0xb63   : > { %v14573_v26 = vmul.f32 0.17677669, %v11209_v35  ;;  %v7113_v7 = vpop.f32.mrb[79].mxu0  ;;  %v7267_v29 = vsel %vm2644_vm7, %v14581_v48, -inf }
 0xb64   : > { %v14575_v38 = vmul.f32 0.17677669, %v7113_v7 }
 0xb65   : > { %v7264_v9 = vsel %vm2648_vm8, %v14573_v26, -inf }
 0xb66   : > { %7265 = vmax.xlane.f32.xlu0 %v7264_v9  ;;  %v7261_v30 = vsel %vm2644_vm7, %v14575_v38, -inf }
 0xb67   : > { %7262 = vmax.xlane.f32.xlu1 %v7261_v30 }
 0xb6a   : > { %7271 = vmax.xlane.f32.xlu0 %v7270_v10 }
 0xb6b   : > { %7268 = vmax.xlane.f32.xlu1 %v7267_v29 }
 0xbd2   : > { %v7236_v50 = vpop.xlane.xlu0 %7235 }
 0xbd3   : > { %v7276_v57 = vsub.f32 %v14525_v27, %v7236_v50 }
 0xbd5   : > { %v7295_v62 = vmul.f32 1.442695, %v7276_v57  ;;  %v7230_v31 = vpop.xlane.xlu1 %7229 }
 0xbd6   : > { %v7233_v58 = vpop.xlane.xlu0 %7232  ;;  %v7274_v20 = vsub.f32 %v14531_v61, %v7230_v31 }
 0xbd7   : > { %12098 = vpow2.f32 %v7295_v62  ;;  %v7275_v15 = vsub.f32 %v14527_v53, %v7233_v58 }
 0xbd8   : > { %v7291_v8 = vmul.f32 1.442695, %v7274_v20 }
 0xbd9   : > { %v7293_v52 = vmul.f32 1.442695, %v7275_v15 }
 0xbda   : > { %12100 = vpow2.f32 %v7291_v8  ;;  %v7227_v60 = vpop.xlane.xlu0 %7226 }
 0xbdb   : > { %12102 = vpow2.f32 %v7293_v52  ;;  %v7273_v22 = vsub.f32 %v14535_v19, %v7227_v60 }
 0xbdd   : > { %v7289_v35 = vmul.f32 1.442695, %v7273_v22  ;;  %v7245_v7 = vpop.xlane.xlu1 %7244 }
 0xbde   : > { %v7279_v9 = vsub.f32 %v14543_v28, %v7245_v7  ;;  %v7248_v27 = vpop.xlane.xlu0 %7247 }
 0xbdf   : > { %12104 = vpow2.f32 %v7289_v35  ;;  %v7280_v30 = vsub.f32 %v14539_v43, %v7248_v27 }
 0xbe0   : > { %v7301_v10 = vmul.f32 1.442695, %v7279_v9 }
 0xbe1   : > { %v14595_v61 = vpop.eup %12098  ;;  %v7303_v29 = vmul.f32 1.442695, %v7280_v30  ;;  %v7239_v53 = vpop.xlane.xlu1 %7238 }
 0xbe2   : > { %12106 = vpow2.f32 %v7301_v10  ;;  %v7277_v50 = vsub.f32 %v14549_v44, %v7239_v53  ;;  %v7242_v57 = vpop.xlane.xlu0 %7241  ;;  %v7330_v19 = vsel %vm2648_vm8, %v14595_v61, 0.0 }
 0xbe3   : > { %12108 = vpow2.f32 %v7303_v29  ;;  %v7278_v62 = vsub.f32 %v14547_v36, %v7242_v57  ;;  %7331 = vadd.xlane.f32.xlu0 %v7330_v19 }
 0xbe4   : > { %v14601_v28 = vpop.eup %12100  ;;  %v7297_v31 = vmul.f32 1.442695, %v7277_v50 }
 0xbe5   : > { %v14603_v43 = vpop.eup %12102  ;;  %v7299_v58 = vmul.f32 1.442695, %v7278_v62  ;;  %v7324_v20 = vsel %vm2648_vm8, %v14601_v28, 0.0 }
 0xbe6   : > { %12110 = vpow2.f32 %v7297_v31  ;;  %v7327_v44 = vsel %vm2644_vm7, %v14603_v43, 0.0 }
 0xbe7   : > { %12112 = vpow2.f32 %v7299_v58  ;;  %7325 = vadd.xlane.f32.xlu0 %v7324_v20  ;;  %7328 = vadd.xlane.f32.xlu1 %v7327_v44 }
 0xbe9   : > { %v14609_v15 = vpop.eup %12104  ;;  %v7254_v36 = vpop.xlane.xlu0 %7253 }
 0xbea   : > { %v7282_v8 = vsub.f32 %v14557_v49, %v7254_v36  ;;  %v7251_v52 = vpop.xlane.xlu1 %7250  ;;  %v7321_v60 = vsel %vm2644_vm7, %v14609_v15, 0.0 }
 0xbeb   : > { %v7281_v22 = vsub.f32 %v14559_v25, %v7251_v52  ;;  %7322 = vadd.xlane.f32.xlu1 %v7321_v60 }
 0xbec   : > { %v14615_v35 = vpop.eup %12106  ;;  %v7307_v7 = vmul.f32 1.442695, %v7282_v8 }
 0xbed   : > { %v14617_v9 = vpop.eup %12108  ;;  %v7305_v27 = vmul.f32 1.442695, %v7281_v22  ;;  %v7260_v30 = vpop.xlane.xlu0 %7259  ;;  %v7339_v10 = vsel %vm2644_vm7, %v14615_v35, 0.0 }
 0xbee   : > { %12114 = vpow2.f32 %v7307_v7  ;;  %v7284_v49 = vsub.f32 %v14561_v14, %v7260_v30  ;;  %v7257_v29 = vpop.xlane.xlu1 %7256  ;;  %v7342_v53 = vsel %vm2648_vm8, %v14617_v9, 0.0 }
 0xbef   : > { %12116 = vpow2.f32 %v7305_v27  ;;  %v7283_v25 = vsub.f32 %v14565_v33, %v7257_v29  ;;  %7343 = vadd.xlane.f32.xlu0 %v7342_v53  ;;  %7340 = vadd.xlane.f32.xlu1 %v7339_v10 }
 0xbf0   : > { %v14625_v50 = vpop.eup %12110  ;;  %v7311_v57 = vmul.f32 1.442695, %v7284_v49 }
 0xbf1   : > { %v14627_v19 = vpop.eup %12112  ;;  %v7309_v62 = vmul.f32 1.442695, %v7283_v25  ;;  %v7333_v31 = vsel %vm2644_vm7, %v14625_v50, 0.0 }
 0xbf2   : > { %12118 = vpow2.f32 %v7311_v57  ;;  %v7336_v14 = vsel %vm2648_vm8, %v14627_v19, 0.0 }
 0xbf3   : > { %12120 = vpow2.f32 %v7309_v62  ;;  %7337 = vadd.xlane.f32.xlu0 %v7336_v14  ;;  %7334 = vadd.xlane.f32.xlu1 %v7333_v31  ;;  %v7266_v58 = vpop.xlane.xlu0 %7265 }
 0xbf4   : > { %v7286_v33 = vsub.f32 %v14573_v26, %v7266_v58  ;;  %v7263_v20 = vpop.xlane.xlu1 %7262 }
 0xbf5   : > { %v7285_v44 = vsub.f32 %v14575_v38, %v7263_v20 }
 0xbf6   : > { %v7315_v36 = vmul.f32 1.442695, %v7286_v33 }
 0xbf7   : > { %v7313_v8 = vmul.f32 1.442695, %v7285_v44  ;;  %v7272_v52 = vpop.xlane.xlu0 %7271 }
 0xbf8   : > { %v14635_v60 = vpop.eup %12114  ;;  %12122 = vpow2.f32 %v7315_v36  ;;  %v7288_v22 = vsub.f32 %v14577_v54, %v7272_v52  ;;  %v7269_v7 = vpop.xlane.xlu1 %7268 }
 0xbf9   : > { %v14638_v27 = vpop.eup %12116  ;;  %12124 = vpow2.f32 %v7313_v8  ;;  %v7287_v30 = vsub.f32 %v14581_v48, %v7269_v7  ;;  %v7348_v26 = vsel %vm2648_vm8, %v14635_v60, 0.0 }
 0xbfa   : > { %v7319_v10 = vmul.f32 1.442695, %v7288_v22  ;;  %7349 = vadd.xlane.f32.xlu0 %v7348_v26  ;;  %v7345_v38 = vsel %vm2644_vm7, %v14638_v27, 0.0 }
 0xbfb   : > { %v7317_v49 = vmul.f32 1.442695, %v7287_v30  ;;  %7346 = vadd.xlane.f32.xlu1 %v7345_v38 }
 0xbfc   : > { %v14645_v29 = vpop.eup %12118  ;;  %12126 = vpow2.f32 %v7319_v10 }
 0xbfd   : > { %v14647_v54 = vpop.eup %12120  ;;  %12128 = vpow2.f32 %v7317_v49  ;;  %v7354_v53 = vsel %vm2648_vm8, %v14645_v29, 0.0 }
 0xbfe   : > { %7355 = vadd.xlane.f32.xlu0 %v7354_v53  ;;  %v7351_v48 = vsel %vm2644_vm7, %v14647_v54, 0.0 }
 0xbff   : > { %7352 = vadd.xlane.f32.xlu1 %v7351_v48 }
 0xc02   : > { %v14653_v25 = vpop.eup %12122 }
 0xc03   : > { %v14655_v57 = vpop.eup %12124  ;;  %v7360_v62 = vsel %vm2648_vm8, %v14653_v25, 0.0 }
 0xc04   : > { %7361 = vadd.xlane.f32.xlu0 %v7360_v62  ;;  %v7357_v31 = vsel %vm2644_vm7, %v14655_v57, 0.0 }
 0xc05   : > { %7358 = vadd.xlane.f32.xlu1 %v7357_v31 }
 0xc06   : > { %v14661_v14 = vpop.eup %12126 }
 0xc07   : > { %v14663_v58 = vpop.eup %12128  ;;  %v7366_v33 = vsel %vm2648_vm8, %v14661_v14, 0.0 }
 0xc08   : > { %7367 = vadd.xlane.f32.xlu0 %v7366_v33  ;;  %v7363_v20 = vsel %vm2644_vm7, %v14663_v58, 0.0 }
 0xc09   : > { %7364 = vadd.xlane.f32.xlu1 %v7363_v20 }
 0xc70   : > { %v7332_v44 = vpop.xlane.xlu0 %7331 }
 0xc71   : > { %12130 = vrcp.f32 %v7332_v44 }
 0xc74   : > { %v7326_v36 = vpop.xlane.xlu0 %7325  ;;  %v7329_v8 = vpop.xlane.xlu1 %7328 }
 0xc75   : > { %12132 = vrcp.f32 %v7326_v36 }
 0xc76   : > { %12134 = vrcp.f32 %v7329_v8 }
 0xc78   : > { %v7323_v52 = vpop.xlane.xlu1 %7322 }
 0xc79   : > { %12136 = vrcp.f32 %v7323_v52 }
 0xc7b   : > { %v12131_v22 = vpop.eup %12130 }
 0xc7c   : > { %v7388_v7 = vmul.f32 %v12131_v22, %v14595_v61  ;;  %v7344_v30 = vpop.xlane.xlu0 %7343  ;;  %v7341_v26 = vpop.xlane.xlu1 %7340 }
 0xc7d   : > { %12138 = vrcp.f32 %v7344_v30 }
 0xc7e   : > { %12140 = vrcp.f32 %v7341_v26  ;;  %v7404_v10 = vadd.f32 %v7388_v7, %v13149_v23 }
 0xc7f   : > { %v12133_v38 = vpop.eup %12132 }
 0xc80   : > { %v12135_v49 = vpop.eup %12134  ;;  %v7386_v53 = vmul.f32 %v12133_v38, %v14601_v28  ;;  %v7338_v48 = vpop.xlane.xlu0 %7337  ;;  %9577 = vst.msk [vmem:[%s14674_s18 + $0x18] sm:$0xf] %vm2648_vm8, %v7404_v10 }
 0xc81   : > { %v7335_v61 = vpop.xlane.xlu1 %7334  ;;  %12142 = vrcp.f32 %v7338_v48  ;;  %v7387_v62 = vmul.f32 %v12135_v49, %v14603_v43 }
 0xc82   : > { %12144 = vrcp.f32 %v7335_v61  ;;  %v7402_v31 = vadd.f32 %v7386_v53, %v13139_v59 }
 0xc83   : > { %v12137_v33 = vpop.eup %12136  ;;  %v7403_v20 = vadd.f32 %v7387_v62, %v13155_v3 }
 0xc84   : > { %v7385_v23 = vmul.f32 %v12137_v33, %v14609_v15  ;;  %9575 = vst.msk [vmem:[%s14674_s18 + $0x8] sm:$0xf] %vm2648_vm8, %v7402_v31 }
 0xc85   : > { %11228 = vmatprep.mubr.msk.f32.mxu1 %vm2644_vm7, %v7403_v20  ;;  %9576 = vst.msk [vmem:[%s14674_s18 + $0x10] sm:$0xff] %vm2644_vm7, %v7403_v20 }
 0xc86   : > { %11229 = vmatmul.mubr.msk.f32.vlgmr.msra.gmra.mrb[80].mxu1 %vm2644_vm7, %v7404_v10  ;;  %v7401_v28 = vadd.f32 %v7385_v23, %v13136_v32 }
 0xc87   : > { %v12139_v43 = vpop.eup %12138  ;;  %11780 = vmatpush3.bf16.msk.msra.mxu1 %vm12943_vm6, %v14391_v2  ;;  %v7350_v59 = vpop.xlane.xlu0 %7349 }
 0xc88   : > { %v12141_v44 = vpop.eup %12140  ;;  %v7392_v3 = vmul.f32 %v12139_v43, %v14617_v9  ;;  %11789 = vmatprep.subr.msk.bf16.mxu1 %vm12943_vm6, %v14395_v1  ;;  %12146 = vrcp.f32 %v7350_v59  ;;  %11221 = vmatprep.mubr.msk.f32.mxu0 %vm2644_vm7, %v7401_v28  ;;  %9574 = vst.msk [vmem:[%s14674_s18] sm:$0xff] %vm2644_vm7, %v7401_v28  ;;  %v7347_v32 = vpop.xlane.xlu1 %7346 }
 0xc89   : > { %11222 = vmatmul.mubr.msk.f32.vlgmr.msra.gmra.mrb[80].mxu0 %vm2644_vm7, %v7402_v31  ;;  %12148 = vrcp.f32 %v7347_v32  ;;  %v7391_v2 = vmul.f32 %v12141_v44, %v14615_v35 }
 0xc8a   : > { %11774 = vmatpush3.bf16.msk.msra.mxu0 %vm12943_vm6, %v14389_v41  ;;  %v7408_v15 = vadd.f32 %v7392_v3, %v13187_v11 }
 0xc8b   : > { %v12143_v9 = vpop.eup %12142  ;;  %11783 = vmatprep.subr.msk.bf16.mxu0 %vm12943_vm6, %v14393_v46  ;;  %v7356_v36 = vpop.xlane.xlu0 %7355  ;;  %v7407_v8 = vadd.f32 %v7391_v2, %v13181_v17 }
 0xc8c   : > { %v12145_v52 = vpop.eup %12144  ;;  %v7390_v22 = vmul.f32 %v12143_v9, %v14627_v19  ;;  %12150 = vrcp.f32 %v7356_v36  ;;  %9581 = vst.msk [vmem:[%s14674_s18 + $0x38] sm:$0xf] %vm2648_vm8, %v7408_v15  ;;  %v7353_v35 = vpop.xlane.xlu1 %7352 }
 0xc8d   : > { %11242 = vmatprep.mubr.msk.f32.mxu1 %vm2644_vm7, %v7407_v8  ;;  %9580 = vst.msk [vmem:[%s14674_s18 + $0x30] sm:$0xff] %vm2644_vm7, %v7407_v8  ;;  %12152 = vrcp.f32 %v7353_v35  ;;  %v7389_v11 = vmul.f32 %v12145_v52, %v14625_v50 }
 0xc8e   : > { %11243 = vmatmul.mubr.msk.f32.vlgmr.msra.gmra.mrb[82].mxu1 %vm2644_vm7, %v7408_v15  ;;  %v7406_v41 = vadd.f32 %v7390_v22, %v13171_v63 }
 0xc8f   : > { %11792 = vmatpush3.bf16.msk.msra.mxu1 %vm12943_vm6, %v14395_v1  ;;  %v7405_v17 = vadd.f32 %v7389_v11, %v13168_v34 }
 0xc90   : > { %11801 = vmatprep.subr.msk.bf16.mxu1 %vm12943_vm6, %v14399_v40  ;;  %9579 = vst.msk [vmem:[%s14674_s18 + $0x28] sm:$0xf] %vm2648_vm8, %v7406_v41 }
 0xc91   : > { %11235 = vmatprep.mubr.msk.f32.mxu0 %vm2644_vm7, %v7405_v17  ;;  %9578 = vst.msk [vmem:[%s14674_s18 + $0x20] sm:$0xff] %vm2644_vm7, %v7405_v17  ;;  %v7362_v50 = vpop.xlane.xlu0 %7361  ;;  %v15531_v17 = vld [vmem:[#allocation7_spill] sm:$0xff] }
 0xc92   : > { %v12147_v19 = vpop.eup %12146  ;;  %11236 = vmatmul.mubr.msk.f32.vlgmr.msra.gmra.mrb[82].mxu0 %vm2644_vm7, %v7406_v41  ;;  %12154 = vrcp.f32 %v7362_v50  ;;  %v7359_v63 = vpop.xlane.xlu1 %7358 }
 0xc93   : > { %v12149_v1 = vpop.eup %12148  ;;  %v7394_v34 = vmul.f32 %v12147_v19, %v14635_v60  ;;  %11786 = vmatpush3.bf16.msk.msra.mxu0 %vm12943_vm6, %v14393_v46  ;;  %12156 = vrcp.f32 %v7359_v63 }
 0xc94   : > { %11795 = vmatprep.subr.msk.bf16.mxu0 %vm12943_vm6, %v14397_v24  ;;  %v7393_v7 = vmul.f32 %v12149_v1, %v14638_v27 }
 0xc95   : > { %v7368_v30 = vpop.xlane.xlu0 %7367  ;;  %v7410_v26 = vadd.f32 %v7394_v34, %v13203_v16 }
 0xc96   : > { %v12151_v10 = vpop.eup %12150  ;;  %12158 = vrcp.f32 %v7368_v30  ;;  %v7365_v38 = vpop.xlane.xlu1 %7364  ;;  %v7409_v60 = vadd.f32 %v7393_v7, %v13200_v6  ;;  %v15533_v30 = vld [vmem:[#allocation10_spill] sm:$0xff] }
 0xc97   : > { %v12153_v49 = vpop.eup %12152  ;;  %v7396_v46 = vmul.f32 %v12151_v10, %v14645_v29  ;;  %12160 = vrcp.f32 %v7365_v38  ;;  %9583 = vst.msk [vmem:[%s14674_s18 + $0x48] sm:$0xf] %vm2648_vm8, %v7410_v26  ;;  %v15534_v10 = vld [vmem:[#allocation12_spill] sm:$0xff] }
 0xc98   : > { %11249 = vmatprep.mubr.msk.f32.mxu0 %vm2644_vm7, %v7409_v60  ;;  %9582 = vst.msk [vmem:[%s14674_s18 + $0x40] sm:$0xff] %vm2644_vm7, %v7409_v60  ;;  %v7395_v27 = vmul.f32 %v12153_v49, %v14647_v54 }
 0xc99   : > { %11250 = vmatmul.mubr.msk.f32.vlgmr.msra.gmra.mrb[84].mxu0 %vm2644_vm7, %v7410_v26  ;;  %v7412_v16 = vadd.f32 %v7396_v46, %v13216_v5 }
 0xc9a   : > { %11798 = vmatpush3.bf16.msk.msra.mxu0 %vm12943_vm6, %v14397_v24  ;;  %v7411_v6 = vadd.f32 %v7395_v27, %v13213_v51  ;;  %v15535_v27 = vld [vmem:[#allocation9_spill] sm:$0xff] }
 0xc9b   : > { %9585 = vst.msk [vmem:[%s14674_s18 + $0x58] sm:$0xf] %vm2648_vm8, %v7412_v16 }
 0xc9c   : > { %v12155_v29 = vpop.eup %12154  ;;  %11256 = vmatprep.mubr.msk.f32.mxu1 %vm2644_vm7, %v7411_v6  ;;  %9584 = vst.msk [vmem:[%s14674_s18 + $0x50] sm:$0xff] %vm2644_vm7, %v7411_v6 }
 0xc9d   : > { %v12157_v54 = vpop.eup %12156  ;;  %v7398_v53 = vmul.f32 %v12155_v29, %v14653_v25  ;;  %11257 = vmatmul.mubr.msk.f32.vlgmr.msra.gmra.mrb[84].mxu1 %vm2644_vm7, %v7412_v16  ;;  %v15536_v29 = vld [vmem:[#allocation11_spill] sm:$0xff] }
 0xc9e   : > { %11804 = vmatpush3.bf16.msk.msra.mxu1 %vm12943_vm6, %v14399_v40  ;;  %v7397_v51 = vmul.f32 %v12157_v54, %v14655_v57  ;;  %v15529_v40 = vld [vmem:[#allocation4_spill] sm:$0xff]  ;;  %v15530_v57 = vld [vmem:[#allocation3_spill] sm:$0xff] }
 0xc9f   : > { %v7414_v5 = vadd.f32 %v7398_v53, %v13229_v45 }
 0xca0   : > { %v12159_v24 = vpop.eup %12158  ;;  %v7413_v48 = vadd.f32 %v7397_v51, %v13226_v55  ;;  %v15537_v51 = vld [vmem:[#allocation15_spill] sm:$0xff] }
 0xca1   : > { %v12161_v61 = vpop.eup %12160  ;;  %v7400_v62 = vmul.f32 %v12159_v24, %v14661_v14  ;;  %9587 = vst.msk [vmem:[%s14674_s18 + $0x68] sm:$0xf] %vm2648_vm8, %v7414_v5  ;;  %v15538_v24 = vld [vmem:[#allocation13_spill] sm:$0xff] }
 0xca2   : > { %11263 = vmatprep.mubr.msk.f32.mxu0 %vm2644_vm7, %v7413_v48  ;;  %9586 = vst.msk [vmem:[%s14674_s18 + $0x60] sm:$0xff] %vm2644_vm7, %v7413_v48  ;;  %v7399_v13 = vmul.f32 %v12161_v61, %v14663_v58 }
 0xca3   : > { %11264 = vmatmul.mubr.msk.f32.vlgmr.msra.gmra.mrb[86].mxu0 %vm2644_vm7, %v7414_v5  ;;  %v7416_v25 = vadd.f32 %v7400_v62, %v15529_v40 }
 0xca4   : > { %v7415_v45 = vadd.f32 %v7399_v13, %v15530_v57 }
 0xca5   : > { %9589 = vst.msk [vmem:[%s14674_s18 + $0x78] sm:$0xf] %vm2648_vm8, %v7416_v25 }
 0xca6   : > { %11270 = vmatprep.mubr.msk.f32.mxu1 %vm2644_vm7, %v7415_v45  ;;  %9588 = vst.msk [vmem:[%s14674_s18 + $0x70] sm:$0xff] %vm2644_vm7, %v7415_v45 }
 0xca7   : > { %11271 = vmatmul.mubr.msk.f32.vlgmr.msra.gmra.mrb[86].mxu1 %vm2644_vm7, %v7416_v25 }
 0xd59   : > { %v11230_v55 = vpop.f32.mrb[80].mxu1 }
 0xd5a   : > { %v7602_v14 = vpop.f32.mrb[81].mxu1 }
 0xd5b   : > { %v8130_v31 = vcombine.high %v7602_v14, %v7602_v14  ;;  %v14786_v58 = vadd.f32 %v7602_v14, %v13897_v4  ;;  %v15539_v14 = vld [vmem:[#allocation14_spill] sm:$0xff] }
 0xd5c   : > { %v11223_v33 = vpop.f32.mrb[80].mxu0 }
 0xd5d   : > { %v14789_v20 = vadd.f32 %v11223_v33, %v13872_v56  ;;  %v7517_v23 = vpop.f32.mrb[81].mxu0  ;;  %v14794_v59 = vadd.f32 %v8130_v31, %v13893_v0  ;;  %v14804_v56 = vadd.f32 %v11230_v55, %v13916_v42  ;;  %v15540_v33 = vld [vmem:[#allocation19_spill] sm:$0xff] }
 0xd5e   : > { %v8129_v28 = vcombine.high %v7517_v23, %v7517_v23  ;;  %v14797_v44 = vadd.f32 %v7517_v23, %v13869_v12 }
 0xd5f   : > { %v8202_v43 = vcombine.low %v14789_v20, %v14786_v58  ;;  %v8203_v12 = vcombine.low %v14794_v59, %v14804_v56 }
 0xd60   : > { %v14800_v3 = vadd.f32 %v8129_v28, %v13878_v21 }
 0xd61   : > { %v11244_v32 = vpop.f32.mrb[82].mxu1  ;;  %v8228_v4 = vsel %vm411_vm1, %v8202_v43, 0.0  ;;  %v8231_v35 = vsel %vm411_vm1, %v8203_v12, 0.0 }
 0xd62   : > { %v7772_v2 = vpop.f32.mrb[83].mxu1  ;;  %8229 = vadd.xlane.f32.xlu0 %v8228_v4  ;;  %v8201_v15 = vcombine.low %v14797_v44, %v14800_v3 }
 0xd63   : > { %v8132_v9 = vcombine.high %v7772_v2, %v7772_v2  ;;  %v14812_v21 = vadd.f32 %v7772_v2, %v13953_v18  ;;  %v15532_v18 = vld [vmem:[#allocation8_spill] sm:$0xff] }
 0xd64   : > { %v8225_v0 = vsel %vm411_vm1, %v8201_v15, 0.0  ;;  %v15542_v15 = vld [vmem:[#allocation18_spill] sm:$0xff] }
 0xd65   : > { %v11237_v36 = vpop.f32.mrb[82].mxu0  ;;  %8226 = vadd.xlane.f32.xlu1 %v8225_v0  ;;  %v14821_v11 = vadd.f32 %v8132_v9, %v13931_v39  ;;  %v15543_v9 = vld [vmem:[#allocation20_spill] sm:$0xff] }
 0xd66   : > { %v14815_v8 = vadd.f32 %v11237_v36, %v13936_v47  ;;  %v7687_v42 = vpop.f32.mrb[83].mxu0  ;;  %v14830_v47 = vadd.f32 %v11244_v32, %v15532_v18  ;;  %v15541_v32 = vld [vmem:[#allocation16_spill] sm:$0xff] }
 0xd67   : > { %v8131_v52 = vcombine.high %v7687_v42, %v7687_v42  ;;  %v14824_v41 = vadd.f32 %v7687_v42, %v13901_v37  ;;  %v15544_v42 = vld [vmem:[#allocation17_spill] sm:$0xff] }
 0xd68   : > { %v8205_v22 = vcombine.low %v14815_v8, %v14812_v21  ;;  %v8206_v37 = vcombine.low %v14821_v11, %v14830_v47 }
 0xd69   : > { %v14827_v50 = vadd.f32 %v8131_v52, %v15531_v17  ;;  %8232 = vadd.xlane.f32.xlu1 %v8231_v35 }
 0xd6a   : > { %v8237_v63 = vsel %vm411_vm1, %v8205_v22, 0.0  ;;  %v8240_v49 = vsel %vm411_vm1, %v8206_v37, 0.0  ;;  %v15546_v37 = vld [vmem:[#allocation6_spill] sm:$0xff] }
 0xd6b   : > { %v8204_v19 = vcombine.low %v14824_v41, %v14827_v50 }
 0xd6c   : > { %v11251_v1 = vpop.f32.mrb[84].mxu0 }
 0xd6d   : > { %8238 = vadd.xlane.f32.xlu1 %v8237_v63  ;;  %v8234_v39 = vsel %vm411_vm1, %v8204_v19, 0.0  ;;  %v7857_v34 = vpop.f32.mrb[85].mxu0  ;;  %v14846_v16 = vadd.f32 %v11251_v1, %v15535_v27 }
 0xd6e   : > { %8235 = vadd.xlane.f32.xlu0 %v8234_v39  ;;  %v8133_v7 = vcombine.high %v7857_v34, %v7857_v34  ;;  %v14839_v26 = vadd.f32 %v7857_v34, %v15533_v30  ;;  %v15545_v39 = vld [vmem:[#allocation5_spill] sm:$0xff] }
 0xd70   : > { %v14842_v38 = vadd.f32 %v8133_v7, %v15534_v10  ;;  %v11258_v60 = vpop.f32.mrb[84].mxu1 }
 0xd71   : > { %v7942_v46 = vpop.f32.mrb[85].mxu1  ;;  %v14854_v5 = vadd.f32 %v11258_v60, %v15537_v51 }
 0xd72   : > { %8241 = vadd.xlane.f32.xlu0 %v8240_v49  ;;  %v8134_v6 = vcombine.high %v7942_v46, %v7942_v46  ;;  %v14849_v54 = vadd.f32 %v7942_v46, %v15536_v29  ;;  %v8207_v53 = vcombine.low %v14839_v26, %v14842_v38 }
 0xd74   : > { %v14857_v48 = vadd.f32 %v8134_v6, %v15538_v24  ;;  %v8243_v61 = vsel %vm411_vm1, %v8207_v53, 0.0  ;;  %v8208_v62 = vcombine.low %v14846_v16, %v14849_v54 }
 0xd75   : > { %8244 = vadd.xlane.f32.xlu1 %v8243_v61 }
 0xd76   : > { %v11265_v13 = vpop.f32.mrb[86].mxu0  ;;  %v8246_v40 = vsel %vm411_vm1, %v8208_v62, 0.0  ;;  %v8209_v25 = vcombine.low %v14857_v48, %v14854_v5 }
 0xd77   : > { %8247 = vadd.xlane.f32.xlu0 %v8246_v40  ;;  %v8027_v57 = vpop.f32.mrb[87].mxu0  ;;  %v14873_v4 = vadd.f32 %v11265_v13, %v15541_v32 }
 0xd78   : > { %v8135_v45 = vcombine.high %v8027_v57, %v8027_v57  ;;  %v8249_v55 = vsel %vm411_vm1, %v8209_v25, 0.0  ;;  %v14867_v31 = vadd.f32 %v8027_v57, %v15539_v14 }
 0xd79   : > { %8250 = vadd.xlane.f32.xlu1 %v8249_v55 }
 0xd7a   : > { %v14870_v23 = vadd.f32 %v8135_v45, %v15540_v33  ;;  %v11272_v28 = vpop.f32.mrb[86].mxu1 }
 0xd7b   : > { %v8112_v43 = vpop.f32.mrb[87].mxu1  ;;  %v14881_v36 = vadd.f32 %v11272_v28, %v15543_v9 }
 0xd7c   : > { %v8136_v2 = vcombine.high %v8112_v43, %v8112_v43  ;;  %v14876_v0 = vadd.f32 %v8112_v43, %v15542_v15  ;;  %v8210_v12 = vcombine.low %v14867_v31, %v14870_v23 }
 0xd7e   : > { %v14884_v52 = vadd.f32 %v8136_v2, %v15544_v42  ;;  %v8252_v22 = vsel %vm411_vm1, %v8210_v12, 0.0  ;;  %v8211_v35 = vcombine.low %v14873_v4, %v14876_v0 }
 0xd7f   : > { %8253 = vadd.xlane.f32.xlu0 %v8252_v22 }
 0xd80   : > { %v8255_v17 = vsel %vm411_vm1, %v8211_v35, 0.0  ;;  %v8212_v18 = vcombine.low %v14884_v52, %v14881_v36 }
 0xd81   : > { %8256 = vadd.xlane.f32.xlu1 %v8255_v17 }
 0xd82   : > { %v8258_v19 = vsel %vm411_vm1, %v8212_v18, 0.0 }
 0xd83   : > { %8259 = vadd.xlane.f32.xlu0 %v8258_v19 }
 0xdef   : > { %v8230_v63 = vpop.xlane.xlu0 %8229 }
 0xdf0   : > { %v8262_v1 = vmul.f32 0.03125, %v8230_v63 }
 0xdf2   : > { %v8305_v34 = vrot.slane %v8262_v1, %v15545_v39  ;;  %v8312_v7 = vrot.slane %v8262_v1, %v15546_v37  ;;  %v8227_v30 = vpop.xlane.xlu1 %8226 }
 0xdf3   : > { %v8261_v10 = vmul.f32 0.03125, %v8227_v30 }
 0xdf4   : > { %v14896_v60 = vsub.f32 %v14789_v20, %v8305_v34  ;;  %v14899_v49 = vsub.f32 %v14786_v58, %v8312_v7 }
 0xdf5   : > { %v8291_v46 = vrot.slane %v8261_v10, %v15545_v39  ;;  %v8298_v27 = vrot.slane %v8261_v10, %v15546_v37 }
 0xdf6   : > { %v8233_v6 = vpop.xlane.xlu1 %8232  ;;  %v8503_v29 = vmul.f32 %v14896_v60, %v14896_v60  ;;  %v8504_v53 = vmul.f32 %v14899_v49, %v14899_v49 }
 0xdf7   : > { %v14908_v51 = vsub.f32 %v14797_v44, %v8291_v46  ;;  %v14911_v20 = vsub.f32 %v14800_v3, %v8298_v27  ;;  %v8263_v24 = vmul.f32 0.03125, %v8233_v6 }
 0xdf8   : > { %v8550_v58 = vcombine.low %v8503_v29, %v8504_v53 }
 0xdf9   : > { %v8319_v61 = vrot.slane %v8263_v24, %v15545_v39  ;;  %v8326_v62 = vrot.slane %v8263_v24, %v15546_v37  ;;  %v8501_v13 = vmul.f32 %v14908_v51, %v14908_v51  ;;  %v8502_v40 = vmul.f32 %v14911_v20, %v14911_v20 }
 0xdfa   : > { %v8239_v25 = vpop.xlane.xlu1 %8238  ;;  %v8576_v57 = vsel %vm411_vm1, %v8550_v58, 0.0 }
 0xdfb   : > { %v14921_v44 = vsub.f32 %v14794_v59, %v8319_v61  ;;  %v14924_v3 = vsub.f32 %v14804_v56, %v8326_v62  ;;  %v8236_v45 = vpop.xlane.xlu0 %8235  ;;  %v8265_v55 = vmul.f32 0.03125, %v8239_v25  ;;  %8577 = vadd.xlane.f32.xlu0 %v8576_v57  ;;  %v8549_v14 = vcombine.low %v8501_v13, %v8502_v40 }
 0xdfc   : > { %v8264_v33 = vmul.f32 0.03125, %v8236_v45 }
 0xdfd   : > { %v8347_v28 = vrot.slane %v8265_v55, %v15545_v39  ;;  %v8354_v43 = vrot.slane %v8265_v55, %v15546_v37  ;;  %v8573_v32 = vsel %vm411_vm1, %v8549_v14, 0.0  ;;  %v8505_v2 = vmul.f32 %v14921_v44, %v14921_v44 }
 0xdfe   : > { %v8333_v59 = vrot.slane %v8264_v33, %v15545_v39  ;;  %v8340_v15 = vrot.slane %v8264_v33, %v15546_v37  ;;  %8574 = vadd.xlane.f32.xlu1 %v8573_v32  ;;  %v8506_v56 = vmul.f32 %v14924_v3, %v14924_v3 }
 0xdff   : > { %v14936_v12 = vsub.f32 %v14815_v8, %v8347_v28  ;;  %v14939_v9 = vsub.f32 %v14812_v21, %v8354_v43  ;;  %v8242_v42 = vpop.xlane.xlu0 %8241 }
 0xe00   : > { %v14942_v22 = vsub.f32 %v14824_v41, %v8333_v59  ;;  %v14945_v35 = vsub.f32 %v14827_v50, %v8340_v15  ;;  %v8266_v17 = vmul.f32 0.03125, %v8242_v42  ;;  %v8551_v18 = vcombine.low %v8505_v2, %v8506_v56 }
 0xe01   : > { %v8509_v19 = vmul.f32 %v14936_v12, %v14936_v12  ;;  %v8510_v63 = vmul.f32 %v14939_v9, %v14939_v9 }
 0xe02   : > { %v8361_v8 = vrot.slane %v8266_v17, %v15545_v39  ;;  %v8368_v21 = vrot.slane %v8266_v17, %v15546_v37  ;;  %v8579_v1 = vsel %vm411_vm1, %v8551_v18, 0.0  ;;  %v8245_v34 = vpop.xlane.xlu1 %8244  ;;  %v8507_v41 = vmul.f32 %v14942_v22, %v14942_v22 }
 0xe03   : > { %8580 = vadd.xlane.f32.xlu1 %v8579_v1  ;;  %v8267_v50 = vmul.f32 0.03125, %v8245_v34  ;;  %v8508_v7 = vmul.f32 %v14945_v35, %v14945_v35  ;;  %v8553_v30 = vcombine.low %v8509_v19, %v8510_v63 }
 0xe04   : > { %v14959_v10 = vsub.f32 %v14821_v11, %v8361_v8  ;;  %v14962_v46 = vsub.f32 %v14830_v47, %v8368_v21  ;;  %v8248_v27 = vpop.xlane.xlu0 %8247 }
 0xe05   : > { %v8375_v6 = vrot.slane %v8267_v50, %v15545_v39  ;;  %v8382_v29 = vrot.slane %v8267_v50, %v15546_v37  ;;  %v8268_v53 = vmul.f32 0.03125, %v8248_v27  ;;  %v8552_v24 = vcombine.low %v8507_v41, %v8508_v7 }
 0xe06   : > { %v8585_v58 = vsel %vm411_vm1, %v8553_v30, 0.0  ;;  %v8251_v61 = vpop.xlane.xlu1 %8250  ;;  %v8511_v62 = vmul.f32 %v14959_v10, %v14959_v10  ;;  %v8512_v11 = vmul.f32 %v14962_v46, %v14962_v46 }
 0xe07   : > { %v14972_v13 = vsub.f32 %v14839_v26, %v8375_v6  ;;  %v14975_v47 = vsub.f32 %v14842_v38, %v8382_v29  ;;  %v8389_v40 = vrot.slane %v8268_v53, %v15545_v39  ;;  %v8396_v25 = vrot.slane %v8268_v53, %v15546_v37  ;;  %8586 = vadd.xlane.f32.xlu1 %v8585_v58 }
 0xe08   : > { %v8582_v57 = vsel %vm411_vm1, %v8552_v24, 0.0  ;;  %v8269_v45 = vmul.f32 0.03125, %v8251_v61  ;;  %v8554_v55 = vcombine.low %v8511_v62, %v8512_v11 }
 0xe09   : > { %v14981_v14 = vsub.f32 %v14846_v16, %v8389_v40  ;;  %v14984_v33 = vsub.f32 %v14849_v54, %v8396_v25  ;;  %8583 = vadd.xlane.f32.xlu0 %v8582_v57  ;;  %v8513_v26 = vmul.f32 %v14972_v13, %v14972_v13  ;;  %v8514_v38 = vmul.f32 %v14975_v47, %v14975_v47 }
 0xe0a   : > { %v8403_v28 = vrot.slane %v8269_v45, %v15545_v39  ;;  %v8410_v43 = vrot.slane %v8269_v45, %v15546_v37  ;;  %v8588_v32 = vsel %vm411_vm1, %v8554_v55, 0.0 }
 0xe0b   : > { %v8555_v2 = vcombine.low %v8513_v26, %v8514_v38  ;;  %v8515_v16 = vmul.f32 %v14981_v14, %v14981_v14  ;;  %v8516_v54 = vmul.f32 %v14984_v33, %v14984_v33 }
 0xe0c   : > { %v14998_v59 = vsub.f32 %v14857_v48, %v8403_v28  ;;  %v15001_v15 = vsub.f32 %v14854_v5, %v8410_v43  ;;  %v8254_v56 = vpop.xlane.xlu0 %8253  ;;  %v9927_v28 = vld [vmem:[%s15472_s3 + $0x88] sm:$0xff] }
 0xe0d   : > { %8589 = vadd.xlane.f32.xlu0 %v8588_v32  ;;  %v8270_v42 = vmul.f32 0.03125, %v8254_v56  ;;  %v8591_v17 = vsel %vm411_vm1, %v8555_v2, 0.0  ;;  %v8556_v18 = vcombine.low %v8515_v16, %v8516_v54  ;;  %v9928_v32 = vld [vmem:[%s15472_s3 + $0x90] sm:$0xff]  ;;  %v9929_v2 = vld [vmem:[%s15472_s3 + $0x98] sm:$0xff]  ;;  %v9930_v54 = vld [vmem:[%s15472_s3 + $0xa0] sm:$0xff] }
 0xe0e   : > { %8592 = vadd.xlane.f32.xlu1 %v8591_v17  ;;  %v8257_v19 = vpop.xlane.xlu1 %8256  ;;  %v8517_v63 = vmul.f32 %v14998_v59, %v14998_v59  ;;  %v8518_v8 = vmul.f32 %v15001_v15, %v15001_v15  ;;  %v11809_v16 = vpack.c.bf16 %v9929_v2, %v9928_v32  ;;  %v9931_v56 = vld [vmem:[%s15472_s3 + $0xa8] sm:$0xff] }
 0xe0f   : > { %v8417_v48 = vrot.slane %v8270_v42, %v15545_v39  ;;  %v8424_v21 = vrot.slane %v8270_v42, %v15546_v37  ;;  %v8271_v5 = vmul.f32 0.03125, %v8257_v19  ;;  %v8594_v1 = vsel %vm411_vm1, %v8556_v18, 0.0 }
 0xe10   : > { %v8260_v34 = vpop.xlane.xlu0 %8259  ;;  %v8557_v41 = vcombine.low %v8517_v63, %v8518_v8  ;;  %v11813_v42 = vpack.c.bf16 %v9931_v56, %v9930_v54 }
 0xe11   : > { %v15012_v50 = vsub.f32 %v14867_v31, %v8417_v48  ;;  %v15015_v7 = vsub.f32 %v14870_v23, %v8424_v21  ;;  %v8431_v30 = vrot.slane %v8271_v5, %v15545_v39  ;;  %v8438_v27 = vrot.slane %v8271_v5, %v15546_v37  ;;  %8595 = vadd.xlane.f32.xlu0 %v8594_v1 }
 0xe12   : > { %v8272_v6 = vmul.f32 0.03125, %v8260_v34  ;;  %v8597_v29 = vsel %vm411_vm1, %v8557_v41, 0.0  ;;  %11814 = vmatprep.subr.bf16.mxu1 %v11813_v42  ;;  %v15070_v41 = vld [vmem:[%s15473_s4 + $0x8] sm:$0x7f] }
 0xe13   : > { %v15021_v53 = vsub.f32 %v14873_v4, %v8431_v30  ;;  %v15024_v24 = vsub.f32 %v14876_v0, %v8438_v27  ;;  %8598 = vadd.xlane.f32.xlu1 %v8597_v29  ;;  %v8519_v31 = vmul.f32 %v15012_v50, %v15012_v50  ;;  %v8520_v23 = vmul.f32 %v15015_v7, %v15015_v7  ;;  %v15547_v30 = vld [vmem:[#allocation2_spill] sm:$0xff] }
 0xe14   : > { %v8445_v58 = vrot.slane %v8272_v6, %v15545_v39  ;;  %v8452_v61 = vrot.slane %v8272_v6, %v15546_v37  ;;  %11816 = vmatpush3.bf16.msra.mxu1 %v11813_v42  ;;  %v15548_v27 = vsub.s32 3, %v15547_v30 }
 0xe15   : > { %v8558_v62 = vcombine.low %v8519_v31, %v8520_v23  ;;  %v8521_v11 = vmul.f32 %v15021_v53, %v15021_v53  ;;  %v8522_v4 = vmul.f32 %v15024_v24, %v15024_v24  ;;  %v15549_v23 = vsub.s32 4, %v15547_v30 }
 0xe16   : > { %v15037_v0 = vsub.f32 %v14884_v52, %v8445_v58  ;;  %v15040_v40 = vsub.f32 %v14881_v36, %v8452_v61  ;;  %v9926_v36 = vld [vmem:[%s15472_s3 + $0x80] sm:$0xff]  ;;  %v15075_v6 = vrot.slane %v15070_v41, %v15548_v27 }
 0xe17   : > { %v8600_v25 = vsel %vm411_vm1, %v8558_v62, 0.0  ;;  %v8559_v57 = vcombine.low %v8521_v11, %v8522_v4  ;;  %v11805_v43 = vpack.c.bf16 %v9927_v28, %v9926_v36  ;;  %v15080_v58 = vrot.slane %v15070_v41, %v15549_v23 }
 0xe18   : > { %8601 = vadd.xlane.f32.xlu0 %v8600_v25  ;;  %v8523_v45 = vmul.f32 %v15037_v0, %v15037_v0  ;;  %v8524_v55 = vmul.f32 %v15040_v40, %v15040_v40 }
 0xe19   : > { %v8603_v26 = vsel %vm411_vm1, %v8559_v57, 0.0  ;;  %11806 = vmatprep.subr.bf16.mxu0 %v11805_v43  ;;  %v15086_v57 = vcombine.high %v15075_v6, %v15075_v6  ;;  %v15092_v36 = vcombine.high %v15080_v58, %v15080_v58 }
 0xe1a   : > { %8604 = vadd.xlane.f32.xlu1 %v8603_v26  ;;  %v8560_v38 = vcombine.low %v8523_v45, %v8524_v55  ;;  %11808 = vmatpush3.bf16.msra.mxu0 %v11805_v43 }
 0xe1b   : > { %11810 = vmatprep.subr.bf16.mxu0 %v11809_v16 }
 0xe1c   : > { %v8606_v52 = vsel %vm411_vm1, %v8560_v38, 0.0 }
 0xe1d   : > { %8607 = vadd.xlane.f32.xlu0 %v8606_v52 }
 0xe1e   : > { %11812 = vmatpush3.bf16.msra.mxu0 %v11809_v16 }
 0xe88   : > { %v8578_v17 = vpop.xlane.xlu0 %8577 }
 0xe89   : > { %v8610_v18 = vmul.f32 0.03125, %v8578_v17 }
 0xe8b   : > { %v8622_v19 = vadd.f32 1e-05, %v8610_v18  ;;  %v8575_v63 = vpop.xlane.xlu1 %8574 }
 0xe8c   : > { %v8609_v8 = vmul.f32 0.03125, %v8575_v63 }
 0xe8d   : > { %12162 = vrsqrt.f32 %v8622_v19 }
 0xe8e   : > { %v8621_v48 = vadd.f32 1e-05, %v8609_v8 }
 0xe90   : > { %12164 = vrsqrt.f32 %v8621_v48  ;;  %v8581_v21 = vpop.xlane.xlu1 %8580 }
 0xe91   : > { %v8611_v5 = vmul.f32 0.03125, %v8581_v21 }
 0xe93   : > { %v8623_v1 = vadd.f32 1e-05, %v8611_v5 }
 0xe94   : > { %v8587_v34 = vpop.xlane.xlu1 %8586 }
 0xe95   : > { %12166 = vrsqrt.f32 %v8623_v1  ;;  %v8613_v29 = vmul.f32 0.03125, %v8587_v34 }
 0xe96   : > { %v8584_v31 = vpop.xlane.xlu0 %8583 }
 0xe97   : > { %v12163_v61 = vpop.eup %12162  ;;  %v8612_v62 = vmul.f32 0.03125, %v8584_v31  ;;  %v8625_v11 = vadd.f32 1e-05, %v8613_v29 }
 0xe98   : > { %v8677_v4 = vrot.slane %v12163_v61, %v15545_v39  ;;  %v8684_v25 = vrot.slane %v12163_v61, %v15546_v37 }
 0xe99   : > { %v8624_v45 = vadd.f32 1e-05, %v8612_v62  ;;  %12168 = vrsqrt.f32 %v8625_v11 }
 0xe9a   : > { %v12165_v55 = vpop.eup %12164  ;;  %v8851_v26 = vmul.f32 %v8677_v4, %v14896_v60  ;;  %v8852_v38 = vmul.f32 %v8684_v25, %v14899_v49  ;;  %v8590_v52 = vpop.xlane.xlu0 %8589 }
 0xe9b   : > { %v8663_v28 = vrot.slane %v12165_v55, %v15545_v39  ;;  %v8670_v43 = vrot.slane %v12165_v55, %v15546_v37  ;;  %12170 = vrsqrt.f32 %v8624_v45  ;;  %v8614_v32 = vmul.f32 0.03125, %v8590_v52  ;;  %v8593_v2 = vpop.xlane.xlu1 %8592 }
 0xe9c   : > { %v8615_v16 = vmul.f32 0.03125, %v8593_v2  ;;  %v8882_v54 = vmul.f32 %v15075_v6, %v8851_v26  ;;  %v8883_v56 = vmul.f32 %v15086_v57, %v8852_v38 }
 0xe9d   : > { %v8626_v60 = vadd.f32 1e-05, %v8614_v32  ;;  %v8849_v49 = vmul.f32 %v8663_v28, %v14908_v51  ;;  %v8850_v42 = vmul.f32 %v8670_v43, %v14911_v20 }
 0xe9e   : > { %v8627_v17 = vadd.f32 1e-05, %v8615_v16  ;;  %v8596_v18 = vpop.xlane.xlu0 %8595  ;;  %v8913_v19 = vadd.f32 %v15080_v58, %v8882_v54  ;;  %v8914_v63 = vadd.f32 %v15092_v36, %v8883_v56 }
 0xe9f   : > { %v12167_v8 = vpop.eup %12166  ;;  %12172 = vrsqrt.f32 %v8626_v60  ;;  %v8616_v48 = vmul.f32 0.03125, %v8596_v18  ;;  %v8880_v21 = vmul.f32 %v15075_v6, %v8849_v49  ;;  %v8881_v5 = vmul.f32 %v15086_v57, %v8850_v42 }
 0xea0   : > { %v8691_v1 = vrot.slane %v12167_v8, %v15545_v39  ;;  %v8698_v34 = vrot.slane %v12167_v8, %v15546_v37  ;;  %12174 = vrsqrt.f32 %v8627_v17  ;;  %v8599_v51 = vpop.xlane.xlu1 %8598  ;;  %v15112_v25 = vcombine.low %v8913_v19, %v8914_v63 }
 0xea1   : > { %v8628_v20 = vadd.f32 1e-05, %v8616_v48  ;;  %v8617_v27 = vmul.f32 0.03125, %v8599_v51  ;;  %v8911_v29 = vadd.f32 %v15080_v58, %v8880_v21  ;;  %v8912_v31 = vadd.f32 %v15092_v36, %v8881_v5 }
 0xea2   : > { %v8853_v23 = vmul.f32 %v8691_v1, %v14921_v44  ;;  %v8854_v61 = vmul.f32 %v8698_v34, %v14924_v3 }
 0xea3   : > { %v12169_v62 = vpop.eup %12168  ;;  %12176 = vrsqrt.f32 %v8628_v20  ;;  %v8629_v11 = vadd.f32 1e-05, %v8617_v27  ;;  %v15110_v4 = vcombine.low %v8911_v29, %v8912_v31 }
 0xea4   : > { %v8719_v45 = vrot.slane %v12169_v62, %v15545_v39  ;;  %v8726_v55 = vrot.slane %v12169_v62, %v15546_v37  ;;  %v8884_v26 = vmul.f32 %v15075_v6, %v8853_v23  ;;  %v8885_v38 = vmul.f32 %v15086_v57, %v8854_v61 }
 0xea5   : > { %v12171_v52 = vpop.eup %12170  ;;  %12178 = vrsqrt.f32 %v8629_v11  ;;  %11281 = vmatprep.mubr.msk.f32.mxu0 %vm411_vm1, %v15110_v4  ;;  %v8602_v44 = vpop.xlane.xlu0 %8601 }
 0xea6   : > { %v8705_v3 = vrot.slane %v12171_v52, %v15545_v39  ;;  %v8712_v28 = vrot.slane %v12171_v52, %v15546_v37  ;;  %v8618_v43 = vmul.f32 0.03125, %v8602_v44  ;;  %11282 = vmatmul.mubr.msk.f32.vlgmr.msra.gmra.mrb[88].mxu0 %vm411_vm1, %v15112_v25  ;;  %v8915_v32 = vadd.f32 %v15080_v58, %v8884_v26 }
 0xea7   : > { %v8605_v2 = vpop.xlane.xlu1 %8604  ;;  %v8916_v16 = vadd.f32 %v15092_v36, %v8885_v38  ;;  %v8857_v54 = vmul.f32 %v8719_v45, %v14936_v12  ;;  %v8858_v56 = vmul.f32 %v8726_v55, %v14939_v9 }
 0xea8   : > { %v8630_v60 = vadd.f32 1e-05, %v8618_v43  ;;  %v8619_v49 = vmul.f32 0.03125, %v8605_v2  ;;  %v8855_v42 = vmul.f32 %v8705_v3, %v14942_v22  ;;  %v8856_v17 = vmul.f32 %v8712_v28, %v14945_v35 }
 0xea9   : > { %v12173_v18 = vpop.eup %12172  ;;  %v15130_v19 = vcombine.low %v8915_v32, %v8916_v16  ;;  %v8888_v63 = vmul.f32 %v15075_v6, %v8857_v54  ;;  %v8889_v8 = vmul.f32 %v15086_v57, %v8858_v56 }
 0xeaa   : > { %v12175_v48 = vpop.eup %12174  ;;  %v8733_v21 = vrot.slane %v12173_v18, %v15545_v39  ;;  %v8740_v12 = vrot.slane %v12173_v18, %v15546_v37  ;;  %12180 = vrsqrt.f32 %v8630_v60  ;;  %v8631_v9 = vadd.f32 1e-05, %v8619_v49  ;;  %v8608_v5 = vpop.xlane.xlu0 %8607 }
 0xeab   : > { %v8747_v1 = vrot.slane %v12175_v48, %v15545_v39  ;;  %v8754_v22 = vrot.slane %v12175_v48, %v15546_v37  ;;  %11284 = vmatprep.mubr.msk.f32.mxu0 %vm411_vm1, %v15130_v19  ;;  %v8620_v35 = vmul.f32 0.03125, %v8608_v5  ;;  %v8886_v34 = vmul.f32 %v15075_v6, %v8855_v42 }
 0xeac   : > { %12182 = vrsqrt.f32 %v8631_v9  ;;  %v8887_v51 = vmul.f32 %v15086_v57, %v8856_v17  ;;  %v8919_v20 = vadd.f32 %v15080_v58, %v8888_v63  ;;  %v8920_v27 = vadd.f32 %v15092_v36, %v8889_v8 }
 0xead   : > { %v12177_v29 = vpop.eup %12176  ;;  %v8632_v31 = vadd.f32 1e-05, %v8620_v35  ;;  %v8917_v23 = vadd.f32 %v15080_v58, %v8886_v34  ;;  %v8859_v61 = vmul.f32 %v8733_v21, %v14959_v10  ;;  %v8860_v62 = vmul.f32 %v8740_v12, %v14962_v46 }
 0xeae   : > { %v8761_v11 = vrot.slane %v12177_v29, %v15545_v39  ;;  %v8768_v45 = vrot.slane %v12177_v29, %v15546_v37  ;;  %v8918_v55 = vadd.f32 %v15092_v36, %v8887_v51  ;;  %v15150_v26 = vcombine.low %v8919_v20, %v8920_v27 }
 0xeaf   : > { %v12179_v38 = vpop.eup %12178  ;;  %12184 = vrsqrt.f32 %v8632_v31  ;;  %v8890_v52 = vmul.f32 %v15075_v6, %v8859_v61  ;;  %v8891_v44 = vmul.f32 %v15086_v57, %v8860_v62  ;;  %v8861_v3 = vmul.f32 %v8747_v1, %v14972_v13 }
 0xeb0   : > { %v8775_v10 = vrot.slane %v12179_v38, %v15545_v39  ;;  %v8782_v46 = vrot.slane %v12179_v38, %v15546_v37  ;;  %v15157_v28 = vcombine.low %v8917_v23, %v8918_v55  ;;  %v8862_v43 = vmul.f32 %v8754_v22, %v14975_v47 }
 0xeb1   : > { %v8921_v32 = vadd.f32 %v15080_v58, %v8890_v52  ;;  %v8922_v2 = vadd.f32 %v15092_v36, %v8891_v44  ;;  %v8892_v16 = vmul.f32 %v15075_v6, %v8861_v3  ;;  %v8863_v54 = vmul.f32 %v8761_v11, %v14981_v14 }
 0xeb2   : > { %11285 = vmatmul.mubr.msk.f32.gmra.mrb[90].mxu0 %vm411_vm1, %v15157_v28  ;;  %v8893_v13 = vmul.f32 %v15086_v57, %v8862_v43  ;;  %v8864_v56 = vmul.f32 %v8768_v45, %v14984_v33  ;;  %v8865_v60 = vmul.f32 %v8775_v10, %v14998_v59  ;;  %v8866_v49 = vmul.f32 %v8782_v46, %v15001_v15 }
 0xeb3   : > { %11287 = vmatprep.mubr.msk.f32.mxu0 %vm411_vm1, %v15150_v26  ;;  %v15172_v47 = vcombine.low %v8921_v32, %v8922_v2  ;;  %v8923_v42 = vadd.f32 %v15080_v58, %v8892_v16  ;;  %v8894_v14 = vmul.f32 %v15075_v6, %v8863_v54 }
 0xeb4   : > { %v12181_v17 = vpop.eup %12180  ;;  %v8924_v18 = vadd.f32 %v15092_v36, %v8893_v13  ;;  %v8895_v63 = vmul.f32 %v15086_v57, %v8864_v56  ;;  %v8896_v33 = vmul.f32 %v15075_v6, %v8865_v60  ;;  %v8897_v59 = vmul.f32 %v15086_v57, %v8866_v49 }
 0xeb5   : > { %v8789_v15 = vrot.slane %v12181_v17, %v15545_v39  ;;  %v8796_v8 = vrot.slane %v12181_v17, %v15546_v37  ;;  %v8925_v48 = vadd.f32 %v15080_v58, %v8894_v14 }
 0xeb6   : > { %v12183_v21 = vpop.eup %12182  ;;  %11288 = vmatmul.mubr.msk.f32.gmra.mrb[92].mxu0 %vm411_vm1, %v15172_v47  ;;  %v15185_v12 = vcombine.low %v8923_v42, %v8924_v18  ;;  %v8926_v9 = vadd.f32 %v15092_v36, %v8895_v63  ;;  %v8927_v5 = vadd.f32 %v15080_v58, %v8896_v33  ;;  %v8928_v1 = vadd.f32 %v15092_v36, %v8897_v59 }
 0xeb7   : > { %v8803_v22 = vrot.slane %v12183_v21, %v15545_v39  ;;  %v8810_v35 = vrot.slane %v12183_v21, %v15546_v37  ;;  %v8867_v34 = vmul.f32 %v8789_v15, %v15012_v50  ;;  %v8868_v51 = vmul.f32 %v8796_v8, %v15015_v7 }
 0xeb8   : > { %11290 = vmatprep.mubr.msk.f32.mxu0 %vm411_vm1, %v15185_v12  ;;  %v15196_v20 = vcombine.low %v8925_v48, %v8926_v9  ;;  %v15198_v27 = vcombine.low %v8927_v5, %v8928_v1 }
 0xeb9   : > { %v12185_v29 = vpop.eup %12184  ;;  %v8898_v31 = vmul.f32 %v15075_v6, %v8867_v34  ;;  %v8899_v23 = vmul.f32 %v15086_v57, %v8868_v51  ;;  %v8869_v61 = vmul.f32 %v8803_v22, %v15021_v53  ;;  %v8870_v62 = vmul.f32 %v8810_v35, %v15024_v24 }
 0xeba   : > { %v8817_v50 = vrot.slane %v12185_v29, %v15545_v39  ;;  %v8824_v7 = vrot.slane %v12185_v29, %v15546_v37  ;;  %11291 = vmatmul.mubr.msk.f32.gmra.mrb[94].mxu0 %vm411_vm1, %v15196_v20 }
 0xebb   : > { %11293 = vmatprep.mubr.msk.f32.mxu0 %vm411_vm1, %v15198_v27  ;;  %v8929_v11 = vadd.f32 %v15080_v58, %v8898_v31  ;;  %v8930_v45 = vadd.f32 %v15092_v36, %v8899_v23  ;;  %v8900_v55 = vmul.f32 %v15075_v6, %v8869_v61  ;;  %v8901_v53 = vmul.f32 %v15086_v57, %v8870_v62 }
 0xebc   : > { %v8871_v24 = vmul.f32 %v8817_v50, %v15037_v0  ;;  %v8872_v39 = vmul.f32 %v8824_v7, %v15040_v40 }
 0xebd   : > { %v15216_v38 = vcombine.low %v8929_v11, %v8930_v45  ;;  %v8931_v37 = vadd.f32 %v15080_v58, %v8900_v55  ;;  %v8932_v52 = vadd.f32 %v15092_v36, %v8901_v53  ;;  %v15551_v53 = vsub.s32 2, %v15547_v30 }
 0xebe   : > { %v8902_v44 = vmul.f32 %v15075_v6, %v8871_v24  ;;  %v8903_v3 = vmul.f32 %v15086_v57, %v8872_v39  ;;  %v9932_v6 = vld [vmem:[%s15472_s3 + $0xb0] sm:$0xff]  ;;  %v9933_v57 = vld [vmem:[%s15472_s3 + $0xb8] sm:$0xff] }
 0xebf   : > { %11294 = vmatmul.mubr.msk.f32.gmra.mrb[96].mxu0 %vm411_vm1, %v15216_v38  ;;  %v15224_v10 = vcombine.low %v8931_v37, %v8932_v52  ;;  %v11817_v43 = vpack.c.bf16 %v9933_v57, %v9932_v6  ;;  %v9139_v24 = vrot.slane %v15070_v41, %v15551_v53 }
 0xec0   : > { %v8933_v46 = vadd.f32 %v15080_v58, %v8902_v44  ;;  %v8934_v0 = vadd.f32 %v15092_v36, %v8903_v3  ;;  %v15550_v58 = vsub.s32 1, %v15547_v30 }
 0xec1   : > { %11296 = vmatprep.mubr.msk.f32.mxu0 %vm411_vm1, %v15224_v10  ;;  %11818 = vmatprep.subr.bf16.mxu1 %v11817_v43 }
 0xec2   : > { %v15230_v40 = vcombine.low %v8933_v46, %v8934_v0  ;;  %11820 = vmatpush3.bf16.msra.mxu1 %v11817_v43  ;;  %v8938_v36 = vrot.slane %v15070_v41, %v15550_v58 }
 0xec4   : > { %11297 = vmatmul.mubr.msk.f32.gmra.mrb[98].mxu0 %vm411_vm1, %v15230_v40 }
 0xf79   : > { %v11283_v32 = vpop.f32.mrb[88].mxu0 }
 0xf7a   : > { %v9071_v2 = vadd.f32 %v11283_v32, %v8938_v36  ;;  %v9065_v16 = vpop.f32.mrb[89].mxu0 }
 0xf7b   : > { %v9066_v54 = vadd.f32 %v9065_v16, %v8938_v36 }
 0xf7c   : > { %v9125_v56 = vmax.f32 %v9071_v2, 0.0 }
 0xf7d   : > { %v9124_v13 = vmax.f32 %v9066_v54, 0.0 }
 0xf7f   : > { %11307 = vmatprep.mubr.msk.f32.mxu1 %vm411_vm1, %v9124_v13 }
 0xf80   : > { %11308 = vmatmul.mubr.msk.f32.vlgmr.msra.gmra.mrb[88].mxu1 %vm411_vm1, %v9125_v56 }
 0xf85   : > { %v11286_v60 = vpop.f32.mrb[90].mxu0 }
 0xf86   : > { %v9081_v49 = vadd.f32 %v11286_v60, %v8938_v36  ;;  %v9075_v42 = vpop.f32.mrb[91].mxu0 }
 0xf87   : > { %v9076_v14 = vadd.f32 %v9075_v42, %v8938_v36 }
 0xf88   : > { %v9127_v63 = vmax.f32 %v9081_v49, 0.0 }
 0xf89   : > { %v9126_v17 = vmax.f32 %v9076_v14, 0.0  ;;  %v11289_v18 = vpop.f32.mrb[92].mxu0 }
 0xf8a   : > { %v9091_v33 = vadd.f32 %v11289_v18, %v8938_v36  ;;  %v9085_v59 = vpop.f32.mrb[93].mxu0 }
 0xf8b   : > { %v9086_v15 = vadd.f32 %v9085_v59, %v8938_v36  ;;  %11310 = vmatprep.mubr.msk.f32.mxu1 %vm411_vm1, %v9126_v17 }
 0xf8c   : > { %11311 = vmatmul.mubr.msk.f32.gmra.mrb[90].mxu1 %vm411_vm1, %v9127_v63  ;;  %v9129_v21 = vmax.f32 %v9091_v33, 0.0 }
 0xf8d   : > { %v9128_v8 = vmax.f32 %v9086_v15, 0.0  ;;  %v11292_v48 = vpop.f32.mrb[94].mxu0 }
 0xf8e   : > { %v9101_v9 = vadd.f32 %v11292_v48, %v8938_v36  ;;  %v9095_v5 = vpop.f32.mrb[95].mxu0 }
 0xf8f   : > { %11313 = vmatprep.mubr.msk.f32.mxu1 %vm411_vm1, %v9128_v8  ;;  %v9096_v1 = vadd.f32 %v9095_v5, %v8938_v36 }
 0xf90   : > { %11314 = vmatmul.mubr.msk.f32.gmra.mrb[92].mxu1 %vm411_vm1, %v9129_v21  ;;  %v9131_v35 = vmax.f32 %v9101_v9, 0.0 }
 0xf91   : > { %v9130_v22 = vmax.f32 %v9096_v1, 0.0 }
 0xf92   : > { %v11295_v34 = vpop.f32.mrb[96].mxu0 }
 0xf93   : > { %11316 = vmatprep.mubr.msk.f32.mxu1 %vm411_vm1, %v9130_v22  ;;  %v9111_v51 = vadd.f32 %v11295_v34, %v8938_v36  ;;  %v9105_v29 = vpop.f32.mrb[97].mxu0 }
 0xf94   : > { %11317 = vmatmul.mubr.msk.f32.gmra.mrb[94].mxu1 %vm411_vm1, %v9131_v35  ;;  %v9106_v31 = vadd.f32 %v9105_v29, %v8938_v36 }
 0xf95   : > { %v9133_v61 = vmax.f32 %v9111_v51, 0.0 }
 0xf96   : > { %v9132_v23 = vmax.f32 %v9106_v31, 0.0 }
 0xf97   : > { %v11298_v62 = vpop.f32.mrb[98].mxu0 }
 0xf98   : > { %v9121_v50 = vadd.f32 %v11298_v62, %v8938_v36  ;;  %v9115_v7 = vpop.f32.mrb[99].mxu0  ;;  %11319 = vmatprep.mubr.msk.f32.mxu1 %vm411_vm1, %v9132_v23 }
 0xf99   : > { %v9116_v11 = vadd.f32 %v9115_v7, %v8938_v36  ;;  %11320 = vmatmul.mubr.msk.f32.gmra.mrb[96].mxu1 %vm411_vm1, %v9133_v61 }
 0xf9a   : > { %v9135_v55 = vmax.f32 %v9121_v50, 0.0 }
 0xf9b   : > { %v9134_v45 = vmax.f32 %v9116_v11, 0.0 }
 0xf9d   : > { %11322 = vmatprep.mubr.msk.f32.mxu1 %vm411_vm1, %v9134_v45 }
 0xf9e   : > { %11323 = vmatmul.mubr.msk.f32.gmra.mrb[98].mxu1 %vm411_vm1, %v9135_v55 }
0x1053   : > { %v11309_v39 = vpop.f32.mrb[88].mxu1 }
0x1054   : > { %v9248_v37 = vadd.f32 %v11309_v39, %v9139_v24  ;;  %v9242_v52 = vpop.f32.mrb[89].mxu1 }
0x1055   : > { %v9243_v44 = vadd.f32 %v9242_v52, %v9139_v24 }
0x1056   : > { %v9314_v3 = vadd.f32 %v9248_v37, %v15112_v25 }
0x1057   : > { %v9313_v46 = vadd.f32 %v9243_v44, %v15110_v4 }
0x1058   : > { %v9328_v0 = vsel %vm411_vm1, %v9314_v3, 0.0 }
0x1059   : > { %9329 = vadd.xlane.f32.xlu0 %v9328_v0  ;;  %v9325_v6 = vsel %vm411_vm1, %v9313_v46, 0.0 }
0x105a   : > { %9326 = vadd.xlane.f32.xlu1 %v9325_v6 }
0x105f   : > { %v11312_v57 = vpop.f32.mrb[90].mxu1 }
0x1060   : > { %v9258_v43 = vadd.f32 %v11312_v57, %v9139_v24  ;;  %v9252_v58 = vpop.f32.mrb[91].mxu1 }
0x1061   : > { %v9253_v36 = vadd.f32 %v9252_v58, %v9139_v24 }
0x1062   : > { %v9316_v32 = vadd.f32 %v9258_v43, %v15157_v28 }
0x1063   : > { %v11315_v2 = vpop.f32.mrb[92].mxu1  ;;  %v15264_v16 = vadd.f32 %v9253_v36, %v15130_v19 }
0x1064   : > { %v9268_v54 = vadd.f32 %v11315_v2, %v9139_v24  ;;  %v9262_v25 = vpop.f32.mrb[93].mxu1  ;;  %v9334_v4 = vsel %vm411_vm1, %v9316_v32, 0.0 }
0x1065   : > { %v9263_v13 = vadd.f32 %v9262_v25, %v9139_v24  ;;  %9335 = vadd.xlane.f32.xlu1 %v9334_v4  ;;  %v9331_v42 = vsel %vm411_vm1, %v15264_v16, 0.0 }
0x1066   : > { %v9318_v56 = vadd.f32 %v9268_v54, %v15172_v47 }
0x1067   : > { %v11318_v60 = vpop.f32.mrb[94].mxu1  ;;  %v15269_v49 = vadd.f32 %v9263_v13, %v15150_v26 }
0x1068   : > { %v9340_v28 = vsel %vm411_vm1, %v9318_v56, 0.0  ;;  %v9278_v14 = vadd.f32 %v11318_v60, %v9139_v24  ;;  %v9272_v19 = vpop.f32.mrb[95].mxu1 }
0x1069   : > { %9332 = vadd.xlane.f32.xlu1 %v9331_v42  ;;  %9341 = vadd.xlane.f32.xlu0 %v9340_v28  ;;  %v9273_v17 = vadd.f32 %v9272_v19, %v9139_v24  ;;  %v9337_v26 = vsel %vm411_vm1, %v15269_v49, 0.0 }
0x106a   : > { %v15275_v18 = vadd.f32 %v9278_v14, %v15196_v20 }
0x106b   : > { %v15278_v63 = vadd.f32 %v9273_v17, %v15185_v12 }
0x106c   : > { %v11321_v47 = vpop.f32.mrb[96].mxu1  ;;  %v9346_v8 = vsel %vm411_vm1, %v15275_v18, 0.0 }
0x106d   : > { %9338 = vadd.xlane.f32.xlu0 %v9337_v26  ;;  %v9343_v33 = vsel %vm411_vm1, %v15278_v63, 0.0  ;;  %v9288_v59 = vadd.f32 %v11321_v47, %v9139_v24  ;;  %v9282_v15 = vpop.f32.mrb[97].mxu1 }
0x106e   : > { %9344 = vadd.xlane.f32.xlu1 %v9343_v33  ;;  %v9283_v48 = vadd.f32 %v9282_v15, %v9139_v24 }
0x106f   : > { %v9322_v20 = vadd.f32 %v9288_v59, %v15216_v38 }
0x1070   : > { %v15288_v12 = vadd.f32 %v9283_v48, %v15198_v27 }
0x1071   : > { %9347 = vadd.xlane.f32.xlu0 %v9346_v8  ;;  %v11324_v21 = vpop.f32.mrb[98].mxu1  ;;  %v9352_v9 = vsel %vm411_vm1, %v9322_v20, 0.0 }
0x1072   : > { %v9292_v5 = vpop.f32.mrb[99].mxu1  ;;  %9353 = vadd.xlane.f32.xlu1 %v9352_v9  ;;  %v9298_v1 = vadd.f32 %v11324_v21, %v9139_v24  ;;  %v9349_v34 = vsel %vm411_vm1, %v15288_v12, 0.0 }
0x1073   : > { %v9293_v22 = vadd.f32 %v9292_v5, %v9139_v24 }
0x1074   : > { %v15297_v38 = vadd.f32 %v9298_v1, %v15230_v40 }
0x1075   : > { %v15292_v35 = vadd.f32 %v9293_v22, %v15224_v10 }
0x1076   : > { %9350 = vadd.xlane.f32.xlu1 %v9349_v34  ;;  %v9358_v51 = vsel %vm411_vm1, %v15297_v38, 0.0 }
0x1077   : > { %v9355_v27 = vsel %vm411_vm1, %v15292_v35, 0.0 }
0x1078   : > { %9356 = vadd.xlane.f32.xlu0 %v9355_v27 }
0x107c   : > { %9359 = vadd.xlane.f32.xlu0 %v9358_v51 }
0x10e6   : > { %v9330_v29 = vpop.xlane.xlu0 %9329 }
0x10e7   : > { %v9362_v31 = vmul.f32 0.03125, %v9330_v29  ;;  %v9327_v23 = vpop.xlane.xlu1 %9326 }
0x10e8   : > { %v9361_v10 = vmul.f32 0.03125, %v9327_v23 }
0x10e9   : > { %v15303_v61 = vsub.f32 %v9314_v3, %v9362_v31 }
0x10ea   : > { %v15305_v62 = vsub.f32 %v9313_v46, %v9361_v10 }
0x10eb   : > { %v9386_v40 = vmul.f32 %v15303_v61, %v15303_v61 }
0x10ec   : > { %v9385_v50 = vmul.f32 %v15305_v62, %v15305_v62 }
0x10ed   : > { %v9400_v7 = vsel %vm411_vm1, %v9386_v40, 0.0 }
0x10ee   : > { %9401 = vadd.xlane.f32.xlu0 %v9400_v7  ;;  %v9397_v11 = vsel %vm411_vm1, %v9385_v50, 0.0  ;;  %v15552_v7 = vsub.s32 5, %v15547_v30 }
0x10ef   : > { %9398 = vadd.xlane.f32.xlu1 %v9397_v11 }
0x10f0   : > { %v15373_v11 = vrot.slane %v15070_v41, %v15552_v7 }
0x10f2   : > { %v9336_v45 = vpop.xlane.xlu1 %9335 }
0x10f3   : > { %v9364_v55 = vmul.f32 0.03125, %v9336_v45 }
0x10f5   : > { %v15313_v53 = vsub.f32 %v9316_v32, %v9364_v55 }
0x10f6   : > { %v9342_v24 = vpop.xlane.xlu0 %9341  ;;  %v9333_v39 = vpop.xlane.xlu1 %9332 }
0x10f7   : > { %v9366_v37 = vmul.f32 0.03125, %v9342_v24  ;;  %v9363_v52 = vmul.f32 0.03125, %v9333_v39  ;;  %v9388_v44 = vmul.f32 %v15313_v53, %v15313_v53  ;;  %v15553_v39 = vsub.s32 6, %v15547_v30 }
0x10f9   : > { %v15317_v3 = vsub.f32 %v9318_v56, %v9366_v37  ;;  %v15320_v46 = vsub.f32 %v15264_v16, %v9363_v52  ;;  %v9406_v0 = vsel %vm411_vm1, %v9388_v44, 0.0  ;;  %v15378_v37 = vrot.slane %v15070_v41, %v15553_v39 }
0x10fa   : > { %v9339_v6 = vpop.xlane.xlu0 %9338  ;;  %9407 = vadd.xlane.f32.xlu1 %v9406_v0 }
0x10fb   : > { %v9365_v57 = vmul.f32 0.03125, %v9339_v6  ;;  %v9390_v43 = vmul.f32 %v15317_v3, %v15317_v3  ;;  %v9387_v58 = vmul.f32 %v15320_v46, %v15320_v46  ;;  %v9345_v36 = vpop.xlane.xlu1 %9344 }
0x10fc   : > { %v9367_v32 = vmul.f32 0.03125, %v9345_v36 }
0x10fd   : > { %v15328_v2 = vsub.f32 %v15269_v49, %v9365_v57  ;;  %v9412_v54 = vsel %vm411_vm1, %v9390_v43, 0.0  ;;  %v9403_v16 = vsel %vm411_vm1, %v9387_v58, 0.0 }
0x10fe   : > { %v9348_v25 = vpop.xlane.xlu0 %9347  ;;  %9413 = vadd.xlane.f32.xlu0 %v9412_v54  ;;  %9404 = vadd.xlane.f32.xlu1 %v9403_v16  ;;  %v15333_v4 = vsub.f32 %v15278_v63, %v9367_v32 }
0x10ff   : > { %v9368_v13 = vmul.f32 0.03125, %v9348_v25  ;;  %v9389_v56 = vmul.f32 %v15328_v2, %v15328_v2  ;;  %v9354_v60 = vpop.xlane.xlu1 %9353 }
0x1100   : > { %v9370_v42 = vmul.f32 0.03125, %v9354_v60  ;;  %v9391_v49 = vmul.f32 %v15333_v4, %v15333_v4 }
0x1101   : > { %v15340_v28 = vsub.f32 %v15275_v18, %v9368_v13  ;;  %v9409_v14 = vsel %vm411_vm1, %v9389_v56, 0.0 }
0x1102   : > { %9410 = vadd.xlane.f32.xlu0 %v9409_v14  ;;  %v15343_v19 = vsub.f32 %v9322_v20, %v9370_v42  ;;  %v9415_v17 = vsel %vm411_vm1, %v9391_v49, 0.0 }
0x1103   : > { %v9392_v63 = vmul.f32 %v15340_v28, %v15340_v28  ;;  %9416 = vadd.xlane.f32.xlu1 %v9415_v17  ;;  %v9351_v26 = vpop.xlane.xlu1 %9350 }
0x1104   : > { %v9369_v47 = vmul.f32 0.03125, %v9351_v26  ;;  %v9394_v33 = vmul.f32 %v15343_v19, %v15343_v19 }
0x1105   : > { %v9418_v59 = vsel %vm411_vm1, %v9392_v63, 0.0  ;;  %v9357_v18 = vpop.xlane.xlu0 %9356 }
0x1106   : > { %9419 = vadd.xlane.f32.xlu0 %v9418_v59  ;;  %v15352_v15 = vsub.f32 %v15288_v12, %v9369_v47  ;;  %v9371_v8 = vmul.f32 0.03125, %v9357_v18  ;;  %v9424_v48 = vsel %vm411_vm1, %v9394_v33, 0.0 }
0x1107   : > { %9425 = vadd.xlane.f32.xlu1 %v9424_v48 }
0x1108   : > { %v15356_v20 = vsub.f32 %v15292_v35, %v9371_v8  ;;  %v9393_v21 = vmul.f32 %v15352_v15, %v15352_v15 }
0x1109   : > { %v9360_v9 = vpop.xlane.xlu0 %9359 }
0x110a   : > { %v9372_v5 = vmul.f32 0.03125, %v9360_v9  ;;  %v9421_v1 = vsel %vm411_vm1, %v9393_v21, 0.0  ;;  %v9395_v22 = vmul.f32 %v15356_v20, %v15356_v20 }
0x110b   : > { %9422 = vadd.xlane.f32.xlu1 %v9421_v1 }
0x110c   : > { %v15364_v12 = vsub.f32 %v15297_v38, %v9372_v5  ;;  %v9427_v34 = vsel %vm411_vm1, %v9395_v22, 0.0 }
0x110d   : > { %9428 = vadd.xlane.f32.xlu0 %v9427_v34 }
0x110e   : > { %v9396_v35 = vmul.f32 %v15364_v12, %v15364_v12 }
0x1110   : > { %v9430_v27 = vsel %vm411_vm1, %v9396_v35, 0.0 }
0x1111   : > { %9431 = vadd.xlane.f32.xlu0 %v9430_v27 }
0x117b   : > { %v9402_v51 = vpop.xlane.xlu0 %9401 }
0x117c   : > { %v9434_v29 = vmul.f32 0.03125, %v9402_v51  ;;  %v9399_v31 = vpop.xlane.xlu1 %9398 }
0x117d   : > { %v9433_v23 = vmul.f32 0.03125, %v9399_v31 }
0x117e   : > { %v9446_v10 = vadd.f32 1e-05, %v9434_v29 }
0x117f   : > { %v9445_v40 = vadd.f32 1e-05, %v9433_v23 }
0x1180   : > { %12186 = vrsqrt.f32 %v9446_v10 }
0x1181   : > { %12188 = vrsqrt.f32 %v9445_v40 }
0x1187   : > { %v9408_v38 = vpop.xlane.xlu1 %9407 }
0x1188   : > { %v9436_v50 = vmul.f32 0.03125, %v9408_v38 }
0x118a   : > { %v12187_v45 = vpop.eup %12186  ;;  %v9448_v55 = vadd.f32 1e-05, %v9436_v50 }
0x118b   : > { %v12189_v24 = vpop.eup %12188  ;;  %v9470_v52 = vmul.f32 %v12187_v45, %v15303_v61  ;;  %v9414_v44 = vpop.xlane.xlu0 %9413 }
0x118c   : > { %v9405_v0 = vpop.xlane.xlu1 %9404  ;;  %v9469_v6 = vmul.f32 %v12189_v24, %v15305_v62  ;;  %12190 = vrsqrt.f32 %v9448_v55  ;;  %v9438_v57 = vmul.f32 0.03125, %v9414_v44 }
0x118d   : > { %v9435_v43 = vmul.f32 0.03125, %v9405_v0  ;;  %v9486_v58 = vmul.f32 %v15373_v11, %v9470_v52 }
0x118e   : > { %v9485_v41 = vmul.f32 %v15373_v11, %v9469_v6  ;;  %v9450_v30 = vadd.f32 1e-05, %v9438_v57 }
0x118f   : > { %v9447_v61 = vadd.f32 1e-05, %v9435_v43  ;;  %v9502_v36 = vadd.f32 %v15378_v37, %v9486_v58  ;;  %v9411_v32 = vpop.xlane.xlu0 %9410 }
0x1190   : > { %v9501_v62 = vadd.f32 %v15378_v37, %v9485_v41  ;;  %12192 = vrsqrt.f32 %v9450_v30  ;;  %v9437_v54 = vmul.f32 0.03125, %v9411_v32  ;;  %v9417_v16 = vpop.xlane.xlu1 %9416 }
0x1191   : > { %9559 = vst.msk [vmem:[%s15387_s29 + $0x8] sm:$0xf] %vm9558_vm9, %v9502_v36  ;;  %12194 = vrsqrt.f32 %v9447_v61  ;;  %v9439_v25 = vmul.f32 0.03125, %v9417_v16  ;;  %v9526_v7 = vcombine.high %v9502_v36, %v9502_v36 }
0x1192   : > { %v9525_v13 = vcombine.high %v9501_v62, %v9501_v62  ;;  %v9449_v56 = vadd.f32 1e-05, %v9437_v54 }
0x1193   : > { %v9420_v60 = vpop.xlane.xlu0 %9419  ;;  %v9451_v42 = vadd.f32 1e-05, %v9439_v25 }
0x1194   : > { %v9541_v49 = vcombine.low %v9501_v62, %v9525_v13  ;;  %12196 = vrsqrt.f32 %v9449_v56  ;;  %v9440_v14 = vmul.f32 0.03125, %v9420_v60  ;;  %v9426_v17 = vpop.xlane.xlu1 %9425 }
0x1195   : > { %12198 = vrsqrt.f32 %v9451_v42  ;;  %v9442_v63 = vmul.f32 0.03125, %v9426_v17 }
0x1196   : > { %v12191_v26 = vpop.eup %12190  ;;  %9557 = vst.msk [vmem:[%s15387_s29] sm:$0xff] %vm411_vm1, %v9541_v49  ;;  %v9452_v47 = vadd.f32 1e-05, %v9440_v14 }
0x1197   : > { %v9472_v33 = vmul.f32 %v12191_v26, %v15313_v53  ;;  %v9454_v59 = vadd.f32 1e-05, %v9442_v63 }
0x1198   : > { %12200 = vrsqrt.f32 %v9452_v47  ;;  %v9423_v18 = vpop.xlane.xlu1 %9422 }
0x1199   : > { %v9488_v8 = vmul.f32 %v15373_v11, %v9472_v33  ;;  %12202 = vrsqrt.f32 %v9454_v59  ;;  %v9441_v48 = vmul.f32 0.03125, %v9423_v18 }
0x119a   : > { %v12193_v21 = vpop.eup %12192  ;;  %v9429_v9 = vpop.xlane.xlu0 %9428 }
0x119b   : > { %v12195_v5 = vpop.eup %12194  ;;  %v9504_v1 = vadd.f32 %v15378_v37, %v9488_v8  ;;  %v9474_v22 = vmul.f32 %v12193_v21, %v15317_v3  ;;  %v9453_v34 = vadd.f32 1e-05, %v9441_v48  ;;  %v9443_v35 = vmul.f32 0.03125, %v9429_v9 }
0x119c   : > { %v9471_v27 = vmul.f32 %v12195_v5, %v15320_v46 }
0x119d   : > { %v9528_v51 = vcombine.high %v9504_v1, %v9504_v1  ;;  %v9490_v53 = vmul.f32 %v15373_v11, %v9474_v22  ;;  %12204 = vrsqrt.f32 %v9453_v34  ;;  %v9455_v29 = vadd.f32 1e-05, %v9443_v35 }
0x119e   : > { %v12197_v31 = vpop.eup %12196  ;;  %v9487_v23 = vmul.f32 %v15373_v11, %v9471_v27  ;;  %v9432_v10 = vpop.xlane.xlu0 %9431 }
0x119f   : > { %v12199_v40 = vpop.eup %12198  ;;  %v9543_v38 = vcombine.low %v9504_v1, %v9528_v51  ;;  %v9506_v50 = vadd.f32 %v15378_v37, %v9490_v53  ;;  %v9473_v3 = vmul.f32 %v12197_v31, %v15328_v2  ;;  %12206 = vrsqrt.f32 %v9455_v29 }
0x11a0   : > { %v9503_v46 = vadd.f32 %v15378_v37, %v9487_v23  ;;  %v9475_v45 = vmul.f32 %v12199_v40, %v15333_v4  ;;  %v9444_v55 = vmul.f32 0.03125, %v9432_v10 }
0x11a1   : > { %9562 = vst.msk [vmem:[%s15387_s29 + $0x20] sm:$0xff] %vm411_vm1, %v9543_v38  ;;  %v9530_v24 = vcombine.high %v9506_v50, %v9506_v50  ;;  %v9489_v39 = vmul.f32 %v15373_v11, %v9473_v3 }
0x11a2   : > { %v12201_v52 = vpop.eup %12200  ;;  %v9527_v44 = vcombine.high %v9503_v46, %v9503_v46  ;;  %v9542_v0 = vcombine.low %v9526_v7, %v9503_v46  ;;  %v9491_v2 = vmul.f32 %v15373_v11, %v9475_v45  ;;  %v9456_v6 = vadd.f32 1e-05, %v9444_v55 }
0x11a3   : > { %v12203_v57 = vpop.eup %12202  ;;  %9565 = vst.msk [vmem:[%s15387_s29 + $0x38] sm:$0xf] %vm9558_vm9, %v9530_v24  ;;  %v9505_v43 = vadd.f32 %v15378_v37, %v9489_v39  ;;  %v9476_v4 = vmul.f32 %v12201_v52, %v15340_v28 }
0x11a4   : > { %9560 = vst.msk [vmem:[%s15387_s29 + $0x10] sm:$0xff] %vm411_vm1, %v9542_v0  ;;  %v9507_v58 = vadd.f32 %v15378_v37, %v9491_v2  ;;  %v9478_v41 = vmul.f32 %v12203_v57, %v15343_v19  ;;  %12208 = vrsqrt.f32 %v9456_v6 }
0x11a5   : > { %9561 = vst.msk [vmem:[%s15387_s29 + $0x18] sm:$0xf] %vm9558_vm9, %v9527_v44  ;;  %v9529_v30 = vcombine.high %v9505_v43, %v9505_v43  ;;  %9563 = vst.msk [vmem:[%s15387_s29 + $0x28] sm:$0xf] %vm9558_vm9, %v9505_v43  ;;  %v9492_v61 = vmul.f32 %v15373_v11, %v9476_v4 }
0x11a6   : > { %v9531_v36 = vcombine.high %v9507_v58, %v9507_v58  ;;  %v9494_v28 = vmul.f32 %v15373_v11, %v9478_v41 }
0x11a7   : > { %v12205_v32 = vpop.eup %12204  ;;  %v9544_v62 = vcombine.low %v9529_v30, %v9506_v50  ;;  %v9508_v54 = vadd.f32 %v15378_v37, %v9492_v61 }
0x11a8   : > { %v9545_v16 = vcombine.low %v9507_v58, %v9531_v36  ;;  %v9510_v25 = vadd.f32 %v15378_v37, %v9494_v28  ;;  %v9477_v19 = vmul.f32 %v12205_v32, %v15352_v15 }
0x11a9   : > { %v12207_v13 = vpop.eup %12206  ;;  %9564 = vst.msk [vmem:[%s15387_s29 + $0x30] sm:$0xff] %vm411_vm1, %v9544_v62  ;;  %v9532_v49 = vcombine.high %v9508_v54, %v9508_v54 }
0x11aa   : > { %9567 = vst.msk [vmem:[%s15387_s29 + $0x48] sm:$0xf] %vm9558_vm9, %v9508_v54  ;;  %v9534_v56 = vcombine.high %v9510_v25, %v9510_v25  ;;  %v9493_v60 = vmul.f32 %v15373_v11, %v9477_v19  ;;  %v9479_v42 = vmul.f32 %v12207_v13, %v15356_v20 }
0x11ab   : > { %9566 = vst.msk [vmem:[%s15387_s29 + $0x40] sm:$0xff] %vm411_vm1, %v9545_v16 }
0x11ac   : > { %v9547_v14 = vcombine.low %v9510_v25, %v9534_v56  ;;  %v9509_v17 = vadd.f32 %v15378_v37, %v9493_v60  ;;  %v9495_v15 = vmul.f32 %v15373_v11, %v9479_v42 }
0x11ae   : > { %v12209_v63 = vpop.eup %12208  ;;  %9570 = vst.msk [vmem:[%s15387_s29 + $0x60] sm:$0xff] %vm411_vm1, %v9547_v14  ;;  %v9533_v26 = vcombine.high %v9509_v17, %v9509_v17  ;;  %v9546_v47 = vcombine.low %v9532_v49, %v9509_v17  ;;  %v9511_v33 = vadd.f32 %v15378_v37, %v9495_v15 }
0x11af   : > { %v9480_v59 = vmul.f32 %v12209_v63, %v15364_v12 }
0x11b0   : > { %9568 = vst.msk [vmem:[%s15387_s29 + $0x50] sm:$0xff] %vm411_vm1, %v9546_v47  ;;  %v9535_v18 = vcombine.high %v9511_v33, %v9511_v33 }
0x11b1   : > { %9569 = vst.msk [vmem:[%s15387_s29 + $0x58] sm:$0xf] %vm9558_vm9, %v9533_v26  ;;  %9571 = vst.msk [vmem:[%s15387_s29 + $0x68] sm:$0xf] %vm9558_vm9, %v9511_v33  ;;  %v9496_v20 = vmul.f32 %v15373_v11, %v9480_v59 }
0x11b3   : > { %v9512_v8 = vadd.f32 %v15378_v37, %v9496_v20 }
0x11b5   : > { %v9536_v48 = vcombine.high %v9512_v8, %v9512_v8  ;;  %v9548_v21 = vcombine.low %v9535_v18, %v9512_v8 }
0x11b7   : > { %9572 = vst.msk [vmem:[%s15387_s29 + $0x70] sm:$0xff] %vm411_vm1, %v9548_v21 }
0x11b8   : > { %9573 = vst.msk [vmem:[%s15387_s29 + $0x78] sm:$0xf] %vm9558_vm9, %v9536_v48 }
0x11b9 PF: > { %s17_s25 = sadd.s32 1, %s12266_s25   ;;  %s15554_s21 = smov %s12258_s23 }
0x11ba   : > { %p14_p7 = scmp.ge.s32.totalorder %s17_s25, 6   ;;  %s15555_s22 = smov %s12262_s24 }
0x11bb   : > { %s15556_s23 = smov %s15559_s26  ;;  %s15557_s24 = smov %s15563_s27 }
0x11bc   :  { %16 = sbr.rel (!%p14_p7) target bundleno = 3 (0x3), region = 94 }

</bundles_post_ra>
